<compile_context>
chip_gen: v7x
topology: tpu7x:2x2x1
jax: 0.10.0
libtpu: 0.0.40
codegen_flags: <defaults>
</compile_context>

<pallas_src>
import jax
import jax.numpy as jnp
import numpy as np
from jax import lax
from jax.experimental import pallas as pl
from jax.experimental.pallas import tpu as pltpu

EPS = 1e-4  # all BatchNorm layers use eps=0.0001

_VMEM = pl.BlockSpec(memory_space=pltpu.MemorySpace.VMEM)
_HIGHEST = lax.Precision.HIGHEST


# ------------------------------ fused kernel -------------------------------

def _fused_forward_kernel(patches_ref, packA_ref, w1_ref, ba1_ref,
                          s2_ref, w2_ref, ba2_ref,
                          s3_ref, w3_ref, ba3_ref,
                          s4_ref, w4_ref, ba4_ref,
                          w5_ref, ba5_ref, w6_ref, b6_ref, o_ref):
    def dot(a, b):
        return jnp.dot(a, b, precision=_HIGHEST,
                       preferred_element_type=jnp.float32)

    def prelu(y, alpha):                    # alpha: (1, C), broadcast over rows
        return jnp.where(y > 0, y, alpha * y)

    def shifted_matmul(s_ref, w_ref, act):
        # conv as a sum of selection dots:  y = sum_kk (S[kk] @ act) @ W[kk]
        acc = dot(dot(s_ref[0], act), w_ref[0])
        for kk in range(1, s_ref.shape[0]):
            acc = acc + dot(dot(s_ref[kk], act), w_ref[kk])
        return acc

    # input BatchNorm2d(4) + PReLU(4), applied on the (row, kk*4+c) patches
    x = patches_ref[...]
    x = prelu(x * packA_ref[0:1, :] + packA_ref[1:2, :], packA_ref[2:3, :])

    # conv1 (4,3) of both branches as one block-diagonal matmul (+BN +PReLU)
    y = prelu(dot(x, w1_ref[...]) + ba1_ref[0:1, :], ba1_ref[1:2, :])

    # conv2 (1,3) of both branches, block-diagonal per shift (+BN +PReLU)
    y = prelu(shifted_matmul(s2_ref, w2_ref, y) + ba2_ref[0:1, :],
              ba2_ref[1:2, :])

    # branch sum folded into conv3 (2,3) via row-tiled weights (+BN +PReLU)
    y = prelu(shifted_matmul(s3_ref, w3_ref, y) + ba3_ref[0:1, :],
              ba3_ref[1:2, :])

    # torch .view(-1, 96) + fc1 fused: per-spatial-position selection dots
    y = prelu(shifted_matmul(s4_ref, w4_ref, y) + ba4_ref[0:1, :],
              ba4_ref[1:2, :])

    # fc2 (+BN +PReLU)
    y = prelu(dot(y, w5_ref[...]) + ba5_ref[0:1, :], ba5_ref[1:2, :])

    # output linear + sigmoid
    o_ref[...] = jax.nn.sigmoid(dot(y, w6_ref[...]) + b6_ref[...])


# --------------------------- host-side preparation --------------------------

def _bn_scale(bn):
    return bn['gamma'] * lax.rsqrt(bn['var'] + EPS)


def _fold_bias(b, bn, scale):
    return (b - bn['mean']) * scale + bn['beta']


def _im2col(x_nhwc, kh, kw):
    N, H, W, C = x_nhwc.shape
    oh, ow = H - kh + 1, W - kw + 1
    cols = [x_nhwc[:, i:i + oh, j:j + ow, :]
            for i in range(kh) for j in range(kw)]
    p = jnp.stack(cols, axis=3)                       # (N, oh, ow, kh*kw, C)
    return p.reshape(N * oh * ow, kh * kw * C)


def _sel(N, IH, IW, KH, KW):
    """Constant 0/1 matrices S[kk]: flattened (n,ih,iw) rows -> (n,oh,ow) rows."""
    OH, OW = IH - KH + 1, IW - KW + 1
    S = np.zeros((KH * KW, N * OH * OW, N * IH * IW), np.float32)
    for ki in range(KH):
        for kj in range(KW):
            kk = ki * KW + kj
            for n in range(N):
                for oh in range(OH):
                    for ow in range(OW):
                        S[kk, (n * OH + oh) * OW + ow,
                              (n * IH + oh + ki) * IW + (ow + kj)] = 1.0
    return jnp.asarray(S)


def prepare_constants(P, N, H, W):
    """Fold eval-mode BN into weights; build block-diagonal & selection mats."""
    C = 4
    OH1, OW1 = H - 4 + 1, W - 3 + 1          # conv1 (4,3)
    OH2, OW2 = OH1, OW1 - 3 + 1              # conv2 (1,3)
    OH3, OW3 = OH2 - 2 + 1, OW2 - 3 + 1      # conv3 (2,3)
    SP = OH3 * OW3                           # spatial positions per sample
    assert 24 * SP == 96, "spatial dims must satisfy torch .view(-1, 96)"

    # input BN + PReLU, tiled over the 12 patch copies of each channel
    s0 = _bn_scale(P['in_bn'])
    t0 = P['in_bn']['beta'] - P['in_bn']['mean'] * s0
    packA = jnp.stack([jnp.tile(s0, 12), jnp.tile(t0, 12),
                       jnp.tile(P['in_alpha'], 12)])             # (3, 48)

    # conv1: block-diagonal (12*4, 24) folded weight (branch b uses chans 2b:2b+2)
    blk = jnp.zeros((12, C, 24), jnp.float32)
    b1, a1 = [], []
    for i in range(2):
        bp = P['branch'][i]
        sc = _bn_scale(bp['bn1'])
        w = jnp.transpose(bp['conv1']['w'], (2, 3, 1, 0)).reshape(12, 2, 12)
        blk = blk.at[:, 2 * i:2 * i + 2, 12 * i:12 * i + 12].set(w * sc)
        b1.append(_fold_bias(bp['conv1']['b'], bp['bn1'], sc))
        a1.append(bp['alpha1'])
    w1 = blk.reshape(12 * C, 24)
    ba1 = jnp.stack([jnp.concatenate(b1), jnp.concatenate(a1)])  # (2, 24)

    # conv2 (1,3): block-diagonal (24, 24) folded weight per kj shift
    S2 = _sel(N, OH1, OW1, 1, 3)
    w2s, b2, a2 = [], [], []
    for i in range(2):
        bp = P['branch'][i]
        sc = _bn_scale(bp['bn2'])
        b2.append(_fold_bias(bp['conv2']['b'], bp['bn2'], sc))
        a2.append(bp['alpha2'])
    for kj in range(3):
        wkk = jnp.zeros((24, 24), jnp.float32)
        for i in range(2):
            bp = P['branch'][i]
            sc = _bn_scale(bp['bn2'])
            wi = bp['conv2']['w'][:, :, 0, kj].T * sc[None, :]   # (12, 12)
            wkk = wkk.at[12 * i:12 * i + 12, 12 * i:12 * i + 12].set(wi)
        w2s.append(wkk)
    w2 = jnp.stack(w2s)                                          # (3, 24, 24)
    ba2 = jnp.stack([jnp.concatenate(b2), jnp.concatenate(a2)])

    # conv3 (2,3): branch sum folded by row-tiling the (12,24) weight to (24,24)
    S3 = _sel(N, OH2, OW2, 2, 3)
    sc3 = _bn_scale(P['bn3'])
    w3s = []
    for ki in range(2):
        for kj in range(3):
            wk = P['conv3']['w'][:, :, ki, kj].T * sc3[None, :]  # (12, 24)
            w3s.append(jnp.concatenate([wk, wk], axis=0))        # (24, 24)
    w3 = jnp.stack(w3s)                                          # (6, 24, 24)
    ba3 = jnp.stack([_fold_bias(P['conv3']['b'], P['bn3'], sc3), P['alpha3']])

    # flatten (torch CHW order) + fc1: one selection + (24,100) weight per
    # spatial position s, with W4[s][c, o] = fc1.w[o, c*SP + s] * bn_scale[o]
    S4 = np.zeros((SP, N, N * SP), np.float32)
    for s in range(SP):
        for n in range(N):
            S4[s, n, n * SP + s] = 1.0
    S4 = jnp.asarray(S4)
    sc4 = _bn_scale(P['bnfc1'])
    wfc1 = P['fc1']['w'] * sc4[:, None]                          # (100, 96)
    w4 = jnp.stack([wfc1[:, s::SP].T for s in range(SP)])        # (4, 24, 100)
    ba4 = jnp.stack([_fold_bias(P['fc1']['b'], P['bnfc1'], sc4), P['alphafc1']])

    # fc2
    sc5 = _bn_scale(P['bnfc2'])
    w5 = (P['fc2']['w'] * sc5[:, None]).T                        # (100, 100)
    ba5 = jnp.stack([_fold_bias(P['fc2']['b'], P['bnfc2'], sc5), P['alphafc2']])

    # output
    w6 = P['out']['w'].T                                         # (100, 3)
    b6 = P['out']['b'].reshape(1, 3)

    return dict(packA=packA, w1=w1, ba1=ba1, S2=S2, w2=w2, ba2=ba2,
                S3=S3, w3=w3, ba3=ba3, S4=S4, w4=w4, ba4=ba4,
                w5=w5, ba5=ba5, w6=w6, b6=b6)


# --------------------------------- forward ----------------------------------

def forward(x_nchw, consts):
    N = x_nchw.shape[0]
    x_nhwc = jnp.transpose(x_nchw, (0, 2, 3, 1))
    patches = _im2col(x_nhwc, 4, 3)                  # (N*OH1*OW1, 12*4)
    args = (patches, consts['packA'], consts['w1'], consts['ba1'],
            consts['S2'], consts['w2'], consts['ba2'],
            consts['S3'], consts['w3'], consts['ba3'],
            consts['S4'], consts['w4'], consts['ba4'],
            consts['w5'], consts['ba5'], consts['w6'], consts['b6'])
    return pl.pallas_call(
        _fused_forward_kernel,
        out_shape=jax.ShapeDtypeStruct((N, 3), jnp.float32),
        in_specs=[_VMEM] * len(args),
        out_specs=_VMEM,
    )(*args)


# ----------------------------- pure-JAX reference ----------------------------

def ref_forward(x, P):
    def bn2d(x, p):
        g = p['gamma'][None, :, None, None]
        b = p['beta'][None, :, None, None]
        m = p['mean'][None, :, None, None]
        v = p['var'][None, :, None, None]
        return (x - m) / jnp.sqrt(v + EPS) * g + b

    def prelu2d(x, a):
        a = a[None, :, None, None]
        return jnp.where(x > 0, x, a * x)

    def conv(x, w, b):
        y = lax.conv_general_dilated(
            x, w, (1, 1), 'VALID',
            dimension_numbers=('NCHW', 'OIHW', 'NCHW'),
            precision=lax.Precision.HIGHEST)
        return y + b[None, :, None, None]

    def bn1d(x, p):
        return (x - p['mean']) / jnp.sqrt(p['var'] + EPS) * p['gamma'] + p['beta']

    def prelu1d(x, a):
        return jnp.where(x > 0, x, a * x)

    x = prelu2d(bn2d(x, P['in_bn']), P['in_alpha'])
    outs = []
    for i in range(2):
        bp = P['branch'][i]
        xi = x[:, 2 * i:2 * i + 2]
        y = prelu2d(bn2d(conv(xi, bp['conv1']['w'], bp['conv1']['b']), bp['bn1']), bp['alpha1'])
        y = prelu2d(bn2d(conv(y, bp['conv2']['w'], bp['conv2']['b']), bp['bn2']), bp['alpha2'])
        outs.append(y)
    m = outs[0] + outs[1]
    y = prelu2d(bn2d(conv(m, P['conv3']['w'], P['conv3']['b']), P['bn3']), P['alpha3'])
    flat = y.reshape(-1, 96)
    mm = lambda a, b: jnp.dot(a, b, precision=lax.Precision.HIGHEST)
    h = prelu1d(bn1d(mm(flat, P['fc1']['w'].T) + P['fc1']['b'], P['bnfc1']), P['alphafc1'])
    h = prelu1d(bn1d(mm(h, P['fc2']['w'].T) + P['fc2']['b'], P['bnfc2']), P['alphafc2'])
    return jax.nn.sigmoid(mm(h, P['out']['w'].T) + P['out']['b'])


# ------------------------------- param init ---------------------------------

def init_params(key):
    keys = iter(jax.random.split(key, 64))
    nxt = lambda: next(keys)

    def conv_p(outc, inc, kh, kw):
        fan_in = inc * kh * kw
        return dict(w=jax.random.normal(nxt(), (outc, inc, kh, kw), jnp.float32)
                    * np.sqrt(2.0 / fan_in),
                    b=jnp.zeros((outc,), jnp.float32))

    def lin_p(outf, inf):
        return dict(w=jax.random.normal(nxt(), (outf, inf), jnp.float32)
                    * np.sqrt(2.0 / inf),
                    b=jnp.zeros((outf,), jnp.float32))

    def bn_p(c):
        return dict(gamma=jax.random.uniform(nxt(), (c,), jnp.float32, 0.5, 1.5),
                    beta=jax.random.normal(nxt(), (c,), jnp.float32) * 0.1,
                    mean=jax.random.normal(nxt(), (c,), jnp.float32) * 0.1,
                    var=jax.random.uniform(nxt(), (c,), jnp.float32, 0.5, 1.5))

    prelu = lambda c: jnp.full((c,), 0.25, jnp.float32)  # torch PReLU default

    return dict(
        in_bn=bn_p(4), in_alpha=prelu(4),
        branch=[dict(conv1=conv_p(12, 2, 4, 3), bn1=bn_p(12), alpha1=prelu(12),
                     conv2=conv_p(12, 12, 1, 3), bn2=bn_p(12), alpha2=prelu(12))
                for _ in range(2)],
        conv3=conv_p(24, 12, 2, 3), bn3=bn_p(24), alpha3=prelu(24),
        fc1=lin_p(100, 96), bnfc1=bn_p(100), alphafc1=prelu(100),
        fc2=lin_p(100, 100), bnfc2=bn_p(100), alphafc2=prelu(100),
        out=lin_p(3, 100),
    )


if __name__ == "__main__":
    key = jax.random.PRNGKey(0)
    k_param, k_x = jax.random.split(key)
    params = init_params(k_param)

    # input: NCHW (batch=2, channels=4, H=6, W=8) so that 24*(H-4)*(W-6) == 96
    N, H, W = 2, 6, 8
    x = jax.random.normal(k_x, (N, 4, H, W), jnp.float32)

    consts = prepare_constants(params, N, H, W)
    fwd = jax.jit(forward)
    out = jax.block_until_ready(fwd(x, consts))
    ref = jax.block_until_ready(ref_forward(x, params))

    assert out.shape == (N, 3), out.shape
    err = float(np.max(np.abs(np.asarray(out) - np.asarray(ref))))
    assert np.allclose(np.asarray(out), np.asarray(ref), atol=1e-3, rtol=1e-3), err
    print("KERNEL_OK")
</pallas_src>

<mosaic_0001>
module attributes {stable_mosaic.version = 11 : i64} {
  func.func @_fused_forward_kernel(%arg0: memref<36x48xf32, #tpu.memory_space<vmem>>, %arg1: memref<3x48xf32, #tpu.memory_space<vmem>>, %arg2: memref<48x24xf32, #tpu.memory_space<vmem>>, %arg3: memref<2x24xf32, #tpu.memory_space<vmem>>, %arg4: memref<3x24x36xf32, #tpu.memory_space<vmem>>, %arg5: memref<3x24x24xf32, #tpu.memory_space<vmem>>, %arg6: memref<2x24xf32, #tpu.memory_space<vmem>>, %arg7: memref<6x8x24xf32, #tpu.memory_space<vmem>>, %arg8: memref<6x24x24xf32, #tpu.memory_space<vmem>>, %arg9: memref<2x24xf32, #tpu.memory_space<vmem>>, %arg10: memref<4x2x8xf32, #tpu.memory_space<vmem>>, %arg11: memref<4x24x100xf32, #tpu.memory_space<vmem>>, %arg12: memref<2x100xf32, #tpu.memory_space<vmem>>, %arg13: memref<100x100xf32, #tpu.memory_space<vmem>>, %arg14: memref<2x100xf32, #tpu.memory_space<vmem>>, %arg15: memref<100x3xf32, #tpu.memory_space<vmem>>, %arg16: memref<1x3xf32, #tpu.memory_space<vmem>>, %arg17: memref<2x3xf32, #tpu.memory_space<vmem>>) attributes {dimension_semantics = [], scalar_prefetch = 0 : i64, scratch_operands = 0 : i64, tpu.core_type = #tpu.core_type<tc>} {
    %c0 = arith.constant 0 : index
    %c0_0 = arith.constant 0 : index
    %0 = vector.load %arg0[%c0, %c0_0] : memref<36x48xf32, #tpu.memory_space<vmem>>, vector<36x48xf32>
    %c0_1 = arith.constant 0 : index
    %c0_2 = arith.constant 0 : index
    %1 = vector.load %arg1[%c0_1, %c0_2] : memref<3x48xf32, #tpu.memory_space<vmem>>, vector<1x48xf32>
    %2 = vector.broadcast %1 : vector<1x48xf32> to vector<36x48xf32>
    %3 = arith.mulf %0, %2 : vector<36x48xf32>
    %c1 = arith.constant 1 : index
    %c0_3 = arith.constant 0 : index
    %4 = vector.load %arg1[%c1, %c0_3] : memref<3x48xf32, #tpu.memory_space<vmem>>, vector<1x48xf32>
    %5 = vector.broadcast %4 : vector<1x48xf32> to vector<36x48xf32>
    %6 = arith.addf %3, %5 : vector<36x48xf32>
    %c2 = arith.constant 2 : index
    %c0_4 = arith.constant 0 : index
    %7 = vector.load %arg1[%c2, %c0_4] : memref<3x48xf32, #tpu.memory_space<vmem>>, vector<1x48xf32>
    %cst = arith.constant 0.000000e+00 : f32
    %8 = vector.broadcast %cst : f32 to vector<36x48xf32>
    %9 = arith.cmpf ogt, %6, %8 : vector<36x48xf32>
    %10 = vector.broadcast %7 : vector<1x48xf32> to vector<36x48xf32>
    %11 = arith.mulf %10, %6 : vector<36x48xf32>
    %12 = arith.select %9, %6, %11 : vector<36x48xi1>, vector<36x48xf32>
    %c0_5 = arith.constant 0 : index
    %c0_6 = arith.constant 0 : index
    %13 = vector.load %arg2[%c0_5, %c0_6] : memref<48x24xf32, #tpu.memory_space<vmem>>, vector<48x24xf32>
    %cst_7 = arith.constant dense<0.000000e+00> : vector<36x24xf32>
    %14 = tpu.matmul %12, %13, %cst_7 {dimension_numbers = #tpu.dot_dimension_numbers<[1], [0], [0], [1], [0, 0, 1, 1], [], []>, precision = #tpu.contract_precision<fp32>} : vector<36x48xf32>, vector<48x24xf32>, vector<36x24xf32> -> vector<36x24xf32>
    %c0_8 = arith.constant 0 : index
    %c0_9 = arith.constant 0 : index
    %15 = vector.load %arg3[%c0_8, %c0_9] : memref<2x24xf32, #tpu.memory_space<vmem>>, vector<1x24xf32>
    %16 = vector.broadcast %15 : vector<1x24xf32> to vector<36x24xf32>
    %17 = arith.addf %14, %16 : vector<36x24xf32>
    %c1_10 = arith.constant 1 : index
    %c0_11 = arith.constant 0 : index
    %18 = vector.load %arg3[%c1_10, %c0_11] : memref<2x24xf32, #tpu.memory_space<vmem>>, vector<1x24xf32>
    %cst_12 = arith.constant 0.000000e+00 : f32
    %19 = vector.broadcast %cst_12 : f32 to vector<36x24xf32>
    %20 = arith.cmpf ogt, %17, %19 : vector<36x24xf32>
    %21 = vector.broadcast %18 : vector<1x24xf32> to vector<36x24xf32>
    %22 = arith.mulf %21, %17 : vector<36x24xf32>
    %23 = arith.select %20, %17, %22 : vector<36x24xi1>, vector<36x24xf32>
    %c0_13 = arith.constant 0 : index
    %c0_14 = arith.constant 0 : index
    %c0_15 = arith.constant 0 : index
    %24 = vector.load %arg4[%c0_13, %c0_14, %c0_15] : memref<3x24x36xf32, #tpu.memory_space<vmem>>, vector<1x24x36xf32>
    %25 = vector.shape_cast %24 : vector<1x24x36xf32> to vector<24x36xf32>
    %cst_16 = arith.constant dense<0.000000e+00> : vector<24x24xf32>
    %26 = tpu.matmul %25, %23, %cst_16 {dimension_numbers = #tpu.dot_dimension_numbers<[1], [0], [0], [1], [0, 0, 1, 1], [], []>, precision = #tpu.contract_precision<fp32>} : vector<24x36xf32>, vector<36x24xf32>, vector<24x24xf32> -> vector<24x24xf32>
    %c0_17 = arith.constant 0 : index
    %c0_18 = arith.constant 0 : index
    %c0_19 = arith.constant 0 : index
    %27 = vector.load %arg5[%c0_17, %c0_18, %c0_19] : memref<3x24x24xf32, #tpu.memory_space<vmem>>, vector<1x24x24xf32>
    %28 = vector.shape_cast %27 : vector<1x24x24xf32> to vector<24x24xf32>
    %cst_20 = arith.constant dense<0.000000e+00> : vector<24x24xf32>
    %29 = tpu.matmul %26, %28, %cst_20 {dimension_numbers = #tpu.dot_dimension_numbers<[1], [0], [0], [1], [0, 0, 1, 1], [], []>, precision = #tpu.contract_precision<fp32>} : vector<24x24xf32>, vector<24x24xf32>, vector<24x24xf32> -> vector<24x24xf32>
    %c1_21 = arith.constant 1 : index
    %c0_22 = arith.constant 0 : index
    %c0_23 = arith.constant 0 : index
    %30 = vector.load %arg4[%c1_21, %c0_22, %c0_23] : memref<3x24x36xf32, #tpu.memory_space<vmem>>, vector<1x24x36xf32>
    %31 = vector.shape_cast %30 : vector<1x24x36xf32> to vector<24x36xf32>
    %cst_24 = arith.constant dense<0.000000e+00> : vector<24x24xf32>
    %32 = tpu.matmul %31, %23, %cst_24 {dimension_numbers = #tpu.dot_dimension_numbers<[1], [0], [0], [1], [0, 0, 1, 1], [], []>, precision = #tpu.contract_precision<fp32>} : vector<24x36xf32>, vector<36x24xf32>, vector<24x24xf32> -> vector<24x24xf32>
    %c1_25 = arith.constant 1 : index
    %c0_26 = arith.constant 0 : index
    %c0_27 = arith.constant 0 : index
    %33 = vector.load %arg5[%c1_25, %c0_26, %c0_27] : memref<3x24x24xf32, #tpu.memory_space<vmem>>, vector<1x24x24xf32>
    %34 = vector.shape_cast %33 : vector<1x24x24xf32> to vector<24x24xf32>
    %cst_28 = arith.constant dense<0.000000e+00> : vector<24x24xf32>
    %35 = tpu.matmul %32, %34, %cst_28 {dimension_numbers = #tpu.dot_dimension_numbers<[1], [0], [0], [1], [0, 0, 1, 1], [], []>, precision = #tpu.contract_precision<fp32>} : vector<24x24xf32>, vector<24x24xf32>, vector<24x24xf32> -> vector<24x24xf32>
    %36 = arith.addf %29, %35 : vector<24x24xf32>
    %c2_29 = arith.constant 2 : index
    %c0_30 = arith.constant 0 : index
    %c0_31 = arith.constant 0 : index
    %37 = vector.load %arg4[%c2_29, %c0_30, %c0_31] : memref<3x24x36xf32, #tpu.memory_space<vmem>>, vector<1x24x36xf32>
    %38 = vector.shape_cast %37 : vector<1x24x36xf32> to vector<24x36xf32>
    %cst_32 = arith.constant dense<0.000000e+00> : vector<24x24xf32>
    %39 = tpu.matmul %38, %23, %cst_32 {dimension_numbers = #tpu.dot_dimension_numbers<[1], [0], [0], [1], [0, 0, 1, 1], [], []>, precision = #tpu.contract_precision<fp32>} : vector<24x36xf32>, vector<36x24xf32>, vector<24x24xf32> -> vector<24x24xf32>
    %c2_33 = arith.constant 2 : index
    %c0_34 = arith.constant 0 : index
    %c0_35 = arith.constant 0 : index
    %40 = vector.load %arg5[%c2_33, %c0_34, %c0_35] : memref<3x24x24xf32, #tpu.memory_space<vmem>>, vector<1x24x24xf32>
    %41 = vector.shape_cast %40 : vector<1x24x24xf32> to vector<24x24xf32>
    %cst_36 = arith.constant dense<0.000000e+00> : vector<24x24xf32>
    %42 = tpu.matmul %39, %41, %cst_36 {dimension_numbers = #tpu.dot_dimension_numbers<[1], [0], [0], [1], [0, 0, 1, 1], [], []>, precision = #tpu.contract_precision<fp32>} : vector<24x24xf32>, vector<24x24xf32>, vector<24x24xf32> -> vector<24x24xf32>
    %43 = arith.addf %36, %42 : vector<24x24xf32>
    %c0_37 = arith.constant 0 : index
    %c0_38 = arith.constant 0 : index
    %44 = vector.load %arg6[%c0_37, %c0_38] : memref<2x24xf32, #tpu.memory_space<vmem>>, vector<1x24xf32>
    %45 = vector.broadcast %44 : vector<1x24xf32> to vector<24x24xf32>
    %46 = arith.addf %43, %45 : vector<24x24xf32>
    %c1_39 = arith.constant 1 : index
    %c0_40 = arith.constant 0 : index
    %47 = vector.load %arg6[%c1_39, %c0_40] : memref<2x24xf32, #tpu.memory_space<vmem>>, vector<1x24xf32>
    %cst_41 = arith.constant 0.000000e+00 : f32
    %48 = vector.broadcast %cst_41 : f32 to vector<24x24xf32>
    %49 = arith.cmpf ogt, %46, %48 : vector<24x24xf32>
    %50 = vector.broadcast %47 : vector<1x24xf32> to vector<24x24xf32>
    %51 = arith.mulf %50, %46 : vector<24x24xf32>
    %52 = arith.select %49, %46, %51 : vector<24x24xi1>, vector<24x24xf32>
    %c0_42 = arith.constant 0 : index
    %c0_43 = arith.constant 0 : index
    %c0_44 = arith.constant 0 : index
    %53 = vector.load %arg7[%c0_42, %c0_43, %c0_44] : memref<6x8x24xf32, #tpu.memory_space<vmem>>, vector<1x8x24xf32>
    %54 = vector.shape_cast %53 : vector<1x8x24xf32> to vector<8x24xf32>
    %cst_45 = arith.constant dense<0.000000e+00> : vector<8x24xf32>
    %55 = tpu.matmul %54, %52, %cst_45 {dimension_numbers = #tpu.dot_dimension_numbers<[1], [0], [0], [1], [0, 0, 1, 1], [], []>, precision = #tpu.contract_precision<fp32>} : vector<8x24xf32>, vector<24x24xf32>, vector<8x24xf32> -> vector<8x24xf32>
    %c0_46 = arith.constant 0 : index
    %c0_47 = arith.constant 0 : index
    %c0_48 = arith.constant 0 : index
    %56 = vector.load %arg8[%c0_46, %c0_47, %c0_48] : memref<6x24x24xf32, #tpu.memory_space<vmem>>, vector<1x24x24xf32>
    %57 = vector.shape_cast %56 : vector<1x24x24xf32> to vector<24x24xf32>
    %cst_49 = arith.constant dense<0.000000e+00> : vector<8x24xf32>
    %58 = tpu.matmul %55, %57, %cst_49 {dimension_numbers = #tpu.dot_dimension_numbers<[1], [0], [0], [1], [0, 0, 1, 1], [], []>, precision = #tpu.contract_precision<fp32>} : vector<8x24xf32>, vector<24x24xf32>, vector<8x24xf32> -> vector<8x24xf32>
    %c1_50 = arith.constant 1 : index
    %c0_51 = arith.constant 0 : index
    %c0_52 = arith.constant 0 : index
    %59 = vector.load %arg7[%c1_50, %c0_51, %c0_52] : memref<6x8x24xf32, #tpu.memory_space<vmem>>, vector<1x8x24xf32>
    %60 = vector.shape_cast %59 : vector<1x8x24xf32> to vector<8x24xf32>
    %cst_53 = arith.constant dense<0.000000e+00> : vector<8x24xf32>
    %61 = tpu.matmul %60, %52, %cst_53 {dimension_numbers = #tpu.dot_dimension_numbers<[1], [0], [0], [1], [0, 0, 1, 1], [], []>, precision = #tpu.contract_precision<fp32>} : vector<8x24xf32>, vector<24x24xf32>, vector<8x24xf32> -> vector<8x24xf32>
    %c1_54 = arith.constant 1 : index
    %c0_55 = arith.constant 0 : index
    %c0_56 = arith.constant 0 : index
    %62 = vector.load %arg8[%c1_54, %c0_55, %c0_56] : memref<6x24x24xf32, #tpu.memory_space<vmem>>, vector<1x24x24xf32>
    %63 = vector.shape_cast %62 : vector<1x24x24xf32> to vector<24x24xf32>
    %cst_57 = arith.constant dense<0.000000e+00> : vector<8x24xf32>
    %64 = tpu.matmul %61, %63, %cst_57 {dimension_numbers = #tpu.dot_dimension_numbers<[1], [0], [0], [1], [0, 0, 1, 1], [], []>, precision = #tpu.contract_precision<fp32>} : vector<8x24xf32>, vector<24x24xf32>, vector<8x24xf32> -> vector<8x24xf32>
    %65 = arith.addf %58, %64 : vector<8x24xf32>
    %c2_58 = arith.constant 2 : index
    %c0_59 = arith.constant 0 : index
    %c0_60 = arith.constant 0 : index
    %66 = vector.load %arg7[%c2_58, %c0_59, %c0_60] : memref<6x8x24xf32, #tpu.memory_space<vmem>>, vector<1x8x24xf32>
    %67 = vector.shape_cast %66 : vector<1x8x24xf32> to vector<8x24xf32>
    %cst_61 = arith.constant dense<0.000000e+00> : vector<8x24xf32>
    %68 = tpu.matmul %67, %52, %cst_61 {dimension_numbers = #tpu.dot_dimension_numbers<[1], [0], [0], [1], [0, 0, 1, 1], [], []>, precision = #tpu.contract_precision<fp32>} : vector<8x24xf32>, vector<24x24xf32>, vector<8x24xf32> -> vector<8x24xf32>
    %c2_62 = arith.constant 2 : index
    %c0_63 = arith.constant 0 : index
    %c0_64 = arith.constant 0 : index
    %69 = vector.load %arg8[%c2_62, %c0_63, %c0_64] : memref<6x24x24xf32, #tpu.memory_space<vmem>>, vector<1x24x24xf32>
    %70 = vector.shape_cast %69 : vector<1x24x24xf32> to vector<24x24xf32>
    %cst_65 = arith.constant dense<0.000000e+00> : vector<8x24xf32>
    %71 = tpu.matmul %68, %70, %cst_65 {dimension_numbers = #tpu.dot_dimension_numbers<[1], [0], [0], [1], [0, 0, 1, 1], [], []>, precision = #tpu.contract_precision<fp32>} : vector<8x24xf32>, vector<24x24xf32>, vector<8x24xf32> -> vector<8x24xf32>
    %72 = arith.addf %65, %71 : vector<8x24xf32>
    %c3 = arith.constant 3 : index
    %c0_66 = arith.constant 0 : index
    %c0_67 = arith.constant 0 : index
    %73 = vector.load %arg7[%c3, %c0_66, %c0_67] : memref<6x8x24xf32, #tpu.memory_space<vmem>>, vector<1x8x24xf32>
    %74 = vector.shape_cast %73 : vector<1x8x24xf32> to vector<8x24xf32>
    %cst_68 = arith.constant dense<0.000000e+00> : vector<8x24xf32>
    %75 = tpu.matmul %74, %52, %cst_68 {dimension_numbers = #tpu.dot_dimension_numbers<[1], [0], [0], [1], [0, 0, 1, 1], [], []>, precision = #tpu.contract_precision<fp32>} : vector<8x24xf32>, vector<24x24xf32>, vector<8x24xf32> -> vector<8x24xf32>
    %c3_69 = arith.constant 3 : index
    %c0_70 = arith.constant 0 : index
    %c0_71 = arith.constant 0 : index
    %76 = vector.load %arg8[%c3_69, %c0_70, %c0_71] : memref<6x24x24xf32, #tpu.memory_space<vmem>>, vector<1x24x24xf32>
    %77 = vector.shape_cast %76 : vector<1x24x24xf32> to vector<24x24xf32>
    %cst_72 = arith.constant dense<0.000000e+00> : vector<8x24xf32>
    %78 = tpu.matmul %75, %77, %cst_72 {dimension_numbers = #tpu.dot_dimension_numbers<[1], [0], [0], [1], [0, 0, 1, 1], [], []>, precision = #tpu.contract_precision<fp32>} : vector<8x24xf32>, vector<24x24xf32>, vector<8x24xf32> -> vector<8x24xf32>
    %79 = arith.addf %72, %78 : vector<8x24xf32>
    %c4 = arith.constant 4 : index
    %c0_73 = arith.constant 0 : index
    %c0_74 = arith.constant 0 : index
    %80 = vector.load %arg7[%c4, %c0_73, %c0_74] : memref<6x8x24xf32, #tpu.memory_space<vmem>>, vector<1x8x24xf32>
    %81 = vector.shape_cast %80 : vector<1x8x24xf32> to vector<8x24xf32>
    %cst_75 = arith.constant dense<0.000000e+00> : vector<8x24xf32>
    %82 = tpu.matmul %81, %52, %cst_75 {dimension_numbers = #tpu.dot_dimension_numbers<[1], [0], [0], [1], [0, 0, 1, 1], [], []>, precision = #tpu.contract_precision<fp32>} : vector<8x24xf32>, vector<24x24xf32>, vector<8x24xf32> -> vector<8x24xf32>
    %c4_76 = arith.constant 4 : index
    %c0_77 = arith.constant 0 : index
    %c0_78 = arith.constant 0 : index
    %83 = vector.load %arg8[%c4_76, %c0_77, %c0_78] : memref<6x24x24xf32, #tpu.memory_space<vmem>>, vector<1x24x24xf32>
    %84 = vector.shape_cast %83 : vector<1x24x24xf32> to vector<24x24xf32>
    %cst_79 = arith.constant dense<0.000000e+00> : vector<8x24xf32>
    %85 = tpu.matmul %82, %84, %cst_79 {dimension_numbers = #tpu.dot_dimension_numbers<[1], [0], [0], [1], [0, 0, 1, 1], [], []>, precision = #tpu.contract_precision<fp32>} : vector<8x24xf32>, vector<24x24xf32>, vector<8x24xf32> -> vector<8x24xf32>
    %86 = arith.addf %79, %85 : vector<8x24xf32>
    %c5 = arith.constant 5 : index
    %c0_80 = arith.constant 0 : index
    %c0_81 = arith.constant 0 : index
    %87 = vector.load %arg7[%c5, %c0_80, %c0_81] : memref<6x8x24xf32, #tpu.memory_space<vmem>>, vector<1x8x24xf32>
    %88 = vector.shape_cast %87 : vector<1x8x24xf32> to vector<8x24xf32>
    %cst_82 = arith.constant dense<0.000000e+00> : vector<8x24xf32>
    %89 = tpu.matmul %88, %52, %cst_82 {dimension_numbers = #tpu.dot_dimension_numbers<[1], [0], [0], [1], [0, 0, 1, 1], [], []>, precision = #tpu.contract_precision<fp32>} : vector<8x24xf32>, vector<24x24xf32>, vector<8x24xf32> -> vector<8x24xf32>
    %c5_83 = arith.constant 5 : index
    %c0_84 = arith.constant 0 : index
    %c0_85 = arith.constant 0 : index
    %90 = vector.load %arg8[%c5_83, %c0_84, %c0_85] : memref<6x24x24xf32, #tpu.memory_space<vmem>>, vector<1x24x24xf32>
    %91 = vector.shape_cast %90 : vector<1x24x24xf32> to vector<24x24xf32>
    %cst_86 = arith.constant dense<0.000000e+00> : vector<8x24xf32>
    %92 = tpu.matmul %89, %91, %cst_86 {dimension_numbers = #tpu.dot_dimension_numbers<[1], [0], [0], [1], [0, 0, 1, 1], [], []>, precision = #tpu.contract_precision<fp32>} : vector<8x24xf32>, vector<24x24xf32>, vector<8x24xf32> -> vector<8x24xf32>
    %93 = arith.addf %86, %92 : vector<8x24xf32>
    %c0_87 = arith.constant 0 : index
    %c0_88 = arith.constant 0 : index
    %94 = vector.load %arg9[%c0_87, %c0_88] : memref<2x24xf32, #tpu.memory_space<vmem>>, vector<1x24xf32>
    %95 = vector.broadcast %94 : vector<1x24xf32> to vector<8x24xf32>
    %96 = arith.addf %93, %95 : vector<8x24xf32>
    %c1_89 = arith.constant 1 : index
    %c0_90 = arith.constant 0 : index
    %97 = vector.load %arg9[%c1_89, %c0_90] : memref<2x24xf32, #tpu.memory_space<vmem>>, vector<1x24xf32>
    %cst_91 = arith.constant 0.000000e+00 : f32
    %98 = vector.broadcast %cst_91 : f32 to vector<8x24xf32>
    %99 = arith.cmpf ogt, %96, %98 : vector<8x24xf32>
    %100 = vector.broadcast %97 : vector<1x24xf32> to vector<8x24xf32>
    %101 = arith.mulf %100, %96 : vector<8x24xf32>
    %102 = arith.select %99, %96, %101 : vector<8x24xi1>, vector<8x24xf32>
    %c0_92 = arith.constant 0 : index
    %c0_93 = arith.constant 0 : index
    %c0_94 = arith.constant 0 : index
    %103 = vector.load %arg10[%c0_92, %c0_93, %c0_94] : memref<4x2x8xf32, #tpu.memory_space<vmem>>, vector<1x2x8xf32>
    %104 = vector.shape_cast %103 : vector<1x2x8xf32> to vector<2x8xf32>
    %cst_95 = arith.constant dense<0.000000e+00> : vector<2x24xf32>
    %105 = tpu.matmul %104, %102, %cst_95 {dimension_numbers = #tpu.dot_dimension_numbers<[1], [0], [0], [1], [0, 0, 1, 1], [], []>, precision = #tpu.contract_precision<fp32>} : vector<2x8xf32>, vector<8x24xf32>, vector<2x24xf32> -> vector<2x24xf32>
    %c0_96 = arith.constant 0 : index
    %c0_97 = arith.constant 0 : index
    %c0_98 = arith.constant 0 : index
    %106 = vector.load %arg11[%c0_96, %c0_97, %c0_98] : memref<4x24x100xf32, #tpu.memory_space<vmem>>, vector<1x24x100xf32>
    %107 = vector.shape_cast %106 : vector<1x24x100xf32> to vector<24x100xf32>
    %cst_99 = arith.constant dense<0.000000e+00> : vector<2x100xf32>
    %108 = tpu.matmul %105, %107, %cst_99 {dimension_numbers = #tpu.dot_dimension_numbers<[1], [0], [0], [1], [0, 0, 1, 1], [], []>, precision = #tpu.contract_precision<fp32>} : vector<2x24xf32>, vector<24x100xf32>, vector<2x100xf32> -> vector<2x100xf32>
    %c1_100 = arith.constant 1 : index
    %c0_101 = arith.constant 0 : index
    %c0_102 = arith.constant 0 : index
    %109 = vector.load %arg10[%c1_100, %c0_101, %c0_102] : memref<4x2x8xf32, #tpu.memory_space<vmem>>, vector<1x2x8xf32>
    %110 = vector.shape_cast %109 : vector<1x2x8xf32> to vector<2x8xf32>
    %cst_103 = arith.constant dense<0.000000e+00> : vector<2x24xf32>
    %111 = tpu.matmul %110, %102, %cst_103 {dimension_numbers = #tpu.dot_dimension_numbers<[1], [0], [0], [1], [0, 0, 1, 1], [], []>, precision = #tpu.contract_precision<fp32>} : vector<2x8xf32>, vector<8x24xf32>, vector<2x24xf32> -> vector<2x24xf32>
    %c1_104 = arith.constant 1 : index
    %c0_105 = arith.constant 0 : index
    %c0_106 = arith.constant 0 : index
    %112 = vector.load %arg11[%c1_104, %c0_105, %c0_106] : memref<4x24x100xf32, #tpu.memory_space<vmem>>, vector<1x24x100xf32>
    %113 = vector.shape_cast %112 : vector<1x24x100xf32> to vector<24x100xf32>
    %cst_107 = arith.constant dense<0.000000e+00> : vector<2x100xf32>
    %114 = tpu.matmul %111, %113, %cst_107 {dimension_numbers = #tpu.dot_dimension_numbers<[1], [0], [0], [1], [0, 0, 1, 1], [], []>, precision = #tpu.contract_precision<fp32>} : vector<2x24xf32>, vector<24x100xf32>, vector<2x100xf32> -> vector<2x100xf32>
    %115 = arith.addf %108, %114 : vector<2x100xf32>
    %c2_108 = arith.constant 2 : index
    %c0_109 = arith.constant 0 : index
    %c0_110 = arith.constant 0 : index
    %116 = vector.load %arg10[%c2_108, %c0_109, %c0_110] : memref<4x2x8xf32, #tpu.memory_space<vmem>>, vector<1x2x8xf32>
    %117 = vector.shape_cast %116 : vector<1x2x8xf32> to vector<2x8xf32>
    %cst_111 = arith.constant dense<0.000000e+00> : vector<2x24xf32>
    %118 = tpu.matmul %117, %102, %cst_111 {dimension_numbers = #tpu.dot_dimension_numbers<[1], [0], [0], [1], [0, 0, 1, 1], [], []>, precision = #tpu.contract_precision<fp32>} : vector<2x8xf32>, vector<8x24xf32>, vector<2x24xf32> -> vector<2x24xf32>
    %c2_112 = arith.constant 2 : index
    %c0_113 = arith.constant 0 : index
    %c0_114 = arith.constant 0 : index
    %119 = vector.load %arg11[%c2_112, %c0_113, %c0_114] : memref<4x24x100xf32, #tpu.memory_space<vmem>>, vector<1x24x100xf32>
    %120 = vector.shape_cast %119 : vector<1x24x100xf32> to vector<24x100xf32>
    %cst_115 = arith.constant dense<0.000000e+00> : vector<2x100xf32>
    %121 = tpu.matmul %118, %120, %cst_115 {dimension_numbers = #tpu.dot_dimension_numbers<[1], [0], [0], [1], [0, 0, 1, 1], [], []>, precision = #tpu.contract_precision<fp32>} : vector<2x24xf32>, vector<24x100xf32>, vector<2x100xf32> -> vector<2x100xf32>
    %122 = arith.addf %115, %121 : vector<2x100xf32>
    %c3_116 = arith.constant 3 : index
    %c0_117 = arith.constant 0 : index
    %c0_118 = arith.constant 0 : index
    %123 = vector.load %arg10[%c3_116, %c0_117, %c0_118] : memref<4x2x8xf32, #tpu.memory_space<vmem>>, vector<1x2x8xf32>
    %124 = vector.shape_cast %123 : vector<1x2x8xf32> to vector<2x8xf32>
    %cst_119 = arith.constant dense<0.000000e+00> : vector<2x24xf32>
    %125 = tpu.matmul %124, %102, %cst_119 {dimension_numbers = #tpu.dot_dimension_numbers<[1], [0], [0], [1], [0, 0, 1, 1], [], []>, precision = #tpu.contract_precision<fp32>} : vector<2x8xf32>, vector<8x24xf32>, vector<2x24xf32> -> vector<2x24xf32>
    %c3_120 = arith.constant 3 : index
    %c0_121 = arith.constant 0 : index
    %c0_122 = arith.constant 0 : index
    %126 = vector.load %arg11[%c3_120, %c0_121, %c0_122] : memref<4x24x100xf32, #tpu.memory_space<vmem>>, vector<1x24x100xf32>
    %127 = vector.shape_cast %126 : vector<1x24x100xf32> to vector<24x100xf32>
    %cst_123 = arith.constant dense<0.000000e+00> : vector<2x100xf32>
    %128 = tpu.matmul %125, %127, %cst_123 {dimension_numbers = #tpu.dot_dimension_numbers<[1], [0], [0], [1], [0, 0, 1, 1], [], []>, precision = #tpu.contract_precision<fp32>} : vector<2x24xf32>, vector<24x100xf32>, vector<2x100xf32> -> vector<2x100xf32>
    %129 = arith.addf %122, %128 : vector<2x100xf32>
    %c0_124 = arith.constant 0 : index
    %c0_125 = arith.constant 0 : index
    %130 = vector.load %arg12[%c0_124, %c0_125] : memref<2x100xf32, #tpu.memory_space<vmem>>, vector<1x100xf32>
    %131 = vector.broadcast %130 : vector<1x100xf32> to vector<2x100xf32>
    %132 = arith.addf %129, %131 : vector<2x100xf32>
    %c1_126 = arith.constant 1 : index
    %c0_127 = arith.constant 0 : index
    %133 = vector.load %arg12[%c1_126, %c0_127] : memref<2x100xf32, #tpu.memory_space<vmem>>, vector<1x100xf32>
    %cst_128 = arith.constant 0.000000e+00 : f32
    %134 = vector.broadcast %cst_128 : f32 to vector<2x100xf32>
    %135 = arith.cmpf ogt, %132, %134 : vector<2x100xf32>
    %136 = vector.broadcast %133 : vector<1x100xf32> to vector<2x100xf32>
    %137 = arith.mulf %136, %132 : vector<2x100xf32>
    %138 = arith.select %135, %132, %137 : vector<2x100xi1>, vector<2x100xf32>
    %c0_129 = arith.constant 0 : index
    %c0_130 = arith.constant 0 : index
    %139 = vector.load %arg13[%c0_129, %c0_130] : memref<100x100xf32, #tpu.memory_space<vmem>>, vector<100x100xf32>
    %cst_131 = arith.constant dense<0.000000e+00> : vector<2x100xf32>
    %140 = tpu.matmul %138, %139, %cst_131 {dimension_numbers = #tpu.dot_dimension_numbers<[1], [0], [0], [1], [0, 0, 1, 1], [], []>, precision = #tpu.contract_precision<fp32>} : vector<2x100xf32>, vector<100x100xf32>, vector<2x100xf32> -> vector<2x100xf32>
    %c0_132 = arith.constant 0 : index
    %c0_133 = arith.constant 0 : index
    %141 = vector.load %arg14[%c0_132, %c0_133] : memref<2x100xf32, #tpu.memory_space<vmem>>, vector<1x100xf32>
    %142 = vector.broadcast %141 : vector<1x100xf32> to vector<2x100xf32>
    %143 = arith.addf %140, %142 : vector<2x100xf32>
    %c1_134 = arith.constant 1 : index
    %c0_135 = arith.constant 0 : index
    %144 = vector.load %arg14[%c1_134, %c0_135] : memref<2x100xf32, #tpu.memory_space<vmem>>, vector<1x100xf32>
    %cst_136 = arith.constant 0.000000e+00 : f32
    %145 = vector.broadcast %cst_136 : f32 to vector<2x100xf32>
    %146 = arith.cmpf ogt, %143, %145 : vector<2x100xf32>
    %147 = vector.broadcast %144 : vector<1x100xf32> to vector<2x100xf32>
    %148 = arith.mulf %147, %143 : vector<2x100xf32>
    %149 = arith.select %146, %143, %148 : vector<2x100xi1>, vector<2x100xf32>
    %c0_137 = arith.constant 0 : index
    %c0_138 = arith.constant 0 : index
    %150 = vector.load %arg15[%c0_137, %c0_138] : memref<100x3xf32, #tpu.memory_space<vmem>>, vector<100x3xf32>
    %cst_139 = arith.constant dense<0.000000e+00> : vector<2x3xf32>
    %151 = tpu.matmul %149, %150, %cst_139 {dimension_numbers = #tpu.dot_dimension_numbers<[1], [0], [0], [1], [0, 0, 1, 1], [], []>, precision = #tpu.contract_precision<fp32>} : vector<2x100xf32>, vector<100x3xf32>, vector<2x3xf32> -> vector<2x3xf32>
    %c0_140 = arith.constant 0 : index
    %c0_141 = arith.constant 0 : index
    %152 = vector.load %arg16[%c0_140, %c0_141] : memref<1x3xf32, #tpu.memory_space<vmem>>, vector<1x3xf32>
    %153 = vector.broadcast %152 : vector<1x3xf32> to vector<2x3xf32>
    %154 = arith.addf %151, %153 : vector<2x3xf32>
    %155 = arith.negf %154 : vector<2x3xf32>
    %156 = math.exp %155 : vector<2x3xf32>
    %cst_142 = arith.constant 1.000000e+00 : f32
    %157 = vector.broadcast %cst_142 : f32 to vector<2x3xf32>
    %158 = arith.addf %157, %156 : vector<2x3xf32>
    %159 = arith.divf %157, %158 : vector<2x3xf32>
    %c0_143 = arith.constant 0 : index
    %c0_144 = arith.constant 0 : index
    %160 = vector.load %arg17[%c0_143, %c0_144] : memref<2x3xf32, #tpu.memory_space<vmem>>, vector<2x3xf32>
    tpu.vector_store %arg17[%c0_143, %c0_144], %159 {strides = array<i32>} : memref<2x3xf32, #tpu.memory_space<vmem>>, vector<2x3xf32>,
    return
  }
}

</mosaic_0001>

<bundles_post_ra>
// kernel: forward.1
= control target key start
LH: loop header
LB: loop body
LE: loop exit
PB: predicated region body
PF: predicated region fallthrough
CT: control target
= control target key end

     0   :  { %s21968_s0 = inlined_call_operand.vmem [shape: f32[36,48], index: 0, kind: input, shape index: {}]   ;;  %s21969_s1 = inlined_call_operand.vmem [shape: f32[3,48], index: 1, kind: input, shape index: {}]   ;;  %s21970_s2 = inlined_call_operand.vmem [shape: f32[48,24], index: 2, kind: input, shape index: {}]   ;;  %s21971_s3 = inlined_call_operand.vmem [shape: f32[2,24], index: 3, kind: input, shape index: {}]   ;;  %s21972_s4 = inlined_call_operand.vmem [shape: f32[3,24,36], index: 4, kind: input, shape index: {}]   ;;  %s21973_s5 = inlined_call_operand.vmem [shape: f32[3,24,24], index: 5, kind: input, shape index: {}]   ;;  %s21974_s6 = inlined_call_operand.vmem [shape: f32[2,24], index: 6, kind: input, shape index: {}]   ;;  %s21975_s7 = inlined_call_operand.vmem [shape: f32[6,8,24], index: 7, kind: input, shape index: {}]   ;;  %s21976_s8 = inlined_call_operand.vmem [shape: f32[6,24,24], index: 8, kind: input, shape index: {}]   ;;  %s21977_s9 = inlined_call_operand.vmem [shape: f32[2,24], index: 9, kind: input, shape index: {}]   ;;  %s21978_s10 = inlined_call_operand.vmem [shape: f32[4,2,8], index: 10, kind: input, shape index: {}]   ;;  %s21979_s11 = inlined_call_operand.vmem [shape: f32[4,24,100], index: 11, kind: input, shape index: {}]   ;;  %s21980_s12 = inlined_call_operand.vmem [shape: f32[2,100], index: 12, kind: input, shape index: {}]   ;;  %s21981_s13 = inlined_call_operand.vmem [shape: f32[100,100], index: 13, kind: input, shape index: {}]   ;;  %s21982_s14 = inlined_call_operand.vmem [shape: f32[2,100], index: 14, kind: input, shape index: {}]   ;;  %s21983_s15 = inlined_call_operand.vmem [shape: f32[100,3], index: 15, kind: input, shape index: {}]   ;;  %s21984_s16 = inlined_call_operand.vmem [shape: f32[1,3], index: 16, kind: input, shape index: {}]   ;;  %s21985_s17 = inlined_call_operand.hbm [shape: f32[2,3], index: 17, kind: output, shape index: {}]  }
   0x1   :  { %21992 = sst [smem:[#allocation5_spill]] %s21968_s0 }
   0x2   :  { %21993 = sst [smem:[#allocation6_spill]] %s21969_s1 }
   0x3   :  { %v102_v0 = vld [vmem:[%s21970_s2] sm:$0xff]  ;;  %v103_v1 = vld [vmem:[%s21970_s2 + $0x8] sm:$0xff]  ;;  %v104_v2 = vld [vmem:[%s21970_s2 + $0x10] sm:$0xff]  ;;  %v19239_v3 = vmov 0.0|0.0   ;;  %vm19240_vm0 = vmmov 0   ;;  %v19241_v10 = vmov 0.0  }
   0x4   :  { %18220 = vmatprep.subr.bf16.mxu0 %v19239_v3  ;;  %v130_v4 = vand.u32 4294901760, %v102_v0  ;;  %v133_v5 = vand.u32 4294901760, %v103_v1  ;;  %v105_v6 = vld [vmem:[%s21970_s2 + $0x18] sm:$0xff]  ;;  %v136_v7 = vand.u32 4294901760, %v104_v2  ;;  %v106_v8 = vld [vmem:[%s21970_s2 + $0x20] sm:$0xff]  ;;  %v107_v9 = vld [vmem:[%s21970_s2 + $0x28] sm:$0xff]  ;;  %16126 = vmatprep.mubr.msk.f32.mxu0 %vm19240_vm0, %v19241_v10 }
   0x5   :  { %v139_v11 = vand.u32 4294901760, %v105_v6  ;;  %v142_v12 = vand.u32 4294901760, %v106_v8  ;;  %v145_v13 = vand.u32 4294901760, %v107_v9  ;;  %s21994_s23 = sld [smem:[#allocation5_spill]]  ;;  %s21995_s26 = sld [smem:[#allocation6_spill]]  ;;  %18274 = vmatprep.subr.bf16.mxu1 %v19239_v3  ;;  %16286 = vmatprep.mubr.msk.f32.mxu1 %vm19240_vm0, %v19241_v10 }
   0x6   :  { %v19365_v16 = vpack.c.bf16 %v133_v5, %v130_v4  ;;  %v19367_v17 = vsub.f32 %v102_v0, %v130_v4  ;;  %v19372_v19 = vsub.f32 %v103_v1, %v133_v5  ;;  %v19376_v21 = vsub.f32 %v104_v2, %v136_v7 }
   0x7   :  { %v19374_v20 = vpack.c.bf16 %v139_v11, %v136_v7  ;;  %v19390_v25 = vsub.f32 %v105_v6, %v139_v11  ;;  %v19392_v26 = vpack.c.bf16 %v145_v13, %v142_v12 }
   0x8   :  { %18222 = vmatpush3.bf16.msra.mxu0 %v19365_v16 }
   0xb   :  { %v57_v14 = vld [vmem:[%s21994_s23] sm:$0xff]  ;;  %v58_v18 = vld [vmem:[%s21994_s23 + $0x8] sm:$0xff]  ;;  %v59_v23 = vld [vmem:[%s21994_s23 + $0x10] sm:$0xff] }
   0xc   :  { %v19360_v15 = vld [vmem:[%s21995_s26] ss:$0 sm:$0xff]  ;;  %v19381_v22 = vld [vmem:[%s21995_s26 + $0x1] ss:$0 sm:$0xff]  ;;  %v60_v24 = vld [vmem:[%s21994_s23 + $0x18] sm:$0xff] }
   0xd   :  { %v67_v27 = vmul.f32 %v19360_v15, %v57_v14  ;;  %v68_v28 = vmul.f32 %v19360_v15, %v58_v18 }
   0xe   :  { %22 = vsyncpa [#allocation3], 0  ;;  %18223 = vmatprep.subr.bf16.mxu0 %v19239_v3  ;;  %v19397_v29 = vsub.f32 %v106_v8, %v142_v12  ;;  %v15139_v30 = vld [vmem:[%s21995_s26 + $0x2] ss:$0 sm:$0xff]  ;;  %v253_v31 = vand.u32 4294901760, %v19367_v17  ;;  %v69_v32 = vmul.f32 %v19360_v15, %v59_v23  ;;  %v70_v33 = vmul.f32 %v19360_v15, %v60_v24  ;;  %s19242_s0 = smov [#allocation2]  }
   0xf   :  { %v19405_v34 = vsub.f32 %v107_v9, %v145_v13  ;;  %v77_v35 = vadd.f32 %v19381_v22, %v67_v27  ;;  %vm113_vm1 = vcmask 392192   ;;  %v78_v36 = vadd.f32 %v19381_v22, %v68_v28  ;;  %18225 = vmatpush3.bf16.msra.mxu0 %v19374_v20  ;;  %v61_v53 = vld [vmem:[%s21994_s23 + $0x20] sm:$0xf]  ;;  %s15129_s30 = sshll.u32 %s19242_s0, 4  ;;  %s15130_s30 = int_to_ptr.vmem [resolvable:$true] %s15129_s30 }
  0x10   :  { %v260_v37 = vand.u32 4294901760, %v19372_v19  ;;  %v79_v38 = vadd.f32 %v19381_v22, %v69_v32  ;;  %v80_v39 = vadd.f32 %v19381_v22, %v70_v33  ;;  %v267_v40 = vand.u32 4294901760, %v19376_v21  ;;  %18226 = vmatprep.subr.bf16.mxu0 %v19239_v3  ;;  %s19215_s18 = scalar_lea.vmem %s15130_s30, 32  ;;  %p19220_p1 = scmp.lt.s32.totalorder %s15130_s30, %s15130_s30 }
  0x11   :  { %vm83_vm2 = vcmp.gt.f32.partialorder %v77_v35, 0.0  ;;  %v92_v41 = vmul.f32 %v15139_v30, %v77_v35  ;;  %vm84_vm3 = vcmp.gt.f32.partialorder %v78_v36, 0.0  ;;  %v93_v42 = vmul.f32 %v15139_v30, %v78_v36  ;;  %p19216_p0 = scmp.ne.s32.totalorder %s15130_s30, %s19215_s18  ;;  %p19221_p2 = scmp.lt.s32.totalorder %s19215_s18, %s19215_s18 }
  0x12   :  { %v254_v43 = vsub.f32 %v19367_v17, %v253_v31  ;;  %vm85_vm4 = vcmp.gt.f32.partialorder %v79_v38, 0.0  ;;  %v94_v44 = vmul.f32 %v15139_v30, %v79_v38  ;;  %v274_v45 = vand.u32 4294901760, %v19390_v25 }
  0x13   :  { %v97_v46 = vsel %vm83_vm2, %v77_v35, %v92_v41  ;;  %v98_v47 = vsel %vm84_vm3, %v78_v36, %v93_v42  ;;  %vm86_vm5 = vcmp.gt.f32.partialorder %v80_v39, 0.0  ;;  %v95_v48 = vmul.f32 %v15139_v30, %v80_v39  ;;  %18228 = vmatpush3.bf16.msra.mxu0 %v19392_v26  ;;  %p19222_p3 = por %p19221_p2, %p19220_p1 }
  0x14   :  { %v115_v49 = vsel %vm113_vm1, %v97_v46, 0  ;;  %v118_v50 = vsel %vm113_vm1, %v98_v47, 0  ;;  %v261_v51 = vsub.f32 %v19372_v19, %v260_v37  ;;  %v99_v52 = vsel %vm85_vm4, %v79_v38, %v94_v44  ;;  %18229 = vmatprep.subr.bf16.mxu0 %v19239_v3 }
  0x15   :  { %v19428_v54 = vand.u32 4294901760, %v115_v49  ;;  %v19430_v55 = vand.u32 4294901760, %v118_v50  ;;  %v121_v56 = vsel %vm113_vm1, %v99_v52, 0  ;;  %v100_v57 = vsel %vm86_vm5, %v80_v39, %v95_v48  ;;  %p19223_p4 = pnand %p19222_p3, %p19216_p0 }
  0x16   :  { %v19434_v58 = vand.u32 4294901760, %v121_v56  ;;  %v124_v59 = vsel %vm113_vm1, %v100_v57, 0  ;;  %v268_v60 = vsub.f32 %v19376_v21, %v267_v40  ;;  %v275_v61 = vsub.f32 %v19390_v25, %v274_v45 }
  0x17   :  { %v19442_v62 = vsub.f32 %v115_v49, %v19428_v54  ;;  %v19445_v63 = vsub.f32 %v118_v50, %v19430_v55  ;;  %v19447_v0 = vand.u32 4294901760, %v124_v59  ;;  %v71_v1 = vmul.f32 %v19360_v15, %v61_v53 }
  0x18   :  { %v255_v2 = vand.u32 4294901760, %v254_v43  ;;  %v262_v4 = vand.u32 4294901760, %v261_v51  ;;  %v19451_v5 = vsub.f32 %v121_v56, %v19434_v58  ;;  %v281_v6 = vand.u32 4294901760, %v19397_v29 }
  0x19   :  { %v202_v7 = vand.u32 4294901760, %v19442_v62  ;;  %v212_v8 = vand.u32 4294901760, %v19445_v63  ;;  %v269_v9 = vand.u32 4294901760, %v268_v60  ;;  %v81_v11 = vadd.f32 %v19381_v22, %v71_v1 }
  0x1a   :  { %v222_v12 = vand.u32 4294901760, %v19451_v5  ;;  %v19459_v13 = vsub.f32 %v124_v59, %v19447_v0  ;;  %v276_v14 = vand.u32 4294901760, %v275_v61  ;;  %v288_v15 = vand.u32 4294901760, %v19405_v34  ;;  %v833_v59 = vld [vmem:[%s21972_s4 + $0x8] sm:$0xff] }
  0x1b   :  { %v203_v18 = vsub.f32 %v19442_v62, %v202_v7  ;;  %v213_v23 = vsub.f32 %v19445_v63, %v212_v8  ;;  %vm87_vm6 = vcmp.gt.f32.partialorder %v81_v11, 0.0  ;;  %v282_v24 = vsub.f32 %v19397_v29, %v281_v6 }
  0x1c   :  { %v18230_v22 = vpack.c.bf16 %v262_v4, %v255_v2  ;;  %v96_v27 = vmul.f32 %v15139_v30, %v81_v11  ;;  %v289_v28 = vsub.f32 %v19405_v34, %v288_v15  ;;  %v223_v33 = vsub.f32 %v19451_v5, %v222_v12 }
  0x1d   :  { %v204_v32 = vand.u32 4294901760, %v203_v18  ;;  %v232_v35 = vand.u32 4294901760, %v19459_v13  ;;  %v18233_v36 = vpack.c.bf16 %v276_v14, %v269_v9  ;;  %v214_v39 = vand.u32 4294901760, %v213_v23 }
  0x1e   :  { %v101_v38 = vsel %vm87_vm6, %v81_v11, %v96_v27  ;;  %v283_v42 = vand.u32 4294901760, %v282_v24  ;;  %v19479_v30 = vpack.c.bf16 %v260_v37, %v253_v31  ;;  %v290_v44 = vand.u32 4294901760, %v289_v28 }
  0x1f   :  { %16127 = vmatmul.mubr.f32.vlgmr.msra.gmra.mrb[0].mxu0 %v204_v32  ;;  %v127_v41 = vsel %vm113_vm1, %v101_v38, 0  ;;  %v19487_v46 = vpack.c.bf16 %v274_v45, %v267_v40  ;;  %v19489_v47 = vpack.c.bf16 %v288_v15, %v281_v6  ;;  %v224_v31 = vand.u32 4294901760, %v223_v33  ;;  %v834_v6 = vld [vmem:[%s21972_s4 + $0x10] sm:$0xff] }
  0x20   :  { %16129 = vmatprep.mubr.msk.f32.mxu0 %vm19240_vm0, %v19241_v10  ;;  %18231 = vmatpush3.bf16.msra.mxu0 %v18230_v22  ;;  %v19483_v43 = vand.u32 4294901760, %v127_v41  ;;  %v233_v37 = vsub.f32 %v19459_v13, %v232_v35  ;;  %v18236_v45 = vpack.c.bf16 %v290_v44, %v283_v42  ;;  %v18239_v52 = vpack.c.bf16 %v19372_v19, %v19367_v17  ;;  %v832_v19 = vld [vmem:[%s21972_s4] sm:$0xff] }
  0x21   :  { %18232 = vmatprep.subr.bf16.mxu0 %v19239_v3  ;;  %v18242_v53 = vpack.c.bf16 %v19390_v25, %v19376_v21  ;;  %v18245_v17 = vpack.c.bf16 %v19405_v34, %v19397_v29  ;;  %vm835_vm7 = vcmask 293888   ;;  %v15141_v21 = vld [vmem:[%s21971_s3 + $0x1] ss:$0 sm:$0xff]  ;;  %vm845_vm12 = vcmask 1043456  }
  0x22   :  { %v19493_v48 = vsub.f32 %v127_v41, %v19483_v43  ;;  %v234_v49 = vand.u32 4294901760, %v233_v37  ;;  %v837_v29 = vsel %vm835_vm7, %v832_v19, 0  ;;  %v843_v15 = vsel %vm835_vm7, %v834_v6, 0  ;;  %v15143_v6 = vld [vmem:[%s21972_s4 + $0x20] sm:$0xff] }
  0x23   :  { %16130 = vmatmul.mubr.f32.gmra.mrb[2].mxu0 %v214_v39  ;;  %v19654_v38 = vand.u32 4294901760, %v843_v15  ;;  %vm2037_vm14 = vcmask 195584   ;;  %vm10118_vm3 = vcmask 64512   ;;  %vm13870_vm6 = vcmask 818176  }
  0x24   :  { %16132 = vmatprep.mubr.msk.f32.mxu0 %vm19240_vm0, %v19241_v10  ;;  %18234 = vmatpush3.bf16.msra.mxu0 %v18233_v36  ;;  %v242_v40 = vand.u32 4294901760, %v19493_v48 }
  0x25   :  { %18235 = vmatprep.subr.bf16.mxu0 %v19239_v3 }
  0x26   :  { %v243_v50 = vsub.f32 %v19493_v48, %v242_v40 }
  0x27   :  { %16133 = vmatmul.mubr.f32.gmra.mrb[4].mxu0 %v224_v31 }
  0x28   :  { %16135 = vmatprep.mubr.msk.f32.mxu0 %vm19240_vm0, %v19241_v10  ;;  %18237 = vmatpush3.bf16.msra.mxu0 %v18236_v45  ;;  %v244_v51 = vand.u32 4294901760, %v243_v50  ;;  %v19663_v50 = vsub.f32 %v843_v15, %v19654_v38 }
  0x29   :  { %18238 = vmatprep.subr.bf16.mxu0 %v19239_v3 }
  0x2b   :  { %16136 = vmatmul.mubr.f32.gmra.mrb[6].mxu0 %v234_v49 }
  0x2c   :  { %16138 = vmatprep.mubr.msk.f32.mxu0 %vm19240_vm0, %v19241_v10 }
  0x2f   :  { %16139 = vmatmul.mubr.f32.gmra.mrb[8].mxu0 %v244_v51 }
  0x30   :  { %16153 = vmatprep.mubr.msk.f32.mxu0 %vm19240_vm0, %v19241_v10 }
  0x33   :  { %16154 = vmatmul.mubr.f32.vlgmr.msra.gmra.mrb[0].mxu0 %v19428_v54 }
  0x34   :  { %16156 = vmatprep.mubr.msk.f32.mxu0 %vm19240_vm0, %v19241_v10  ;;  %18240 = vmatpush3.bf16.msra.mxu0 %v18239_v52 }
  0x35   :  { %18241 = vmatprep.subr.bf16.mxu0 %v19239_v3 }
  0x37   :  { %16157 = vmatmul.mubr.f32.gmra.mrb[2].mxu0 %v19430_v55 }
  0x38   :  { %16159 = vmatprep.mubr.msk.f32.mxu0 %vm19240_vm0, %v19241_v10  ;;  %18243 = vmatpush3.bf16.msra.mxu0 %v18242_v53 }
  0x39   :  { %18244 = vmatprep.subr.bf16.mxu0 %v19239_v3 }
  0x3b   :  { %16160 = vmatmul.mubr.f32.gmra.mrb[4].mxu0 %v19434_v58 }
  0x3c   :  { %16162 = vmatprep.mubr.msk.f32.mxu0 %vm19240_vm0, %v19241_v10  ;;  %18246 = vmatpush3.bf16.msra.mxu0 %v18245_v17 }
  0x3d   :  { %18247 = vmatprep.subr.bf16.mxu0 %v19239_v3 }
  0x3f   :  { %16163 = vmatmul.mubr.f32.gmra.mrb[6].mxu0 %v19447_v0 }
  0x40   :  { %16165 = vmatprep.mubr.msk.f32.mxu0 %vm19240_vm0, %v19241_v10 }
  0x43   :  { %16166 = vmatmul.mubr.f32.gmra.mrb[8].mxu0 %v19483_v43 }
  0x44   :  { %16180 = vmatprep.mubr.msk.f32.mxu0 %vm19240_vm0, %v19241_v10 }
  0x47   :  { %16181 = vmatmul.mubr.f32.vlgmr.msra.gmra.mrb[0].mxu0 %v19442_v62 }
  0x48   :  { %16183 = vmatprep.mubr.msk.f32.mxu0 %vm19240_vm0, %v19241_v10  ;;  %18249 = vmatpush3.bf16.msra.mxu0 %v19365_v16 }
  0x49   :  { %18250 = vmatprep.subr.bf16.mxu0 %v19239_v3 }
  0x4b   :  { %16184 = vmatmul.mubr.f32.gmra.mrb[2].mxu0 %v19445_v63 }
  0x4c   :  { %16186 = vmatprep.mubr.msk.f32.mxu0 %vm19240_vm0, %v19241_v10  ;;  %18252 = vmatpush3.bf16.msra.mxu0 %v19374_v20 }
  0x4d   :  { %18253 = vmatprep.subr.bf16.mxu0 %v19239_v3 }
  0x4f   :  { %16187 = vmatmul.mubr.f32.gmra.mrb[4].mxu0 %v19451_v5 }
  0x50   :  { %16189 = vmatprep.mubr.msk.f32.mxu0 %vm19240_vm0, %v19241_v10  ;;  %18255 = vmatpush3.bf16.msra.mxu0 %v19392_v26 }
  0x51   :  { %18256 = vmatprep.subr.bf16.mxu0 %v19239_v3 }
  0x53   :  { %16190 = vmatmul.mubr.f32.gmra.mrb[6].mxu0 %v19459_v13 }
  0x54   :  { %16192 = vmatprep.mubr.msk.f32.mxu0 %vm19240_vm0, %v19241_v10 }
  0x57   :  { %16193 = vmatmul.mubr.f32.gmra.mrb[8].mxu0 %v19493_v48 }
  0x58   :  { %16207 = vmatprep.mubr.msk.f32.mxu0 %vm19240_vm0, %v19241_v10 }
  0x5b   :  { %16208 = vmatmul.mubr.f32.vlgmr.msra.gmra.mrb[0].mxu0 %v202_v7 }
  0x5c   :  { %16210 = vmatprep.mubr.msk.f32.mxu0 %vm19240_vm0, %v19241_v10  ;;  %18258 = vmatpush3.bf16.msra.mxu0 %v19479_v30 }
  0x5d   :  { %18259 = vmatprep.subr.bf16.mxu0 %v19239_v3 }
  0x5f   :  { %16211 = vmatmul.mubr.f32.gmra.mrb[2].mxu0 %v212_v8 }
  0x60   :  { %16213 = vmatprep.mubr.msk.f32.mxu0 %vm19240_vm0, %v19241_v10  ;;  %18261 = vmatpush3.bf16.msra.mxu0 %v19487_v46 }
  0x61   :  { %18262 = vmatprep.subr.bf16.mxu0 %v19239_v3 }
  0x63   :  { %16214 = vmatmul.mubr.f32.gmra.mrb[4].mxu0 %v222_v12 }
  0x64   :  { %16216 = vmatprep.mubr.msk.f32.mxu0 %vm19240_vm0, %v19241_v10  ;;  %18264 = vmatpush3.bf16.msra.mxu0 %v19489_v47 }
  0x65   :  { %18265 = vmatprep.subr.bf16.mxu0 %v19239_v3 }
  0x67   :  { %16217 = vmatmul.mubr.f32.gmra.mrb[6].mxu0 %v232_v35 }
  0x68   :  { %16219 = vmatprep.mubr.msk.f32.mxu0 %vm19240_vm0, %v19241_v10 }
  0x6b   :  { %16220 = vmatmul.mubr.f32.gmra.mrb[8].mxu0 %v242_v40 }
  0x6c   :  { %16234 = vmatprep.mubr.msk.f32.mxu0 %vm19240_vm0, %v19241_v10 }
  0x6f   :  { %16235 = vmatmul.mubr.f32.vlgmr.msra.gmra.mrb[0].mxu0 %v19428_v54 }
  0x70   :  { %16237 = vmatprep.mubr.msk.f32.mxu0 %vm19240_vm0, %v19241_v10  ;;  %18267 = vmatpush3.bf16.msra.mxu0 %v19365_v16  ;;  %v15140_v16 = vld [vmem:[%s21971_s3] ss:$0 sm:$0xff] }
  0x71   :  { %18268 = vmatprep.subr.bf16.mxu0 %v19239_v3 }
  0x73   :  { %16238 = vmatmul.mubr.f32.gmra.mrb[2].mxu0 %v19430_v55 }
  0x74   :  { %16240 = vmatprep.mubr.msk.f32.mxu0 %vm19240_vm0, %v19241_v10  ;;  %18270 = vmatpush3.bf16.msra.mxu0 %v19374_v20 }
  0x75   :  { %18271 = vmatprep.subr.bf16.mxu0 %v19239_v3 }
  0x77   :  { %16241 = vmatmul.mubr.f32.gmra.mrb[4].mxu0 %v19434_v58 }
  0x78   :  { %16243 = vmatprep.mubr.msk.f32.mxu0 %vm19240_vm0, %v19241_v10  ;;  %18273 = vmatpush3.bf16.msra.mxu0 %v19392_v26 }
  0x79   :  { %18346 = vmatprep.subr.bf16.mxu0 %v19239_v3 }
  0x7b   :  { %16244 = vmatmul.mubr.f32.gmra.mrb[6].mxu0 %v19447_v0 }
  0x7c   :  { %16246 = vmatprep.mubr.msk.f32.mxu0 %vm19240_vm0, %v19241_v10 }
  0x7f   :  { %16247 = vmatmul.mubr.f32.gmra.mrb[8].mxu0 %v19483_v43 }
  0x80   :  { %16261 = vmatprep.mubr.msk.f32.mxu0 %vm19240_vm0, %v19241_v10 }
  0x83   :  { %16262 = vmatmul.mubr.f32.vlgmr.msra.gmra.mrb[0].mxu0 %v19428_v54 }
  0x84   :  { %16264 = vmatprep.mubr.msk.f32.mxu0 %vm19240_vm0, %v19241_v10 }
  0x87   :  { %16265 = vmatmul.mubr.f32.gmra.mrb[2].mxu0 %v19430_v55 }
  0x88   :  { %16267 = vmatprep.mubr.msk.f32.mxu0 %vm19240_vm0, %v19241_v10 }
  0x8b   :  { %16268 = vmatmul.mubr.f32.gmra.mrb[4].mxu0 %v19434_v58  ;;  %v19629_v58 = vand.u32 4294901760, %v837_v29 }
  0x8c   :  { %16270 = vmatprep.mubr.msk.f32.mxu0 %vm19240_vm0, %v19241_v10 }
  0x8d   :  { %v19636_v5 = vsub.f32 %v837_v29, %v19629_v58 }
  0x8f   :  { %16271 = vmatmul.mubr.f32.gmra.mrb[6].mxu0 %v19447_v0  ;;  %v840_v0 = vsel %vm835_vm7, %v833_v59, 0  ;;  %v921_v22 = vand.u32 4294901760, %v19636_v5 }
  0x90   :  { %16273 = vmatprep.mubr.msk.f32.mxu0 %vm19240_vm0, %v19241_v10  ;;  %v19641_v11 = vand.u32 4294901760, %v840_v0 }
  0x91   :  { %v922_v47 = vsub.f32 %v19636_v5, %v921_v22 }
  0x92   :  { %v19652_v36 = vsub.f32 %v840_v0, %v19641_v11 }
  0x93   :  { %16274 = vmatmul.mubr.f32.gmra.mrb[8].mxu0 %v19483_v43 }
  0x94   :  { %16510 = vmatprep.mubr.msk.f32.mxu0 %vm19240_vm0, %v19241_v10  ;;  %v931_v49 = vand.u32 4294901760, %v19652_v36 }
  0x96   :  { %v932_v29 = vsub.f32 %v19652_v36, %v931_v49 }
 0x156   :  { %v784_v20 = vpop.f32.mrb[0].mxu0 }
 0x157   :  { %v18940_v25 = vadd.f32 %v15140_v16, %v784_v20  ;;  %v16263_v26 = vpop.f32.mrb[1].mxu0 }
 0x158   :  { %v923_v26 = vand.u32 4294901760, %v922_v47 }
 0x159   :  { %vm813_vm8 = vcmp.gt.f32.partialorder %v18940_v25, 0.0  ;;  %v822_v34 = vmul.f32 %v18940_v25, %v15141_v21 }
 0x15a   :  { %v790_v54 = vpop.f32.mrb[2].mxu0 }
 0x15b   :  { %v827_v55 = vsel %vm813_vm8, %v18940_v25, %v822_v34  ;;  %v18941_v56 = vadd.f32 %v15140_v16, %v790_v54  ;;  %v16266_v57 = vpop.f32.mrb[3].mxu0  ;;  %v941_v34 = vand.u32 4294901760, %v19663_v50 }
 0x15c   :  { %v850_v60 = vand.u32 4294901760, %v827_v55 }
 0x15d   :  { %vm814_vm9 = vcmp.gt.f32.partialorder %v18941_v56, 0.0  ;;  %v823_v61 = vmul.f32 %v18941_v56, %v15141_v21 }
 0x15e   :  { %v951_v62 = vsub.f32 %v827_v55, %v850_v60  ;;  %v796_v63 = vpop.f32.mrb[4].mxu0 }
 0x15f   :  { %v828_v1 = vsel %vm814_vm9, %v18941_v56, %v823_v61  ;;  %v18942_v2 = vadd.f32 %v15140_v16, %v796_v63  ;;  %v16269_v4 = vpop.f32.mrb[5].mxu0  ;;  %v942_v61 = vsub.f32 %v19663_v50, %v941_v34 }
 0x160   :  { %v952_v7 = vand.u32 4294901760, %v951_v62  ;;  %v853_v8 = vand.u32 4294901760, %v828_v1  ;;  %v15142_v4 = vld [vmem:[%s21972_s4 + $0x18] sm:$0xff] }
 0x161   :  { %vm815_vm10 = vcmp.gt.f32.partialorder %v18942_v2, 0.0  ;;  %v824_v9 = vmul.f32 %v18942_v2, %v15141_v21 }
 0x162   :  { %v19643_v12 = vpack.c.bf16 %v853_v8, %v850_v60  ;;  %v958_v13 = vsub.f32 %v828_v1, %v853_v8  ;;  %v802_v14 = vpop.f32.mrb[6].mxu0  ;;  %v953_v32 = vsub.f32 %v951_v62, %v952_v7  ;;  %v933_v60 = vand.u32 4294901760, %v932_v29 }
 0x163   :  { %v829_v18 = vsel %vm815_vm10, %v18942_v2, %v824_v9  ;;  %v18943_v23 = vadd.f32 %v15140_v16, %v802_v14  ;;  %v16272_v24 = vpop.f32.mrb[7].mxu0  ;;  %v943_v1 = vand.u32 4294901760, %v942_v61  ;;  %v1444_v8 = vsel %vm835_vm7, %v15143_v6, 0  ;;  %v15144_v9 = vld [vmem:[%s21972_s4 + $0x28] sm:$0xff] }
 0x164   :  { %v959_v27 = vand.u32 4294901760, %v958_v13  ;;  %v856_v28 = vand.u32 4294901760, %v829_v18  ;;  %18276 = vmatpush3.bf16.msra.mxu1 %v19643_v12  ;;  %v19648_v33 = vpack.c.bf16 %v958_v13, %v951_v62  ;;  %v954_v37 = vand.u32 4294901760, %v953_v32 }
 0x165   :  { %vm816_vm11 = vcmp.gt.f32.partialorder %v18943_v23, 0.0  ;;  %v825_v35 = vmul.f32 %v18943_v23, %v15141_v21  ;;  %18277 = vmatprep.subr.bf16.mxu1 %v19239_v3  ;;  %v19782_v14 = vand.u32 4294901760, %v1444_v8  ;;  %v1447_v15 = vsel %vm835_vm7, %v15144_v9, 0 }
 0x166   :  { %v965_v39 = vsub.f32 %v829_v18, %v856_v28  ;;  %v808_v41 = vpop.f32.mrb[8].mxu0  ;;  %v960_v42 = vsub.f32 %v958_v13, %v959_v27  ;;  %v19656_v30 = vpack.c.bf16 %v959_v27, %v952_v7  ;;  %v19792_v24 = vand.u32 4294901760, %v1447_v15 }
 0x167   :  { %v830_v43 = vsel %vm816_vm11, %v18943_v23, %v825_v35  ;;  %v18944_v44 = vadd.f32 %v15140_v16, %v808_v41  ;;  %v16275_v46 = vpop.f32.mrb[9].mxu0  ;;  %v1530_v23 = vsub.f32 %v1444_v8, %v19782_v14  ;;  %v15146_v41 = vld [vmem:[%s21973_s5 + $0x20] sm:$0xff] }
 0x168   :  { %v966_v48 = vand.u32 4294901760, %v965_v39  ;;  %v859_v31 = vand.u32 4294901760, %v830_v43  ;;  %v961_v40 = vand.u32 4294901760, %v960_v42 }
 0x169   :  { %vm817_vm13 = vcmp.gt.f32.partialorder %v18944_v44, 0.0  ;;  %v826_v45 = vmul.f32 %v18944_v44, %v15141_v21  ;;  %v1531_v27 = vand.u32 4294901760, %v1530_v23 }
 0x16a   :  { %v19665_v51 = vpack.c.bf16 %v859_v31, %v856_v28  ;;  %v972_v52 = vsub.f32 %v830_v43, %v859_v31  ;;  %v19667_v53 = vpack.c.bf16 %v961_v40, %v954_v37  ;;  %v967_v20 = vsub.f32 %v965_v39, %v966_v48 }
 0x16b   :  { %v831_v17 = vsel %vm817_vm13, %v18944_v44, %v826_v45  ;;  %v1532_v32 = vsub.f32 %v1530_v23, %v1531_v27  ;;  %v2051_v43 = vand.u32 4294901760, %v15146_v41 }
 0x16c   :  { %v973_v16 = vand.u32 4294901760, %v972_v52  ;;  %v847_v19 = vsel %vm845_vm12, %v831_v17, 0  ;;  %18279 = vmatpush3.bf16.msra.mxu1 %v19665_v51  ;;  %v19671_v25 = vpack.c.bf16 %v972_v52, %v965_v39  ;;  %v968_v57 = vand.u32 4294901760, %v967_v20  ;;  %v15145_v39 = vld [vmem:[%s21973_s5 + $0x18] sm:$0xff] }
 0x16d   :  { %v19673_v21 = vand.u32 4294901760, %v847_v19  ;;  %16284 = vmatprep.subr.mxu1 %v19241_v10  ;;  %v2048_v42 = vand.u32 4294901760, %v15145_v39  ;;  %v2154_v46 = vsub.f32 %v15146_v41, %v2051_v43 }
 0x16e   :  { %v974_v54 = vsub.f32 %v972_v52, %v973_v16  ;;  %v19680_v55 = vpack.c.bf16 %v973_v16, %v966_v48  ;;  %v15147_v48 = vld [vmem:[%s21973_s5 + $0x28] sm:$0xff] }
 0x16f   :  { %v19683_v56 = vsub.f32 %v847_v19, %v19673_v21  ;;  %v2147_v44 = vsub.f32 %v15145_v39, %v2048_v42  ;;  %v19895_v31 = vand.u32 4294901760, %v15147_v48  ;;  %v19899_v40 = vpack.c.bf16 %v2051_v43, %v2048_v42 }
 0x170   :  { %16285 = vmatpush3.msra.mxu1 %v19673_v21  ;;  %v975_v59 = vand.u32 4294901760, %v974_v54 }
 0x171   :  { %16287 = vmatmul.mubr.f32.vlgmr.msra.gmra.mrb[0].mxu1 %v923_v26  ;;  %18280 = vmatprep.subr.bf16.mxu1 %v19239_v3  ;;  %v19689_v62 = vand.u32 4294901760, %v19683_v56  ;;  %v18353_v47 = vpack.c.bf16 %v2154_v46, %v2147_v44  ;;  %v2161_v37 = vsub.f32 %v15147_v48, %v19895_v31  ;;  %v2148_v45 = vand.u32 4294901760, %v2147_v44 }
 0x172   :  { %18282 = vmatpush3.bf16.msra.mxu1 %v19667_v53  ;;  %16289 = vmatprep.mubr.msk.f32.mxu1 %vm19240_vm0, %v19241_v10  ;;  %v19694_v63 = vpack.c.bf16 %v975_v59, %v968_v57 }
 0x173   :  { %18283 = vmatprep.subr.bf16.mxu1 %v19239_v3  ;;  %v981_v0 = vsub.f32 %v19683_v56, %v19689_v62  ;;  %18348 = vmatpush3.bf16.msra.mxu0 %v19899_v40  ;;  %v2149_v52 = vsub.f32 %v2147_v44, %v2148_v45 }
 0x174   :  { %16508 = vmatprep.subr.mxu0 %v19241_v10 }
 0x175   :  { %16290 = vmatmul.mubr.f32.gmra.mrb[2].mxu1 %v933_v60  ;;  %v19703_v2 = vand.u32 4294901760, %v981_v0  ;;  %v2150_v16 = vand.u32 4294901760, %v2149_v52 }
 0x176   :  { %18285 = vmatpush3.bf16.msra.mxu1 %v19694_v63  ;;  %16292 = vmatprep.mubr.msk.f32.mxu1 %vm19240_vm0, %v19241_v10 }
 0x177   :  { %16303 = vmatprep.subr.mxu1 %v19241_v10  ;;  %16509 = vmatpush3.msra.mxu0 %v19895_v31 }
 0x178   :  { %18349 = vmatprep.subr.bf16.mxu0 %v19239_v3 }
 0x179   :  { %16293 = vmatmul.mubr.f32.gmra.mrb[4].mxu1 %v943_v1 }
 0x17a   :  { %16304 = vmatpush3.msra.mxu1 %v19703_v2  ;;  %16305 = vmatprep.mubr.msk.f32.mxu1 %vm19240_vm0, %v19241_v10 }
 0x17b   :  { %18286 = vmatprep.subr.bf16.mxu1 %v19239_v3 }
 0x17d   :  { %16306 = vmatmul.mubr.f32.vlgmr.msra.gmra.mrb[0].mxu1 %v19629_v58 }
 0x17e   :  { %18288 = vmatpush3.bf16.msra.mxu1 %v19648_v33  ;;  %16308 = vmatprep.mubr.msk.f32.mxu1 %vm19240_vm0, %v19241_v10 }
 0x17f   :  { %18289 = vmatprep.subr.bf16.mxu1 %v19239_v3 }
 0x181   :  { %16309 = vmatmul.mubr.f32.gmra.mrb[2].mxu1 %v19641_v11 }
 0x182   :  { %18291 = vmatpush3.bf16.msra.mxu1 %v19671_v25  ;;  %16311 = vmatprep.mubr.msk.f32.mxu1 %vm19240_vm0, %v19241_v10 }
 0x183   :  { %16322 = vmatprep.subr.mxu1 %v19241_v10 }
 0x185   :  { %16312 = vmatmul.mubr.f32.gmra.mrb[4].mxu1 %v19654_v38 }
 0x186   :  { %16323 = vmatpush3.msra.mxu1 %v19683_v56  ;;  %16324 = vmatprep.mubr.msk.f32.mxu1 %vm19240_vm0, %v19241_v10 }
 0x187   :  { %18292 = vmatprep.subr.bf16.mxu1 %v19239_v3 }
 0x189   :  { %16325 = vmatmul.mubr.f32.vlgmr.msra.gmra.mrb[0].mxu1 %v19636_v5  ;;  %v1441_v5 = vsel %vm835_vm7, %v15142_v4, 0 }
 0x18a   :  { %18294 = vmatpush3.bf16.msra.mxu1 %v19643_v12  ;;  %16327 = vmatprep.mubr.msk.f32.mxu1 %vm19240_vm0, %v19241_v10  ;;  %v19768_v7 = vand.u32 4294901760, %v1441_v5 }
 0x18b   :  { %18295 = vmatprep.subr.bf16.mxu1 %v19239_v3 }
 0x18c   :  { %v19780_v13 = vsub.f32 %v1441_v5, %v19768_v7 }
 0x18d   :  { %16328 = vmatmul.mubr.f32.gmra.mrb[2].mxu1 %v19652_v36 }
 0x18e   :  { %18297 = vmatpush3.bf16.msra.mxu1 %v19665_v51  ;;  %16330 = vmatprep.mubr.msk.f32.mxu1 %vm19240_vm0, %v19241_v10  ;;  %v1521_v18 = vand.u32 4294901760, %v19780_v13 }
 0x18f   :  { %16341 = vmatprep.subr.mxu1 %v19241_v10 }
 0x191   :  { %16331 = vmatmul.mubr.f32.gmra.mrb[4].mxu1 %v19663_v50 }
 0x192   :  { %16342 = vmatpush3.msra.mxu1 %v19673_v21  ;;  %16343 = vmatprep.mubr.msk.f32.mxu1 %vm19240_vm0, %v19241_v10 }
 0x193   :  { %18298 = vmatprep.subr.bf16.mxu1 %v19239_v3 }
 0x195   :  { %16344 = vmatmul.mubr.f32.vlgmr.msra.gmra.mrb[0].mxu1 %v921_v22  ;;  %v1522_v22 = vsub.f32 %v19780_v13, %v1521_v18 }
 0x196   :  { %18300 = vmatpush3.bf16.msra.mxu1 %v19656_v30  ;;  %16346 = vmatprep.mubr.msk.f32.mxu1 %vm19240_vm0, %v19241_v10 }
 0x197   :  { %18301 = vmatprep.subr.bf16.mxu1 %v19239_v3  ;;  %v1523_v28 = vand.u32 4294901760, %v1522_v22 }
 0x199   :  { %16347 = vmatmul.mubr.f32.gmra.mrb[2].mxu1 %v931_v49  ;;  %v2155_v49 = vand.u32 4294901760, %v2154_v46 }
 0x19a   :  { %18303 = vmatpush3.bf16.msra.mxu1 %v19680_v55  ;;  %16349 = vmatprep.mubr.msk.f32.mxu1 %vm19240_vm0, %v19241_v10 }
 0x19b   :  { %16360 = vmatprep.subr.mxu1 %v19241_v10  ;;  %v18359_v50 = vpack.c.bf16 %v2155_v49, %v2148_v45  ;;  %v2156_v17 = vsub.f32 %v2154_v46, %v2155_v49 }
 0x19d   :  { %16350 = vmatmul.mubr.f32.gmra.mrb[4].mxu1 %v941_v34  ;;  %v2157_v19 = vand.u32 4294901760, %v2156_v17 }
 0x19e   :  { %16361 = vmatpush3.msra.mxu1 %v19689_v62  ;;  %16362 = vmatprep.mubr.msk.f32.mxu1 %vm19240_vm0, %v19241_v10 }
 0x19f   :  { %18304 = vmatprep.subr.bf16.mxu1 %v19239_v3  ;;  %v18350_v20 = vpack.c.bf16 %v2157_v19, %v2150_v16 }
 0x1a1   :  { %16363 = vmatmul.mubr.f32.vlgmr.msra.gmra.mrb[0].mxu1 %v19629_v58 }
 0x1a2   :  { %18306 = vmatpush3.bf16.msra.mxu1 %v19643_v12  ;;  %16365 = vmatprep.mubr.msk.f32.mxu1 %vm19240_vm0, %v19241_v10 }
 0x1a3   :  { %18307 = vmatprep.subr.bf16.mxu1 %v19239_v3 }
 0x1a5   :  { %16366 = vmatmul.mubr.f32.gmra.mrb[2].mxu1 %v19641_v11 }
 0x1a6   :  { %18309 = vmatpush3.bf16.msra.mxu1 %v19665_v51  ;;  %16368 = vmatprep.mubr.msk.f32.mxu1 %vm19240_vm0, %v19241_v10 }
 0x1a7   :  { %16379 = vmatprep.subr.mxu1 %v19241_v10 }
 0x1a9   :  { %16369 = vmatmul.mubr.f32.gmra.mrb[4].mxu1 %v19654_v38 }
 0x1aa   :  { %16380 = vmatpush3.msra.mxu1 %v19673_v21  ;;  %16381 = vmatprep.mubr.msk.f32.mxu1 %vm19240_vm0, %v19241_v10 }
 0x1ab   :  { %18310 = vmatprep.subr.bf16.mxu1 %v19239_v3 }
 0x1ad   :  { %16382 = vmatmul.mubr.f32.vlgmr.msra.gmra.mrb[0].mxu1 %v19629_v58  ;;  %v1540_v58 = vsub.f32 %v1447_v15, %v19792_v24 }
 0x1ae   :  { %18312 = vmatpush3.bf16.msra.mxu1 %v19643_v12  ;;  %16384 = vmatprep.mubr.msk.f32.mxu1 %vm19240_vm0, %v19241_v10 }
 0x1af   :  { %18313 = vmatprep.subr.bf16.mxu1 %v19239_v3  ;;  %v1541_v35 = vand.u32 4294901760, %v1540_v58 }
 0x1b1   :  { %16385 = vmatmul.mubr.f32.gmra.mrb[2].mxu1 %v19641_v11  ;;  %v1533_v11 = vand.u32 4294901760, %v1532_v32  ;;  %v1542_v36 = vsub.f32 %v1540_v58, %v1541_v35 }
 0x1b2   :  { %18315 = vmatpush3.bf16.msra.mxu1 %v19665_v51  ;;  %16387 = vmatprep.mubr.msk.f32.mxu1 %vm19240_vm0, %v19241_v10 }
 0x1b3   :  { %16398 = vmatprep.subr.mxu1 %v19241_v10 }
 0x1b5   :  { %16388 = vmatmul.mubr.f32.gmra.mrb[4].mxu1 %v19654_v38  ;;  %v1543_v38 = vand.u32 4294901760, %v1542_v36 }
 0x1b6   :  { %16399 = vmatpush3.msra.mxu1 %v19673_v21  ;;  %16400 = vmatprep.mubr.msk.f32.mxu1 %vm19240_vm0, %v19241_v10 }
 0x1b7   :  { %18316 = vmatprep.subr.bf16.mxu1 %v19239_v3 }
 0x1b9   :  { %16401 = vmatmul.mubr.f32.vlgmr.msra.gmra.mrb[6].mxu1 %v1523_v28 }
 0x1ba   :  { %18318 = vmatpush3.bf16.msra.mxu1 %v19667_v53  ;;  %16403 = vmatprep.mubr.msk.f32.mxu1 %vm19240_vm0, %v19241_v10 }
 0x1bb   :  { %18319 = vmatprep.subr.bf16.mxu1 %v19239_v3 }
 0x1bd   :  { %16404 = vmatmul.mubr.f32.gmra.mrb[8].mxu1 %v1533_v11 }
 0x1be   :  { %18321 = vmatpush3.bf16.msra.mxu1 %v19694_v63  ;;  %16406 = vmatprep.mubr.msk.f32.mxu1 %vm19240_vm0, %v19241_v10 }
 0x1bf   :  { %16417 = vmatprep.subr.mxu1 %v19241_v10 }
 0x1c1   :  { %16407 = vmatmul.mubr.f32.gmra.mrb[10].mxu1 %v1543_v38 }
 0x1c2   :  { %16418 = vmatpush3.msra.mxu1 %v19703_v2  ;;  %16419 = vmatprep.mubr.msk.f32.mxu1 %vm19240_vm0, %v19241_v10 }
 0x1c3   :  { %18322 = vmatprep.subr.bf16.mxu1 %v19239_v3 }
 0x1c5   :  { %16420 = vmatmul.mubr.f32.vlgmr.msra.gmra.mrb[6].mxu1 %v19768_v7 }
 0x1c6   :  { %18324 = vmatpush3.bf16.msra.mxu1 %v19648_v33  ;;  %16422 = vmatprep.mubr.msk.f32.mxu1 %vm19240_vm0, %v19241_v10 }
 0x1c7   :  { %18325 = vmatprep.subr.bf16.mxu1 %v19239_v3 }
 0x1c9   :  { %16423 = vmatmul.mubr.f32.gmra.mrb[8].mxu1 %v19782_v14 }
 0x1ca   :  { %18327 = vmatpush3.bf16.msra.mxu1 %v19671_v25  ;;  %16425 = vmatprep.mubr.msk.f32.mxu1 %vm19240_vm0, %v19241_v10 }
 0x1cb   :  { %16436 = vmatprep.subr.mxu1 %v19241_v10 }
 0x1cd   :  { %16426 = vmatmul.mubr.f32.gmra.mrb[10].mxu1 %v19792_v24 }
 0x1ce   :  { %16437 = vmatpush3.msra.mxu1 %v19683_v56  ;;  %16438 = vmatprep.mubr.msk.f32.mxu1 %vm19240_vm0, %v19241_v10 }
 0x1cf   :  { %18328 = vmatprep.subr.bf16.mxu1 %v19239_v3 }
 0x1d1   :  { %16439 = vmatmul.mubr.f32.vlgmr.msra.gmra.mrb[6].mxu1 %v19780_v13  ;;  %v2162_v13 = vand.u32 4294901760, %v2161_v37 }
 0x1d2   :  { %18330 = vmatpush3.bf16.msra.mxu1 %v19643_v12  ;;  %16441 = vmatprep.mubr.msk.f32.mxu1 %vm19240_vm0, %v19241_v10 }
 0x1d3   :  { %18331 = vmatprep.subr.bf16.mxu1 %v19239_v3  ;;  %v2163_v28 = vsub.f32 %v2161_v37, %v2162_v13 }
 0x1d5   :  { %16442 = vmatmul.mubr.f32.gmra.mrb[8].mxu1 %v1530_v23  ;;  %v1433_v23 = vld [vmem:[%s21973_s5] sm:$0xff]  ;;  %v2164_v44 = vand.u32 4294901760, %v2163_v28 }
 0x1d6   :  { %18333 = vmatpush3.bf16.msra.mxu1 %v19665_v51  ;;  %16444 = vmatprep.mubr.msk.f32.mxu1 %vm19240_vm0, %v19241_v10  ;;  %v2615_v36 = vand.u32 4294901760, %v1433_v23 }
 0x1d7   :  { %16455 = vmatprep.subr.mxu1 %v19241_v10 }
 0x1d9   :  { %16445 = vmatmul.mubr.f32.gmra.mrb[10].mxu1 %v1540_v58 }
 0x1da   :  { %16456 = vmatpush3.msra.mxu1 %v19673_v21  ;;  %16457 = vmatprep.mubr.msk.f32.mxu1 %vm19240_vm0, %v19241_v10 }
 0x1db   :  { %18334 = vmatprep.subr.bf16.mxu1 %v19239_v3 }
 0x1dd   :  { %16458 = vmatmul.mubr.f32.vlgmr.msra.gmra.mrb[6].mxu1 %v1521_v18 }
 0x1de   :  { %18336 = vmatpush3.bf16.msra.mxu1 %v19656_v30  ;;  %16460 = vmatprep.mubr.msk.f32.mxu1 %vm19240_vm0, %v19241_v10 }
 0x1df   :  { %18337 = vmatprep.subr.bf16.mxu1 %v19239_v3 }
 0x1e1   :  { %16461 = vmatmul.mubr.f32.gmra.mrb[8].mxu1 %v1531_v27 }
 0x1e2   :  { %18339 = vmatpush3.bf16.msra.mxu1 %v19680_v55  ;;  %16463 = vmatprep.mubr.msk.f32.mxu1 %vm19240_vm0, %v19241_v10 }
 0x1e3   :  { %16474 = vmatprep.subr.mxu1 %v19241_v10 }
 0x1e5   :  { %16464 = vmatmul.mubr.f32.gmra.mrb[10].mxu1 %v1541_v35 }
 0x1e6   :  { %16475 = vmatpush3.msra.mxu1 %v19689_v62  ;;  %16476 = vmatprep.mubr.msk.f32.mxu1 %vm19240_vm0, %v19241_v10 }
 0x1e7   :  { %18340 = vmatprep.subr.bf16.mxu1 %v19239_v3 }
 0x1e9   :  { %16477 = vmatmul.mubr.f32.vlgmr.msra.gmra.mrb[6].mxu1 %v19768_v7 }
 0x1ea   :  { %18342 = vmatpush3.bf16.msra.mxu1 %v19643_v12  ;;  %16479 = vmatprep.mubr.msk.f32.mxu1 %vm19240_vm0, %v19241_v10 }
 0x1eb   :  { %18343 = vmatprep.subr.bf16.mxu1 %v19239_v3 }
 0x1ed   :  { %16480 = vmatmul.mubr.f32.gmra.mrb[8].mxu1 %v19782_v14 }
 0x1ee   :  { %18345 = vmatpush3.bf16.msra.mxu1 %v19665_v51  ;;  %16482 = vmatprep.mubr.msk.f32.mxu1 %vm19240_vm0, %v19241_v10 }
 0x1ef   :  { %16493 = vmatprep.subr.mxu1 %v19241_v10 }
 0x1f1   :  { %16483 = vmatmul.mubr.f32.gmra.mrb[10].mxu1 %v19792_v24 }
 0x1f2   :  { %16494 = vmatpush3.msra.mxu1 %v19673_v21  ;;  %16495 = vmatprep.mubr.msk.f32.mxu1 %vm19240_vm0, %v19241_v10 }
 0x1f3   :  { %18352 = vmatprep.subr.bf16.mxu1 %v19239_v3 }
 0x1f5   :  { %16496 = vmatmul.mubr.f32.vlgmr.msra.gmra.mrb[6].mxu1 %v19768_v7 }
 0x1f6   :  { %16498 = vmatprep.mubr.msk.f32.mxu1 %vm19240_vm0, %v19241_v10  ;;  %18354 = vmatpush3.bf16.msra.mxu1 %v18353_v47 }
 0x1f7   :  { %16538 = vmatprep.subr.mxu1 %v19241_v10 }
 0x1f9   :  { %16499 = vmatmul.mubr.f32.gmra.mrb[8].mxu1 %v19782_v14 }
 0x1fa   :  { %16501 = vmatprep.mubr.msk.f32.mxu1 %vm19240_vm0, %v19241_v10  ;;  %16539 = vmatpush3.msra.mxu1 %v2161_v37 }
 0x1fb   :  { %18358 = vmatprep.subr.bf16.mxu1 %v19239_v3 }
 0x1fd   :  { %16502 = vmatmul.mubr.f32.gmra.mrb[10].mxu1 %v19792_v24  ;;  %v1434_v24 = vld [vmem:[%s21973_s5 + $0x8] sm:$0xff] }
 0x1fe   :  { %16540 = vmatprep.mubr.msk.f32.mxu1 %vm19240_vm0, %v19241_v10  ;;  %v2618_v38 = vand.u32 4294901760, %v1434_v24 }
 0x200   :  { %v19957_v48 = vpack.c.bf16 %v2618_v38, %v2615_v36 }
 0x280   :  { %v1417_v26 = vpop.f32.mrb[0].mxu1 }
 0x281   :  { %v16383_v29 = vpop.f32.mrb[1].mxu1  ;;  %v2606_v22 = vsel %vm2037_vm14, %v1417_v26, 0 }
 0x282   :  { %v19940_v39 = vand.u32 4294901760, %v2606_v22  ;;  %v2714_v29 = vsub.f32 %v1433_v23, %v2615_v36 }
 0x284   :  { %v1423_v34 = vpop.f32.mrb[2].mxu1  ;;  %v19960_v37 = vsub.f32 %v2606_v22, %v19940_v39 }
 0x285   :  { %v16386_v54 = vpop.f32.mrb[3].mxu1  ;;  %v2609_v43 = vsel %vm2037_vm14, %v1423_v34, 0  ;;  %v2721_v34 = vsub.f32 %v1434_v24, %v2618_v38  ;;  %v15150_v38 = vld [vmem:[%s21972_s4 + $0x40] sm:$0xff] }
 0x286   :  { %v19962_v45 = vand.u32 4294901760, %v2609_v43  ;;  %v2684_v19 = vand.u32 4294901760, %v19960_v37 }
 0x288   :  { %v1429_v57 = vpop.f32.mrb[4].mxu1  ;;  %v2685_v54 = vsub.f32 %v19960_v37, %v2684_v19 }
 0x289   :  { %v16389_v59 = vpop.f32.mrb[5].mxu1  ;;  %v2612_v52 = vsel %vm2037_vm14, %v1429_v57, 0 }
 0x28a   :  { %v19984_v26 = vand.u32 4294901760, %v2612_v52 }
 0x28c   :  { %v19998_v59 = vsub.f32 %v2612_v52, %v19984_v26 }
 0x2c8   :  { %v2017_v60 = vpop.f32.mrb[6].mxu1 }
 0x2c9   :  { %v2039_v61 = vsel %vm2037_vm14, %v2017_v60, 0  ;;  %v16497_v0 = vpop.f32.mrb[7].mxu1  ;;  %v18371_v60 = vpack.c.bf16 %v2721_v34, %v2714_v29 }
 0x2ca   :  { %v19907_v1 = vand.u32 4294901760, %v2039_v61  ;;  %v2704_v0 = vand.u32 4294901760, %v19998_v59 }
 0x2cc   :  { %v19910_v4 = vsub.f32 %v2039_v61, %v19907_v1  ;;  %v2023_v5 = vpop.f32.mrb[8].mxu1  ;;  %v2686_v61 = vand.u32 4294901760, %v2685_v54 }
 0x2cd   :  { %v2042_v6 = vsel %vm2037_vm14, %v2023_v5, 0  ;;  %v16500_v7 = vpop.f32.mrb[9].mxu1 }
 0x2ce   :  { %v2117_v8 = vand.u32 4294901760, %v19910_v4  ;;  %v19914_v9 = vand.u32 4294901760, %v2042_v6  ;;  %16541 = vmatmul.mubr.f32.vlgmr.msra.gmra.mrb[12].mxu1 %v19910_v4 }
 0x2cf   :  { %16543 = vmatprep.mubr.msk.f32.mxu1 %vm19240_vm0, %v19241_v10  ;;  %18360 = vmatpush3.bf16.msra.mxu1 %v18359_v50  ;;  %v1435_v50 = vld [vmem:[%s21973_s5 + $0x10] sm:$0xff] }
 0x2d0   :  { %v2118_v14 = vsub.f32 %v19910_v4, %v2117_v8  ;;  %v19923_v15 = vsub.f32 %v2042_v6, %v19914_v9  ;;  %v2029_v18 = vpop.f32.mrb[10].mxu1  ;;  %16568 = vmatprep.subr.mxu1 %v19241_v10  ;;  %v19978_v16 = vand.u32 4294901760, %v1435_v50  ;;  %v15148_v4 = vld [vmem:[%s21972_s4 + $0x30] sm:$0xff] }
 0x2d1   :  { %v2045_v27 = vsel %vm2037_vm14, %v2029_v18, 0  ;;  %v16503_v58 = vpop.f32.mrb[11].mxu1  ;;  %v2722_v18 = vand.u32 4294901760, %v2721_v34 }
 0x2d2   :  { %v2119_v32 = vand.u32 4294901760, %v2118_v14  ;;  %v2127_v35 = vand.u32 4294901760, %v19923_v15  ;;  %v19935_v11 = vand.u32 4294901760, %v2045_v27  ;;  %16544 = vmatmul.mubr.f32.gmra.mrb[14].mxu1 %v19923_v15  ;;  %v2728_v6 = vsub.f32 %v1435_v50, %v19978_v16 }
 0x2d3   :  { %16546 = vmatprep.mubr.msk.f32.mxu1 %vm19240_vm0, %v19241_v10  ;;  %16569 = vmatpush3.msra.mxu1 %v2162_v13  ;;  %v2705_v13 = vsub.f32 %v19998_v59, %v2704_v0  ;;  %v2715_v14 = vand.u32 4294901760, %v2714_v29  ;;  %v2723_v22 = vsub.f32 %v2721_v34, %v2722_v18  ;;  %v3177_v58 = vsel %vm835_vm7, %v15148_v4, 0 }
 0x2d4   :  { %v19943_v41 = vsub.f32 %v2045_v27, %v19935_v11  ;;  %16511 = vmatmul.mubr.f32.vlgmr.msra.gmra.mrb[10].mxu0 %v2119_v32  ;;  %v2128_v42 = vsub.f32 %v19923_v15, %v2127_v35  ;;  %18364 = vmatprep.subr.bf16.mxu1 %v19239_v3  ;;  %v2729_v15 = vand.u32 4294901760, %v2728_v6 }
 0x2d5   :  { %16513 = vmatprep.mubr.msk.f32.mxu0 %vm19240_vm0, %v19241_v10  ;;  %18351 = vmatpush3.bf16.msra.mxu0 %v18350_v20  ;;  %v19982_v20 = vsub.f32 %v2609_v43, %v19962_v45  ;;  %v2706_v23 = vand.u32 4294901760, %v2705_v13  ;;  %v2716_v24 = vsub.f32 %v2714_v29, %v2715_v14  ;;  %v18377_v27 = vpack.c.bf16 %v2722_v18, %v2715_v14 }
 0x2d6   :  { %v2137_v46 = vand.u32 4294901760, %v19943_v41  ;;  %16547 = vmatmul.mubr.f32.gmra.mrb[16].mxu1 %v19943_v41  ;;  %v2129_v47 = vand.u32 4294901760, %v2128_v42  ;;  %16523 = vmatprep.subr.mxu0 %v19241_v10  ;;  %v2730_v32 = vsub.f32 %v2728_v6, %v2729_v15 }
 0x2d7   :  { %16570 = vmatprep.mubr.msk.f32.mxu1 %vm19240_vm0, %v19241_v10  ;;  %v2694_v57 = vand.u32 4294901760, %v19982_v20 }
 0x2d8   :  { %16514 = vmatmul.mubr.f32.gmra.mrb[12].mxu0 %v2129_v47  ;;  %v2138_v49 = vsub.f32 %v19943_v41, %v2137_v46  ;;  %v2731_v41 = vand.u32 4294901760, %v2730_v32 }
 0x2d9   :  { %16516 = vmatprep.mubr.msk.f32.mxu0 %vm19240_vm0, %v19241_v10  ;;  %16524 = vmatpush3.msra.mxu0 %v2164_v44  ;;  %v2695_v5 = vsub.f32 %v19982_v20, %v2694_v57 }
 0x2da   :  { %16571 = vmatmul.mubr.f32.vlgmr.msra.gmra.mrb[18].mxu1 %v19907_v1  ;;  %v2139_v17 = vand.u32 4294901760, %v2138_v49  ;;  %18355 = vmatprep.subr.bf16.mxu0 %v19239_v3 }
 0x2db   :  { %16573 = vmatprep.mubr.msk.f32.mxu1 %vm19240_vm0, %v19241_v10  ;;  %18366 = vmatpush3.bf16.msra.mxu1 %v19957_v48  ;;  %v2696_v7 = vand.u32 4294901760, %v2695_v5 }
 0x2dc   :  { %16517 = vmatmul.mubr.f32.gmra.mrb[14].mxu0 %v2139_v17  ;;  %16598 = vmatprep.subr.mxu1 %v19241_v10 }
 0x2dd   :  { %16525 = vmatprep.mubr.msk.f32.mxu0 %vm19240_vm0, %v19241_v10 }
 0x2de   :  { %16574 = vmatmul.mubr.f32.gmra.mrb[20].mxu1 %v19914_v9 }
 0x2df   :  { %16576 = vmatprep.mubr.msk.f32.mxu1 %vm19240_vm0, %v19241_v10  ;;  %16599 = vmatpush3.msra.mxu1 %v19978_v16 }
 0x2e0   :  { %16526 = vmatmul.mubr.f32.vlgmr.msra.gmra.mrb[16].mxu0 %v19907_v1  ;;  %18370 = vmatprep.subr.bf16.mxu1 %v19239_v3 }
 0x2e1   :  { %16528 = vmatprep.mubr.msk.f32.mxu0 %vm19240_vm0, %v19241_v10  ;;  %18357 = vmatpush3.bf16.msra.mxu0 %v19899_v40 }
 0x2e2   :  { %16577 = vmatmul.mubr.f32.gmra.mrb[22].mxu1 %v19935_v11  ;;  %16553 = vmatprep.subr.mxu0 %v19241_v10 }
 0x2e3   :  { %16600 = vmatprep.mubr.msk.f32.mxu1 %vm19240_vm0, %v19241_v10 }
 0x2e4   :  { %16529 = vmatmul.mubr.f32.gmra.mrb[18].mxu0 %v19914_v9 }
 0x2e5   :  { %16531 = vmatprep.mubr.msk.f32.mxu0 %vm19240_vm0, %v19241_v10  ;;  %16554 = vmatpush3.msra.mxu0 %v19895_v31 }
 0x2e6   :  { %16601 = vmatmul.mubr.f32.vlgmr.msra.gmra.mrb[24].mxu1 %v2686_v61  ;;  %18361 = vmatprep.subr.bf16.mxu0 %v19239_v3 }
 0x2e7   :  { %16603 = vmatprep.mubr.msk.f32.mxu1 %vm19240_vm0, %v19241_v10  ;;  %18372 = vmatpush3.bf16.msra.mxu1 %v18371_v60 }
 0x2e8   :  { %16532 = vmatmul.mubr.f32.gmra.mrb[20].mxu0 %v19935_v11  ;;  %16628 = vmatprep.subr.mxu1 %v19241_v10 }
 0x2e9   :  { %16555 = vmatprep.mubr.msk.f32.mxu0 %vm19240_vm0, %v19241_v10 }
 0x2ea   :  { %16604 = vmatmul.mubr.f32.gmra.mrb[26].mxu1 %v2696_v7 }
 0x2eb   :  { %16606 = vmatprep.mubr.msk.f32.mxu1 %vm19240_vm0, %v19241_v10  ;;  %16629 = vmatpush3.msra.mxu1 %v2728_v6 }
 0x2ec   :  { %16556 = vmatmul.mubr.f32.vlgmr.msra.gmra.mrb[22].mxu0 %v2117_v8  ;;  %18376 = vmatprep.subr.bf16.mxu1 %v19239_v3  ;;  %v2724_v8 = vand.u32 4294901760, %v2723_v22 }
 0x2ed   :  { %16558 = vmatprep.mubr.msk.f32.mxu0 %vm19240_vm0, %v19241_v10  ;;  %18363 = vmatpush3.bf16.msra.mxu0 %v19899_v40  ;;  %v2717_v40 = vand.u32 4294901760, %v2716_v24 }
 0x2ee   :  { %16607 = vmatmul.mubr.f32.gmra.mrb[28].mxu1 %v2706_v23  ;;  %16583 = vmatprep.subr.mxu0 %v19241_v10 }
 0x2ef   :  { %16630 = vmatprep.mubr.msk.f32.mxu1 %vm19240_vm0, %v19241_v10  ;;  %v18368_v28 = vpack.c.bf16 %v2724_v8, %v2717_v40 }
 0x2f0   :  { %16559 = vmatmul.mubr.f32.gmra.mrb[24].mxu0 %v2127_v35  ;;  %v20061_v35 = vand.u32 4294901760, %v3177_v58 }
 0x2f1   :  { %16561 = vmatprep.mubr.msk.f32.mxu0 %vm19240_vm0, %v19241_v10  ;;  %16584 = vmatpush3.msra.mxu0 %v19895_v31  ;;  %v15149_v31 = vld [vmem:[%s21972_s4 + $0x38] sm:$0xff] }
 0x2f2   :  { %16631 = vmatmul.mubr.f32.vlgmr.msra.gmra.mrb[30].mxu1 %v19960_v37  ;;  %18367 = vmatprep.subr.bf16.mxu0 %v19239_v3  ;;  %v3180_v36 = vsel %vm835_vm7, %v15149_v31, 0  ;;  %v20076_v42 = vsub.f32 %v3177_v58, %v20061_v35 }
 0x2f3   :  { %16633 = vmatprep.mubr.msk.f32.mxu1 %vm19240_vm0, %v19241_v10  ;;  %18378 = vmatpush3.bf16.msra.mxu1 %v18377_v27  ;;  %v20078_v43 = vand.u32 4294901760, %v3180_v36 }
 0x2f4   :  { %16562 = vmatmul.mubr.f32.gmra.mrb[26].mxu0 %v2137_v46  ;;  %16658 = vmatprep.subr.mxu1 %v19241_v10  ;;  %v3257_v44 = vand.u32 4294901760, %v20076_v42 }
 0x2f5   :  { %16585 = vmatprep.mubr.msk.f32.mxu0 %vm19240_vm0, %v19241_v10  ;;  %v20090_v46 = vsub.f32 %v3180_v36, %v20078_v43 }
 0x2f6   :  { %16634 = vmatmul.mubr.f32.gmra.mrb[32].mxu1 %v19982_v20 }
 0x2f7   :  { %16636 = vmatprep.mubr.msk.f32.mxu1 %vm19240_vm0, %v19241_v10  ;;  %16659 = vmatpush3.msra.mxu1 %v2729_v15  ;;  %v3267_v49 = vand.u32 4294901760, %v20090_v46 }
 0x2f8   :  { %16586 = vmatmul.mubr.f32.vlgmr.msra.gmra.mrb[28].mxu0 %v19907_v1  ;;  %18382 = vmatprep.subr.bf16.mxu1 %v19239_v3  ;;  %v3183_v1 = vsel %vm835_vm7, %v15150_v38, 0 }
 0x2f9   :  { %16588 = vmatprep.mubr.msk.f32.mxu0 %vm19240_vm0, %v19241_v10  ;;  %18369 = vmatpush3.bf16.msra.mxu0 %v18368_v28  ;;  %v20092_v47 = vand.u32 4294901760, %v3183_v1  ;;  %v3268_v52 = vsub.f32 %v20090_v46, %v3267_v49 }
 0x2fa   :  { %16637 = vmatmul.mubr.f32.gmra.mrb[34].mxu1 %v19998_v59  ;;  %16613 = vmatprep.subr.mxu0 %v19241_v10 }
 0x2fb   :  { %16660 = vmatprep.mubr.msk.f32.mxu1 %vm19240_vm0, %v19241_v10  ;;  %v20107_v50 = vsub.f32 %v3183_v1, %v20092_v47  ;;  %v3269_v29 = vand.u32 4294901760, %v3268_v52 }
 0x2fc   :  { %16589 = vmatmul.mubr.f32.gmra.mrb[30].mxu0 %v19914_v9  ;;  %v3258_v9 = vsub.f32 %v20076_v42, %v3257_v44 }
 0x2fd   :  { %16591 = vmatprep.mubr.msk.f32.mxu0 %vm19240_vm0, %v19241_v10  ;;  %16614 = vmatpush3.msra.mxu0 %v2731_v41  ;;  %v3277_v17 = vand.u32 4294901760, %v20107_v50 }
 0x2fe   :  { %16661 = vmatmul.mubr.f32.vlgmr.msra.gmra.mrb[36].mxu1 %v19940_v39  ;;  %18373 = vmatprep.subr.bf16.mxu0 %v19239_v3 }
 0x2ff   :  { %18384 = vmatpush3.bf16.msra.mxu1 %v19643_v12  ;;  %16663 = vmatprep.mubr.msk.f32.mxu1 %vm19240_vm0, %v19241_v10  ;;  %v3278_v34 = vsub.f32 %v20107_v50, %v3277_v17 }
 0x300   :  { %16592 = vmatmul.mubr.f32.gmra.mrb[32].mxu0 %v19935_v11  ;;  %18385 = vmatprep.subr.bf16.mxu1 %v19239_v3  ;;  %v3259_v11 = vand.u32 4294901760, %v3258_v9 }
 0x301   :  { %16615 = vmatprep.mubr.msk.f32.mxu0 %vm19240_vm0, %v19241_v10  ;;  %v3279_v54 = vand.u32 4294901760, %v3278_v34 }
 0x302   :  { %16664 = vmatmul.mubr.f32.gmra.mrb[38].mxu1 %v19962_v45 }
 0x303   :  { %18387 = vmatpush3.bf16.msra.mxu1 %v19665_v51  ;;  %16666 = vmatprep.mubr.msk.f32.mxu1 %vm19240_vm0, %v19241_v10 }
 0x304   :  { %16616 = vmatmul.mubr.f32.vlgmr.msra.gmra.mrb[34].mxu0 %v19940_v39  ;;  %16692 = vmatprep.subr.mxu1 %v19241_v10 }
 0x305   :  { %16618 = vmatprep.mubr.msk.f32.mxu0 %vm19240_vm0, %v19241_v10  ;;  %18375 = vmatpush3.bf16.msra.mxu0 %v19957_v48 }
 0x306   :  { %16667 = vmatmul.mubr.f32.gmra.mrb[40].mxu1 %v19984_v26  ;;  %16643 = vmatprep.subr.mxu0 %v19241_v10 }
 0x307   :  { %16693 = vmatpush3.msra.mxu1 %v19673_v21  ;;  %16694 = vmatprep.mubr.msk.f32.mxu1 %vm19240_vm0, %v19241_v10 }
 0x308   :  { %16619 = vmatmul.mubr.f32.gmra.mrb[36].mxu0 %v19962_v45  ;;  %18388 = vmatprep.subr.bf16.mxu1 %v19239_v3 }
 0x309   :  { %16621 = vmatprep.mubr.msk.f32.mxu0 %vm19240_vm0, %v19241_v10  ;;  %16644 = vmatpush3.msra.mxu0 %v19978_v16 }
 0x30a   :  { %16695 = vmatmul.mubr.f32.vlgmr.msra.gmra.mrb[42].mxu1 %v3259_v11  ;;  %18379 = vmatprep.subr.bf16.mxu0 %v19239_v3 }
 0x30b   :  { %18390 = vmatpush3.bf16.msra.mxu1 %v19667_v53  ;;  %16697 = vmatprep.mubr.msk.f32.mxu1 %vm19240_vm0, %v19241_v10 }
 0x30c   :  { %16622 = vmatmul.mubr.f32.gmra.mrb[38].mxu0 %v19984_v26  ;;  %18391 = vmatprep.subr.bf16.mxu1 %v19239_v3 }
 0x30d   :  { %16645 = vmatprep.mubr.msk.f32.mxu0 %vm19240_vm0, %v19241_v10 }
 0x30e   :  { %16698 = vmatmul.mubr.f32.gmra.mrb[44].mxu1 %v3269_v29 }
 0x30f   :  { %18393 = vmatpush3.bf16.msra.mxu1 %v19694_v63  ;;  %16700 = vmatprep.mubr.msk.f32.mxu1 %vm19240_vm0, %v19241_v10 }
 0x310   :  { %16646 = vmatmul.mubr.f32.vlgmr.msra.gmra.mrb[40].mxu0 %v2684_v19  ;;  %16711 = vmatprep.subr.mxu1 %v19241_v10 }
 0x311   :  { %16648 = vmatprep.mubr.msk.f32.mxu0 %vm19240_vm0, %v19241_v10  ;;  %18381 = vmatpush3.bf16.msra.mxu0 %v19957_v48 }
 0x312   :  { %16701 = vmatmul.mubr.f32.gmra.mrb[46].mxu1 %v3279_v54  ;;  %16673 = vmatprep.subr.mxu0 %v19241_v10 }
 0x313   :  { %16712 = vmatpush3.msra.mxu1 %v19703_v2  ;;  %16713 = vmatprep.mubr.msk.f32.mxu1 %vm19240_vm0, %v19241_v10 }
 0x314   :  { %16649 = vmatmul.mubr.f32.gmra.mrb[42].mxu0 %v2694_v57  ;;  %18394 = vmatprep.subr.bf16.mxu1 %v19239_v3 }
 0x315   :  { %16651 = vmatprep.mubr.msk.f32.mxu0 %vm19240_vm0, %v19241_v10  ;;  %16674 = vmatpush3.msra.mxu0 %v19978_v16 }
 0x316   :  { %16714 = vmatmul.mubr.f32.vlgmr.msra.gmra.mrb[42].mxu1 %v20061_v35  ;;  %18418 = vmatprep.subr.bf16.mxu0 %v19239_v3 }
 0x317   :  { %18396 = vmatpush3.bf16.msra.mxu1 %v19648_v33  ;;  %16716 = vmatprep.mubr.msk.f32.mxu1 %vm19240_vm0, %v19241_v10  ;;  %v15152_v33 = vld [vmem:[%s21973_s5 + $0x38] sm:$0xff] }
 0x318   :  { %16652 = vmatmul.mubr.f32.gmra.mrb[44].mxu0 %v2704_v0  ;;  %18397 = vmatprep.subr.bf16.mxu1 %v19239_v3 }
 0x319   :  { %16675 = vmatprep.mubr.msk.f32.mxu0 %vm19240_vm0, %v19241_v10 }
 0x31a   :  { %16717 = vmatmul.mubr.f32.gmra.mrb[44].mxu1 %v20078_v43 }
 0x31b   :  { %18399 = vmatpush3.bf16.msra.mxu1 %v19671_v25  ;;  %16719 = vmatprep.mubr.msk.f32.mxu1 %vm19240_vm0, %v19241_v10 }
 0x31c   :  { %16676 = vmatmul.mubr.f32.vlgmr.msra.gmra.mrb[46].mxu0 %v19940_v39  ;;  %16730 = vmatprep.subr.mxu1 %v19241_v10 }
 0x31d   :  { %16678 = vmatprep.mubr.msk.f32.mxu0 %vm19240_vm0, %v19241_v10 }
 0x31e   :  { %16720 = vmatmul.mubr.f32.gmra.mrb[46].mxu1 %v20092_v47 }
 0x31f   :  { %16731 = vmatpush3.msra.mxu1 %v19683_v56  ;;  %16732 = vmatprep.mubr.msk.f32.mxu1 %vm19240_vm0, %v19241_v10 }
 0x320   :  { %16679 = vmatmul.mubr.f32.gmra.mrb[48].mxu0 %v19962_v45  ;;  %18400 = vmatprep.subr.bf16.mxu1 %v19239_v3 }
 0x321   :  { %16681 = vmatprep.mubr.msk.f32.mxu0 %vm19240_vm0, %v19241_v10 }
 0x322   :  { %16733 = vmatmul.mubr.f32.vlgmr.msra.gmra.mrb[42].mxu1 %v20076_v42 }
 0x323   :  { %18402 = vmatpush3.bf16.msra.mxu1 %v19643_v12  ;;  %16735 = vmatprep.mubr.msk.f32.mxu1 %vm19240_vm0, %v19241_v10 }
 0x324   :  { %16682 = vmatmul.mubr.f32.gmra.mrb[50].mxu0 %v19984_v26  ;;  %18403 = vmatprep.subr.bf16.mxu1 %v19239_v3 }
 0x325   :  { %16804 = vmatprep.mubr.msk.f32.mxu0 %vm19240_vm0, %v19241_v10 }
 0x326   :  { %16736 = vmatmul.mubr.f32.gmra.mrb[44].mxu1 %v20090_v46 }
 0x327   :  { %18405 = vmatpush3.bf16.msra.mxu1 %v19665_v51  ;;  %16738 = vmatprep.mubr.msk.f32.mxu1 %vm19240_vm0, %v19241_v10 }
 0x328   :  { %16749 = vmatprep.subr.mxu1 %v19241_v10 }
 0x32a   :  { %16739 = vmatmul.mubr.f32.gmra.mrb[46].mxu1 %v20107_v50 }
 0x32b   :  { %16750 = vmatpush3.msra.mxu1 %v19673_v21  ;;  %16751 = vmatprep.mubr.msk.f32.mxu1 %vm19240_vm0, %v19241_v10 }
 0x32c   :  { %18406 = vmatprep.subr.bf16.mxu1 %v19239_v3 }
 0x32e   :  { %16752 = vmatmul.mubr.f32.vlgmr.msra.gmra.mrb[42].mxu1 %v3257_v44 }
 0x32f   :  { %18408 = vmatpush3.bf16.msra.mxu1 %v19656_v30  ;;  %16754 = vmatprep.mubr.msk.f32.mxu1 %vm19240_vm0, %v19241_v10 }
 0x330   :  { %18409 = vmatprep.subr.bf16.mxu1 %v19239_v3 }
 0x332   :  { %16755 = vmatmul.mubr.f32.gmra.mrb[44].mxu1 %v3267_v49 }
 0x333   :  { %18411 = vmatpush3.bf16.msra.mxu1 %v19680_v55  ;;  %16757 = vmatprep.mubr.msk.f32.mxu1 %vm19240_vm0, %v19241_v10  ;;  %v20260_v55 = vld [vmem:[%s21973_s5 + $0x40] sm:$0xff] }
 0x334   :  { %16768 = vmatprep.subr.mxu1 %v19241_v10  ;;  %v20267_v63 = vand.u32 4294901760, %v20260_v55 }
 0x336   :  { %16758 = vmatmul.mubr.f32.gmra.mrb[46].mxu1 %v3277_v17 }
 0x337   :  { %16769 = vmatpush3.msra.mxu1 %v19689_v62  ;;  %16770 = vmatprep.mubr.msk.f32.mxu1 %vm19240_vm0, %v19241_v10 }
 0x338   :  { %18412 = vmatprep.subr.bf16.mxu1 %v19239_v3 }
 0x33a   :  { %16771 = vmatmul.mubr.f32.vlgmr.msra.gmra.mrb[42].mxu1 %v20061_v35 }
 0x33b   :  { %18414 = vmatpush3.bf16.msra.mxu1 %v19643_v12  ;;  %16773 = vmatprep.mubr.msk.f32.mxu1 %vm19240_vm0, %v19241_v10  ;;  %v15151_v12 = vld [vmem:[%s21973_s5 + $0x30] sm:$0xff] }
 0x33c   :  { %18415 = vmatprep.subr.bf16.mxu1 %v19239_v3  ;;  %v3783_v30 = vand.u32 4294901760, %v15151_v12 }
 0x33e   :  { %16774 = vmatmul.mubr.f32.gmra.mrb[44].mxu1 %v20078_v43  ;;  %v20262_v56 = vsub.f32 %v15151_v12, %v3783_v30 }
 0x33f   :  { %18417 = vmatpush3.bf16.msra.mxu1 %v19665_v51  ;;  %16776 = vmatprep.mubr.msk.f32.mxu1 %vm19240_vm0, %v19241_v10  ;;  %v3786_v51 = vand.u32 4294901760, %v15152_v33 }
 0x340   :  { %16787 = vmatprep.subr.mxu1 %v19241_v10  ;;  %v3883_v39 = vand.u32 4294901760, %v20262_v56 }
 0x341   :  { %v20253_v53 = vpack.c.bf16 %v3786_v51, %v3783_v30  ;;  %v20264_v62 = vsub.f32 %v15152_v33, %v3786_v51 }
 0x342   :  { %16777 = vmatmul.mubr.f32.gmra.mrb[46].mxu1 %v20092_v47  ;;  %v3884_v16 = vsub.f32 %v20262_v56, %v3883_v39 }
 0x343   :  { %16788 = vmatpush3.msra.mxu1 %v19673_v21  ;;  %16789 = vmatprep.mubr.msk.f32.mxu1 %vm19240_vm0, %v19241_v10  ;;  %v3890_v48 = vand.u32 4294901760, %v20264_v62  ;;  %v18425_v15 = vpack.c.bf16 %v20264_v62, %v20262_v56 }
 0x344   :  { %18436 = vmatprep.subr.bf16.mxu1 %v19239_v3  ;;  %18420 = vmatpush3.bf16.msra.mxu0 %v20253_v53  ;;  %v3885_v57 = vand.u32 4294901760, %v3884_v16 }
 0x345   :  { %16802 = vmatprep.subr.mxu0 %v19241_v10  ;;  %v3891_v19 = vsub.f32 %v20264_v62, %v3890_v48 }
 0x346   :  { %16790 = vmatmul.mubr.f32.vlgmr.msra.gmra.mrb[42].mxu1 %v20061_v35 }
 0x347   :  { %16792 = vmatprep.mubr.msk.f32.mxu1 %vm19240_vm0, %v19241_v10  ;;  %v3892_v59 = vand.u32 4294901760, %v3891_v19 }
 0x348   :  { %16803 = vmatpush3.msra.mxu0 %v20267_v63 }
 0x349   :  { %18421 = vmatprep.subr.bf16.mxu0 %v19239_v3  ;;  %v20279_v0 = vpack.c.bf16 %v3892_v59, %v3885_v57  ;;  %v20287_v57 = vpack.c.bf16 %v3890_v48, %v3883_v39 }
 0x34a   :  { %16793 = vmatmul.mubr.f32.gmra.mrb[44].mxu1 %v20078_v43 }
 0x34b   :  { %16795 = vmatprep.mubr.msk.f32.mxu1 %vm19240_vm0, %v19241_v10 }
 0x34e   :  { %16796 = vmatmul.mubr.f32.gmra.mrb[46].mxu1 %v20092_v47 }
 0x34f   :  { %16894 = vmatprep.mubr.msk.f32.mxu1 %vm19240_vm0, %v19241_v10 }
 0x3a1   :  { %v2317_v25 = vpop.f32.mrb[12].mxu1 }
 0x3a2   :  { %v16542_v21 = vpop.f32.mrb[13].mxu1 }
 0x3a5   :  { %v2324_v2 = vpop.f32.mrb[14].mxu1 }
 0x3a6   :  { %v16545_v37 = vpop.f32.mrb[15].mxu1 }
 0x3a7   :  { %v2121_v45 = vpop.f32.mrb[10].mxu0 }
 0x3a8   :  { %v16512_v20 = vpop.f32.mrb[11].mxu0 }
 0x3a9   :  { %v2331_v26 = vpop.f32.mrb[16].mxu1 }
 0x3aa   :  { %v16548_v60 = vpop.f32.mrb[17].mxu1 }
 0x3ab   :  { %v2131_v61 = vpop.f32.mrb[12].mxu0 }
 0x3ac   :  { %v16515_v5 = vpop.f32.mrb[13].mxu0 }
 0x3ad   :  { %v2503_v6 = vpop.f32.mrb[18].mxu1 }
 0x3ae   :  { %v16572_v7 = vpop.f32.mrb[19].mxu1 }
 0x3af   :  { %v2141_v13 = vpop.f32.mrb[14].mxu0 }
 0x3b0   :  { %v16518_v14 = vpop.f32.mrb[15].mxu0 }
 0x3b1   :  { %v2509_v18 = vpop.f32.mrb[20].mxu1 }
 0x3b2   :  { %v16575_v23 = vpop.f32.mrb[21].mxu1 }
 0x3b3   :  { %v2227_v24 = vpop.f32.mrb[16].mxu0 }
 0x3b4   :  { %v2228_v22 = vadd.f32 %v2227_v24, %v2121_v45  ;;  %v16527_v27 = vpop.f32.mrb[17].mxu0 }
 0x3b5   :  { %v2515_v4 = vpop.f32.mrb[22].mxu1 }
 0x3b6   :  { %v16578_v40 = vpop.f32.mrb[23].mxu1  ;;  %v2318_v8 = vadd.f32 %v2317_v25, %v2228_v22 }
 0x3b7   :  { %v2233_v58 = vpop.f32.mrb[18].mxu0 }
 0x3b8   :  { %v2234_v31 = vadd.f32 %v2233_v58, %v2131_v61  ;;  %v16530_v28 = vpop.f32.mrb[19].mxu0 }
 0x3b9   :  { %v2688_v32 = vpop.f32.mrb[24].mxu1 }
 0x3ba   :  { %v16602_v35 = vpop.f32.mrb[25].mxu1  ;;  %v2325_v36 = vadd.f32 %v2324_v2, %v2234_v31 }
 0x3bb   :  { %v2239_v38 = vpop.f32.mrb[20].mxu0 }
 0x3bc   :  { %v2240_v41 = vadd.f32 %v2239_v38, %v2141_v13  ;;  %v16533_v42 = vpop.f32.mrb[21].mxu0 }
 0x3bd   :  { %v2698_v43 = vpop.f32.mrb[26].mxu1 }
 0x3be   :  { %v16605_v1 = vpop.f32.mrb[27].mxu1  ;;  %v2332_v44 = vadd.f32 %v2331_v26, %v2240_v41 }
 0x3bf   :  { %v2407_v46 = vpop.f32.mrb[22].mxu0 }
 0x3c0   :  { %v2408_v47 = vadd.f32 %v2407_v46, %v2318_v8  ;;  %v16557_v9 = vpop.f32.mrb[23].mxu0 }
 0x3c1   :  { %v2708_v49 = vpop.f32.mrb[28].mxu1 }
 0x3c2   :  { %v16608_v50 = vpop.f32.mrb[29].mxu1  ;;  %v2504_v11 = vadd.f32 %v2503_v6, %v2408_v47 }
 0x3c3   :  { %v2415_v52 = vpop.f32.mrb[24].mxu0 }
 0x3c4   :  { %v2416_v17 = vadd.f32 %v2415_v52, %v2325_v36  ;;  %v16560_v29 = vpop.f32.mrb[25].mxu0 }
 0x3c5   :  { %v2884_v34 = vpop.f32.mrb[30].mxu1 }
 0x3c6   :  { %v16632_v54 = vpop.f32.mrb[31].mxu1  ;;  %v2510_v12 = vadd.f32 %v2509_v18, %v2416_v17 }
 0x3c7   :  { %v2423_v33 = vpop.f32.mrb[26].mxu0 }
 0x3c8   :  { %v2424_v30 = vadd.f32 %v2423_v33, %v2332_v44  ;;  %v16563_v51 = vpop.f32.mrb[27].mxu0 }
 0x3c9   :  { %v2891_v25 = vpop.f32.mrb[32].mxu1 }
 0x3ca   :  { %v16635_v21 = vpop.f32.mrb[33].mxu1  ;;  %v2516_v2 = vadd.f32 %v2515_v4, %v2424_v30 }
 0x3cb   :  { %v2589_v37 = vpop.f32.mrb[28].mxu0 }
 0x3cc   :  { %v2590_v45 = vadd.f32 %v2589_v37, %v2504_v11  ;;  %v16587_v16 = vpop.f32.mrb[29].mxu0 }
 0x3cd   :  { %v2898_v19 = vpop.f32.mrb[34].mxu1  ;;  %v3896_v16 = vsub.f32 %v20260_v55, %v20267_v63 }
 0x3ce   :  { %v16638_v20 = vpop.f32.mrb[35].mxu1  ;;  %v2689_v26 = vadd.f32 %v2688_v32, %v2590_v45 }
 0x3cf   :  { %v2595_v59 = vpop.f32.mrb[30].mxu0 }
 0x3d0   :  { %v2596_v60 = vadd.f32 %v2595_v59, %v2510_v12  ;;  %v16590_v61 = vpop.f32.mrb[31].mxu0 }
 0x3d1   :  { %v3070_v5 = vpop.f32.mrb[36].mxu1  ;;  %v3897_v61 = vand.u32 4294901760, %v3896_v16 }
 0x3d2   :  { %v16662_v6 = vpop.f32.mrb[37].mxu1  ;;  %v2699_v7 = vadd.f32 %v2698_v43, %v2596_v60 }
 0x3d3   :  { %v2601_v13 = vpop.f32.mrb[32].mxu0  ;;  %v3898_v55 = vsub.f32 %v3896_v16, %v3897_v61 }
 0x3d4   :  { %v2602_v14 = vadd.f32 %v2601_v13, %v2516_v2  ;;  %v16593_v18 = vpop.f32.mrb[33].mxu0 }
 0x3d5   :  { %v3076_v23 = vpop.f32.mrb[38].mxu1 }
 0x3d6   :  { %v16665_v24 = vpop.f32.mrb[39].mxu1  ;;  %v2709_v22 = vadd.f32 %v2708_v49, %v2602_v14 }
 0x3d7   :  { %v2794_v27 = vpop.f32.mrb[34].mxu0 }
 0x3d8   :  { %v2795_v4 = vadd.f32 %v2794_v27, %v2689_v26  ;;  %v16617_v40 = vpop.f32.mrb[35].mxu0 }
 0x3d9   :  { %v3082_v8 = vpop.f32.mrb[40].mxu1 }
 0x3da   :  { %v16668_v58 = vpop.f32.mrb[41].mxu1  ;;  %v2885_v31 = vadd.f32 %v2884_v34, %v2795_v4 }
 0x3db   :  { %v2800_v39 = vpop.f32.mrb[36].mxu0 }
 0x3dc   :  { %v2801_v48 = vadd.f32 %v2800_v39, %v2699_v7  ;;  %v16620_v28 = vpop.f32.mrb[37].mxu0 }
 0x3de   :  { %v2892_v32 = vadd.f32 %v2891_v25, %v2801_v48 }
 0x3df   :  { %v2806_v35 = vpop.f32.mrb[38].mxu0 }
 0x3e0   :  { %v2807_v36 = vadd.f32 %v2806_v35, %v2709_v22  ;;  %v16623_v38 = vpop.f32.mrb[39].mxu0 }
 0x3e2   :  { %v2899_v41 = vadd.f32 %v2898_v19, %v2807_v36 }
 0x3e3   :  { %v2974_v42 = vpop.f32.mrb[40].mxu0 }
 0x3e4   :  { %v2975_v43 = vadd.f32 %v2974_v42, %v2885_v31  ;;  %v16647_v1 = vpop.f32.mrb[41].mxu0 }
 0x3e6   :  { %v3071_v44 = vadd.f32 %v3070_v5, %v2975_v43 }
 0x3e7   :  { %v2982_v46 = vpop.f32.mrb[42].mxu0 }
 0x3e8   :  { %v2983_v47 = vadd.f32 %v2982_v46, %v2892_v32  ;;  %v16650_v9 = vpop.f32.mrb[43].mxu0 }
 0x3ea   :  { %v3077_v49 = vadd.f32 %v3076_v23, %v2983_v47 }
 0x3eb   :  { %v2990_v50 = vpop.f32.mrb[44].mxu0 }
 0x3ec   :  { %v2991_v11 = vadd.f32 %v2990_v50, %v2899_v41  ;;  %v16653_v52 = vpop.f32.mrb[45].mxu0 }
 0x3ee   :  { %v3083_v17 = vadd.f32 %v3082_v8, %v2991_v11  ;;  %v3899_v8 = vand.u32 4294901760, %v3898_v55 }
 0x3ef   :  { %v3156_v29 = vpop.f32.mrb[46].mxu0 }
 0x3f0   :  { %v20289_v34 = vadd.f32 %v3156_v29, %v3071_v44  ;;  %v16677_v54 = vpop.f32.mrb[47].mxu0 }
 0x3f3   :  { %v3162_v12 = vpop.f32.mrb[48].mxu0 }
 0x3f4   :  { %v20291_v33 = vadd.f32 %v3162_v12, %v3077_v49  ;;  %v16680_v30 = vpop.f32.mrb[49].mxu0 }
 0x3f7   :  { %v3168_v51 = vpop.f32.mrb[50].mxu0 }
 0x3f8   :  { %v20293_v25 = vadd.f32 %v3168_v51, %v3083_v17  ;;  %v16683_v21 = vpop.f32.mrb[51].mxu0 }
 0x419   :  { %v3753_v2 = vpop.f32.mrb[42].mxu1 }
 0x41a   :  { %v3774_v37 = vsel %vm2037_vm14, %v3753_v2, 0  ;;  %v16791_v45 = vpop.f32.mrb[43].mxu1 }
 0x41b   :  { %v20298_v19 = vand.u32 4294901760, %v3774_v37 }
 0x41d   :  { %v3851_v20 = vsub.f32 %v3774_v37, %v20298_v19  ;;  %v3759_v26 = vpop.f32.mrb[44].mxu1 }
 0x41e   :  { %v3777_v59 = vsel %vm2037_vm14, %v3759_v26, 0  ;;  %v16794_v60 = vpop.f32.mrb[45].mxu1 }
 0x41f   :  { %v3852_v5 = vand.u32 4294901760, %v3851_v20  ;;  %v20302_v6 = vand.u32 4294901760, %v3777_v59 }
 0x421   :  { %v3853_v7 = vsub.f32 %v3851_v20, %v3852_v5  ;;  %v3861_v13 = vsub.f32 %v3777_v59, %v20302_v6  ;;  %v3765_v14 = vpop.f32.mrb[46].mxu1 }
 0x422   :  { %v3780_v18 = vsel %vm2037_vm14, %v3765_v14, 0  ;;  %v16797_v23 = vpop.f32.mrb[47].mxu1 }
 0x423   :  { %v3854_v24 = vand.u32 4294901760, %v3853_v7  ;;  %v3862_v22 = vand.u32 4294901760, %v3861_v13  ;;  %v3870_v27 = vand.u32 4294901760, %v3780_v18  ;;  %v15156_v7 = vld [vmem:[%s21975_s7 + $0x8] sm:$0xff] }
 0x425   :  { %v3871_v4 = vsub.f32 %v3780_v18, %v3870_v27  ;;  %16805 = vmatmul.mubr.f32.vlgmr.msra.gmra.mrb[52].mxu0 %v3854_v24  ;;  %v3863_v40 = vsub.f32 %v3861_v13, %v3862_v22  ;;  %v4847_v18 = vsel %vm2037_vm14, %v15156_v7, 0  ;;  %v15154_v24 = vld [vmem:[%s21974_s6] ss:$0 sm:$0xff] }
 0x426   :  { %16807 = vmatprep.mubr.msk.f32.mxu0 %vm19240_vm0, %v19241_v10  ;;  %18423 = vmatpush3.bf16.msra.mxu0 %v20279_v0 }
 0x427   :  { %v3872_v58 = vand.u32 4294901760, %v3871_v4  ;;  %v3864_v31 = vand.u32 4294901760, %v3863_v40  ;;  %16817 = vmatprep.subr.mxu0 %v19241_v10  ;;  %v15155_v40 = vld [vmem:[%s21974_s6 + $0x1] ss:$0 sm:$0xff] }
 0x429   :  { %16808 = vmatmul.mubr.f32.gmra.mrb[54].mxu0 %v3864_v31  ;;  %v3873_v39 = vsub.f32 %v3871_v4, %v3872_v58 }
 0x42a   :  { %16810 = vmatprep.mubr.msk.f32.mxu0 %vm19240_vm0, %v19241_v10  ;;  %16818 = vmatpush3.msra.mxu0 %v3899_v8 }
 0x42b   :  { %v3874_v48 = vand.u32 4294901760, %v3873_v39  ;;  %18424 = vmatprep.subr.bf16.mxu0 %v19239_v3 }
 0x42d   :  { %16811 = vmatmul.mubr.f32.gmra.mrb[56].mxu0 %v3874_v48 }
 0x42e   :  { %16819 = vmatprep.mubr.msk.f32.mxu0 %vm19240_vm0, %v19241_v10 }
 0x431   :  { %16820 = vmatmul.mubr.f32.vlgmr.msra.gmra.mrb[58].mxu0 %v20298_v19 }
 0x432   :  { %16822 = vmatprep.mubr.msk.f32.mxu0 %vm19240_vm0, %v19241_v10  ;;  %18426 = vmatpush3.bf16.msra.mxu0 %v18425_v15 }
 0x433   :  { %16832 = vmatprep.subr.mxu0 %v19241_v10 }
 0x435   :  { %16823 = vmatmul.mubr.f32.gmra.mrb[60].mxu0 %v20302_v6 }
 0x436   :  { %16825 = vmatprep.mubr.msk.f32.mxu0 %vm19240_vm0, %v19241_v10  ;;  %16833 = vmatpush3.msra.mxu0 %v3896_v16 }
 0x437   :  { %18427 = vmatprep.subr.bf16.mxu0 %v19239_v3 }
 0x439   :  { %16826 = vmatmul.mubr.f32.gmra.mrb[62].mxu0 %v3870_v27 }
 0x43a   :  { %16834 = vmatprep.mubr.msk.f32.mxu0 %vm19240_vm0, %v19241_v10 }
 0x43d   :  { %16835 = vmatmul.mubr.f32.vlgmr.msra.gmra.mrb[64].mxu0 %v3851_v20 }
 0x43e   :  { %16837 = vmatprep.mubr.msk.f32.mxu0 %vm19240_vm0, %v19241_v10  ;;  %18429 = vmatpush3.bf16.msra.mxu0 %v20253_v53 }
 0x43f   :  { %16847 = vmatprep.subr.mxu0 %v19241_v10 }
 0x441   :  { %16838 = vmatmul.mubr.f32.gmra.mrb[66].mxu0 %v3861_v13 }
 0x442   :  { %16840 = vmatprep.mubr.msk.f32.mxu0 %vm19240_vm0, %v19241_v10  ;;  %16848 = vmatpush3.msra.mxu0 %v20267_v63 }
 0x443   :  { %18430 = vmatprep.subr.bf16.mxu0 %v19239_v3 }
 0x445   :  { %16841 = vmatmul.mubr.f32.gmra.mrb[68].mxu0 %v3871_v4  ;;  %v20381_v4 = vand.u32 4294901760, %v4847_v18 }
 0x446   :  { %16849 = vmatprep.mubr.msk.f32.mxu0 %vm19240_vm0, %v19241_v10 }
 0x449   :  { %16850 = vmatmul.mubr.f32.vlgmr.msra.gmra.mrb[70].mxu0 %v3852_v5 }
 0x44a   :  { %16852 = vmatprep.mubr.msk.f32.mxu0 %vm19240_vm0, %v19241_v10  ;;  %18432 = vmatpush3.bf16.msra.mxu0 %v20287_v57 }
 0x44b   :  { %16862 = vmatprep.subr.mxu0 %v19241_v10 }
 0x44d   :  { %16853 = vmatmul.mubr.f32.gmra.mrb[72].mxu0 %v3862_v22 }
 0x44e   :  { %16855 = vmatprep.mubr.msk.f32.mxu0 %vm19240_vm0, %v19241_v10  ;;  %16863 = vmatpush3.msra.mxu0 %v3897_v61  ;;  %v4365_v61 = vld [vmem:[%s21975_s7] sm:$0xff] }
 0x44f   :  { %18433 = vmatprep.subr.bf16.mxu0 %v19239_v3  ;;  %v4367_v13 = vsel %vm2037_vm14, %v4365_v61, 0 }
 0x450   :  { %v20378_v22 = vand.u32 4294901760, %v4367_v13 }
 0x451   :  { %16856 = vmatmul.mubr.f32.gmra.mrb[74].mxu0 %v3872_v58 }
 0x452   :  { %16864 = vmatprep.mubr.msk.f32.mxu0 %vm19240_vm0, %v19241_v10  ;;  %v20387_v48 = vsub.f32 %v4367_v13, %v20378_v22 }
 0x455   :  { %16865 = vmatmul.mubr.f32.vlgmr.msra.gmra.mrb[76].mxu0 %v20298_v19 }
 0x456   :  { %16867 = vmatprep.mubr.msk.f32.mxu0 %vm19240_vm0, %v19241_v10  ;;  %18435 = vmatpush3.bf16.msra.mxu0 %v20253_v53 }
 0x457   :  { %16877 = vmatprep.subr.mxu0 %v19241_v10 }
 0x459   :  { %16868 = vmatmul.mubr.f32.gmra.mrb[78].mxu0 %v20302_v6 }
 0x45a   :  { %16870 = vmatprep.mubr.msk.f32.mxu0 %vm19240_vm0, %v19241_v10  ;;  %16878 = vmatpush3.msra.mxu0 %v20267_v63 }
 0x45b   :  { %18454 = vmatprep.subr.bf16.mxu0 %v19239_v3 }
 0x45d   :  { %16871 = vmatmul.mubr.f32.gmra.mrb[80].mxu0 %v3870_v27 }
 0x45e   :  { %16879 = vmatprep.mubr.msk.f32.mxu0 %vm19240_vm0, %v19241_v10 }
 0x461   :  { %16880 = vmatmul.mubr.f32.vlgmr.msra.gmra.mrb[82].mxu0 %v20298_v19 }
 0x462   :  { %16882 = vmatprep.mubr.msk.f32.mxu0 %vm19240_vm0, %v19241_v10 }
 0x465   :  { %16883 = vmatmul.mubr.f32.gmra.mrb[84].mxu0 %v20302_v6 }
 0x466   :  { %16885 = vmatprep.mubr.msk.f32.mxu0 %vm19240_vm0, %v19241_v10 }
 0x469   :  { %16886 = vmatmul.mubr.f32.gmra.mrb[86].mxu0 %v3870_v27 }
 0x46a   :  { %16948 = vmatprep.mubr.msk.f32.mxu0 %vm19240_vm0, %v19241_v10 }
 0x4f8   :  { %v3856_v53 = vpop.f32.mrb[52].mxu0 }
 0x4f9   :  { %v16806_v56 = vpop.f32.mrb[53].mxu0 }
 0x4fc   :  { %v3866_v62 = vpop.f32.mrb[54].mxu0 }
 0x4fd   :  { %v16809_v63 = vpop.f32.mrb[55].mxu0 }
 0x500   :  { %v3876_v0 = vpop.f32.mrb[56].mxu0 }
 0x501   :  { %v16812_v15 = vpop.f32.mrb[57].mxu0 }
 0x504   :  { %v3962_v57 = vpop.f32.mrb[58].mxu0 }
 0x505   :  { %v3963_v28 = vadd.f32 %v3962_v57, %v3856_v53  ;;  %v16821_v32 = vpop.f32.mrb[59].mxu0 }
 0x506   :  { %v4439_v32 = vand.u32 4294901760, %v20387_v48 }
 0x508   :  { %v3968_v35 = vpop.f32.mrb[60].mxu0 }
 0x509   :  { %v3969_v36 = vadd.f32 %v3968_v35, %v3866_v62  ;;  %v16824_v38 = vpop.f32.mrb[61].mxu0  ;;  %v20391_v62 = vsub.f32 %v4847_v18, %v20381_v4 }
 0x50b   :  { %v4919_v38 = vand.u32 4294901760, %v20391_v62 }
 0x50c   :  { %v3974_v41 = vpop.f32.mrb[62].mxu0 }
 0x50d   :  { %v3975_v42 = vadd.f32 %v3974_v41, %v3876_v0  ;;  %v16827_v43 = vpop.f32.mrb[63].mxu0 }
 0x510   :  { %v4052_v1 = vpop.f32.mrb[64].mxu0 }
 0x511   :  { %v4053_v44 = vadd.f32 %v4052_v1, %v3963_v28  ;;  %v16836_v46 = vpop.f32.mrb[65].mxu0 }
 0x512   :  { %v4440_v46 = vsub.f32 %v20387_v48, %v4439_v32 }
 0x514   :  { %v4059_v47 = vpop.f32.mrb[66].mxu0 }
 0x515   :  { %v4060_v9 = vadd.f32 %v4059_v47, %v3969_v36  ;;  %v16839_v49 = vpop.f32.mrb[67].mxu0  ;;  %v4920_v47 = vsub.f32 %v20391_v62, %v4919_v38 }
 0x518   :  { %v4066_v50 = vpop.f32.mrb[68].mxu0 }
 0x519   :  { %v4067_v11 = vadd.f32 %v4066_v50, %v3975_v42  ;;  %v16842_v52 = vpop.f32.mrb[69].mxu0 }
 0x51c   :  { %v4142_v17 = vpop.f32.mrb[70].mxu0 }
 0x51d   :  { %v4143_v29 = vadd.f32 %v4142_v17, %v4053_v44  ;;  %v16851_v54 = vpop.f32.mrb[71].mxu0 }
 0x51e   :  { %v4921_v54 = vand.u32 4294901760, %v4920_v47 }
 0x520   :  { %v4150_v12 = vpop.f32.mrb[72].mxu0 }
 0x521   :  { %v4151_v30 = vadd.f32 %v4150_v12, %v4060_v9  ;;  %v16854_v51 = vpop.f32.mrb[73].mxu0 }
 0x524   :  { %v4158_v21 = vpop.f32.mrb[74].mxu0 }
 0x525   :  { %v4159_v2 = vadd.f32 %v4158_v21, %v4067_v11  ;;  %v16857_v37 = vpop.f32.mrb[75].mxu0 }
 0x528   :  { %v4238_v45 = vpop.f32.mrb[76].mxu0 }
 0x529   :  { %v4239_v16 = vadd.f32 %v4238_v45, %v4143_v29  ;;  %v16866_v19 = vpop.f32.mrb[77].mxu0  ;;  %v4441_v29 = vand.u32 4294901760, %v4440_v46 }
 0x52c   :  { %v4244_v20 = vpop.f32.mrb[78].mxu0 }
 0x52d   :  { %v4245_v26 = vadd.f32 %v4244_v20, %v4151_v30  ;;  %v16869_v59 = vpop.f32.mrb[79].mxu0  ;;  %v20459_v20 = vld [vmem:[%s21976_s8 + $0x18] sm:$0xff] }
 0x52e   :  { %v5329_v59 = vand.u32 4294901760, %v20459_v20 }
 0x530   :  { %v4250_v60 = vpop.f32.mrb[80].mxu0  ;;  %v20479_v61 = vsub.f32 %v20459_v20, %v5329_v59 }
 0x531   :  { %v4251_v5 = vadd.f32 %v4250_v60, %v4159_v2  ;;  %v16872_v6 = vpop.f32.mrb[81].mxu0 }
 0x532   :  { %v5409_v6 = vand.u32 4294901760, %v20479_v61 }
 0x534   :  { %v4324_v14 = vpop.f32.mrb[82].mxu0  ;;  %v5410_v13 = vsub.f32 %v20479_v61, %v5409_v6 }
 0x535   :  { %v4325_v23 = vadd.f32 %v4324_v14, %v4239_v16  ;;  %v16881_v55 = vpop.f32.mrb[83].mxu0 }
 0x536   :  { %v5411_v18 = vand.u32 4294901760, %v5410_v13 }
 0x537   :  { %v4340_v27 = vadd.f32 %v4325_v23, %v20289_v34 }
 0x538   :  { %v4330_v8 = vpop.f32.mrb[84].mxu0 }
 0x539   :  { %v4348_v58 = vadd.f32 %v15154_v24, %v4340_v27  ;;  %v4331_v31 = vadd.f32 %v4330_v8, %v4245_v26  ;;  %v16884_v39 = vpop.f32.mrb[85].mxu0  ;;  %v15158_v26 = vld [vmem:[%s21976_s8 + $0x20] sm:$0xff] }
 0x53a   :  { %v5332_v60 = vand.u32 4294901760, %v15158_v26  ;;  %v4842_v39 = vld [vmem:[%s21976_s8 + $0x8] sm:$0xff] }
 0x53b   :  { %vm4352_vm15 = vcmp.gt.f32.partialorder %v4348_v58, 0.0  ;;  %v4359_v53 = vmul.f32 %v15155_v40, %v4348_v58  ;;  %v4341_v56 = vadd.f32 %v4331_v31, %v20291_v33  ;;  %v4841_v31 = vld [vmem:[%s21976_s8] sm:$0xff] }
 0x53c   :  { %v4336_v34 = vpop.f32.mrb[86].mxu0 }
 0x53d   :  { %v4362_v63 = vsel %vm4352_vm15, %v4348_v58, %v4359_v53  ;;  %v4349_v0 = vadd.f32 %v15154_v24, %v4341_v56  ;;  %v4337_v15 = vadd.f32 %v4336_v34, %v4251_v5  ;;  %v16887_v57 = vpop.f32.mrb[87].mxu0  ;;  %v20481_v5 = vsub.f32 %v15158_v26, %v5332_v60  ;;  %v4843_v34 = vld [vmem:[%s21976_s8 + $0x10] sm:$0xff] }
 0x53e   :  { %v4370_v28 = vand.u32 4294901760, %v4362_v63  ;;  %v18473_v58 = vpack.c.bf16 %v5332_v60, %v5329_v59  ;;  %v5807_v53 = vand.u32 4294901760, %v4842_v39  ;;  %v15160_v59 = vld [vmem:[%s21975_s7 + $0x10] sm:$0xff] }
 0x53f   :  { %vm4353_vm1 = vcmp.gt.f32.partialorder %v4349_v0, 0.0  ;;  %v4360_v35 = vmul.f32 %v15155_v40, %v4349_v0  ;;  %v4342_v36 = vadd.f32 %v4337_v15, %v20293_v25  ;;  %v5416_v7 = vand.u32 4294901760, %v20481_v5 }
 0x540   :  { %v4449_v41 = vsub.f32 %v4362_v63, %v4370_v28  ;;  %v18479_v46 = vpack.c.bf16 %v20481_v5, %v20479_v61  ;;  %v6278_v61 = vsel %vm2037_vm14, %v15160_v59, 0 }
 0x541   :  { %v4363_v42 = vsel %vm4353_vm1, %v4349_v0, %v4360_v35  ;;  %v4350_v33 = vadd.f32 %v15154_v24, %v4342_v36  ;;  %v5417_v14 = vsub.f32 %v20481_v5, %v5416_v7  ;;  %v15159_v24 = vld [vmem:[%s21976_s8 + $0x28] sm:$0xff]  ;;  %v20557_v36 = vand.u32 4294901760, %v4843_v34 }
 0x542   :  { %v4450_v43 = vand.u32 4294901760, %v4449_v41  ;;  %v4373_v1 = vand.u32 4294901760, %v4363_v42  ;;  %v5335_v27 = vand.u32 4294901760, %v15159_v24 }
 0x543   :  { %vm4354_vm2 = vcmp.gt.f32.partialorder %v4350_v33, 0.0  ;;  %v4361_v44 = vmul.f32 %v15155_v40, %v4350_v33  ;;  %v5418_v23 = vand.u32 4294901760, %v5417_v14 }
 0x544   :  { %v20402_v9 = vpack.c.bf16 %v4373_v1, %v4370_v28  ;;  %v4456_v25 = vsub.f32 %v4363_v42, %v4373_v1  ;;  %v4451_v50 = vsub.f32 %v4449_v41, %v4450_v43  ;;  %v20532_v40 = vsub.f32 %v15159_v24, %v5335_v27  ;;  %v15164_v24 = vld [vmem:[%s21975_s7 + $0x18] sm:$0xff] }
 0x545   :  { %v4364_v49 = vsel %vm4354_vm2, %v4350_v33, %v4361_v44  ;;  %v18476_v55 = vpack.c.bf16 %v5418_v23, %v5411_v18 }
 0x546   :  { %v4457_v11 = vand.u32 4294901760, %v4456_v25  ;;  %v20404_v52 = vpack.c.bf16 %v4456_v25, %v4449_v41  ;;  %v20406_v17 = vand.u32 4294901760, %v4364_v49  ;;  %18438 = vmatpush3.bf16.msra.mxu1 %v20402_v9  ;;  %18456 = vmatpush3.bf16.msra.mxu0 %v20402_v9  ;;  %v4452_v21 = vand.u32 4294901760, %v4451_v50 }
 0x547   :  { %16892 = vmatprep.subr.mxu1 %v19241_v10  ;;  %16946 = vmatprep.subr.mxu0 %v19241_v10 }
 0x548   :  { %v4458_v12 = vsub.f32 %v4456_v25, %v4457_v11  ;;  %v20412_v30 = vpack.c.bf16 %v4457_v11, %v4450_v43  ;;  %v20415_v51 = vsub.f32 %v4364_v49, %v20406_v17  ;;  %v20568_v43 = vsub.f32 %v4843_v34, %v20557_v36 }
 0x54a   :  { %v4459_v2 = vand.u32 4294901760, %v4458_v12  ;;  %v20418_v37 = vand.u32 4294901760, %v20415_v51  ;;  %16893 = vmatpush3.msra.mxu1 %v20406_v17  ;;  %16947 = vmatpush3.msra.mxu0 %v20406_v17  ;;  %v5898_v50 = vand.u32 4294901760, %v20568_v43 }
 0x54b   :  { %16895 = vmatmul.mubr.f32.vlgmr.msra.gmra.mrb[48].mxu1 %v4441_v29  ;;  %16949 = vmatmul.mubr.f32.vlgmr.msra.gmra.mrb[88].mxu0 %v4921_v54 }
 0x54c   :  { %v20422_v45 = vpack.c.bf16 %v4459_v2, %v4452_v21  ;;  %18439 = vmatprep.subr.bf16.mxu1 %v19239_v3  ;;  %18457 = vmatprep.subr.bf16.mxu0 %v19239_v3  ;;  %v4465_v16 = vsub.f32 %v20415_v51, %v20418_v37  ;;  %v5899_v12 = vsub.f32 %v20568_v43, %v5898_v50 }
 0x54d   :  { %16903 = vmatprep.mubr.msk.f32.mxu1 %vm19240_vm0, %v19241_v10  ;;  %16957 = vmatprep.mubr.msk.f32.mxu0 %vm19240_vm0, %v19241_v10  ;;  %v18485_v21 = vpack.c.bf16 %v5416_v7, %v5409_v6  ;;  %v20620_v7 = vand.u32 4294901760, %v6278_v61 }
 0x54e   :  { %18441 = vmatpush3.bf16.msra.mxu1 %v20422_v45  ;;  %18459 = vmatpush3.bf16.msra.mxu0 %v20422_v45  ;;  %v20436_v19 = vand.u32 4294901760, %v4465_v16  ;;  %v5900_v16 = vand.u32 4294901760, %v5899_v12 }
 0x54f   :  { %16901 = vmatprep.subr.mxu1 %v19241_v10  ;;  %16955 = vmatprep.subr.mxu0 %v19241_v10  ;;  %v6349_v13 = vsub.f32 %v6278_v61, %v20620_v7 }
 0x551   :  { %v6350_v18 = vand.u32 4294901760, %v6349_v13 }
 0x552   :  { %16902 = vmatpush3.msra.mxu1 %v20436_v19  ;;  %16956 = vmatpush3.msra.mxu0 %v20436_v19 }
 0x553   :  { %16904 = vmatmul.mubr.f32.vlgmr.msra.gmra.mrb[48].mxu1 %v20378_v22  ;;  %18442 = vmatprep.subr.bf16.mxu1 %v19239_v3  ;;  %v6351_v23 = vsub.f32 %v6349_v13, %v6350_v18 }
 0x554   :  { %16958 = vmatmul.mubr.f32.vlgmr.msra.gmra.mrb[88].mxu0 %v20381_v4  ;;  %18460 = vmatprep.subr.bf16.mxu0 %v19239_v3 }
 0x555   :  { %18444 = vmatpush3.bf16.msra.mxu1 %v20404_v52  ;;  %18462 = vmatpush3.bf16.msra.mxu0 %v20404_v52 }
 0x556   :  { %16910 = vmatprep.subr.mxu1 %v19241_v10  ;;  %16964 = vmatprep.subr.mxu0 %v19241_v10 }
 0x557   :  { %16912 = vmatprep.mubr.msk.f32.mxu1 %vm19240_vm0, %v19241_v10  ;;  %16966 = vmatprep.mubr.msk.f32.mxu0 %vm19240_vm0, %v19241_v10 }
 0x559   :  { %16911 = vmatpush3.msra.mxu1 %v20415_v51  ;;  %16965 = vmatpush3.msra.mxu0 %v20415_v51 }
 0x55a   :  { %18445 = vmatprep.subr.bf16.mxu1 %v19239_v3  ;;  %18463 = vmatprep.subr.bf16.mxu0 %v19239_v3 }
 0x55b   :  { %16913 = vmatmul.mubr.f32.vlgmr.msra.gmra.mrb[48].mxu1 %v20387_v48  ;;  %v5804_v48 = vand.u32 4294901760, %v4841_v31 }
 0x55c   :  { %18447 = vmatpush3.bf16.msra.mxu1 %v20402_v9  ;;  %16967 = vmatmul.mubr.f32.vlgmr.msra.gmra.mrb[88].mxu0 %v20391_v62  ;;  %v20549_v62 = vsub.f32 %v4842_v39, %v5807_v53 }
 0x55d   :  { %18465 = vmatpush3.bf16.msra.mxu0 %v20402_v9  ;;  %16919 = vmatprep.subr.mxu1 %v19241_v10  ;;  %v20547_v56 = vsub.f32 %v4841_v31, %v5804_v48  ;;  %v18491_v20 = vpack.c.bf16 %v5807_v53, %v5804_v48  ;;  %v15168_v31 = vld [vmem:[%s21975_s7 + $0x20] sm:$0xff] }
 0x55e   :  { %16973 = vmatprep.subr.mxu0 %v19241_v10  ;;  %16921 = vmatprep.mubr.msk.f32.mxu1 %vm19240_vm0, %v19241_v10  ;;  %v5891_v35 = vand.u32 4294901760, %v20549_v62  ;;  %v8192_v39 = vsel %vm2037_vm14, %v15168_v31, 0 }
 0x55f   :  { %16975 = vmatprep.mubr.msk.f32.mxu0 %vm19240_vm0, %v19241_v10  ;;  %v18497_v5 = vpack.c.bf16 %v20549_v62, %v20547_v56  ;;  %v20724_v48 = vand.u32 4294901760, %v8192_v39 }
 0x560   :  { %16920 = vmatpush3.msra.mxu1 %v20406_v17  ;;  %v5892_v33 = vsub.f32 %v20549_v62, %v5891_v35 }
 0x561   :  { %16974 = vmatpush3.msra.mxu0 %v20406_v17  ;;  %18448 = vmatprep.subr.bf16.mxu1 %v19239_v3  ;;  %v8263_v53 = vsub.f32 %v8192_v39, %v20724_v48 }
 0x562   :  { %18466 = vmatprep.subr.bf16.mxu0 %v19239_v3  ;;  %v5893_v49 = vand.u32 4294901760, %v5892_v33 }
 0x563   :  { %16922 = vmatmul.mubr.f32.vlgmr.msra.gmra.mrb[48].mxu1 %v4439_v32  ;;  %v5884_v32 = vand.u32 4294901760, %v20547_v56 }
 0x564   :  { %18450 = vmatpush3.bf16.msra.mxu1 %v20412_v30  ;;  %16976 = vmatmul.mubr.f32.vlgmr.msra.gmra.mrb[88].mxu0 %v4919_v38 }
 0x565   :  { %18468 = vmatpush3.bf16.msra.mxu0 %v20412_v30  ;;  %16928 = vmatprep.subr.mxu1 %v19241_v10  ;;  %v5885_v42 = vsub.f32 %v20547_v56, %v5884_v32  ;;  %v18503_v14 = vpack.c.bf16 %v5891_v35, %v5884_v32  ;;  %v8264_v56 = vand.u32 4294901760, %v8263_v53  ;;  %v15161_v32 = vld [vmem:[%s21976_s8 + $0x30] sm:$0xff]  ;;  %v15162_v35 = vld [vmem:[%s21976_s8 + $0x38] sm:$0xff] }
 0x566   :  { %16982 = vmatprep.subr.mxu0 %v19241_v10  ;;  %16930 = vmatprep.mubr.msk.f32.mxu1 %vm19240_vm0, %v19241_v10 }
 0x567   :  { %16984 = vmatprep.mubr.msk.f32.mxu0 %vm19240_vm0, %v19241_v10  ;;  %v5886_v25 = vand.u32 4294901760, %v5885_v42  ;;  %v8265_v62 = vsub.f32 %v8263_v53, %v8264_v56 }
 0x568   :  { %16929 = vmatpush3.msra.mxu1 %v20418_v37 }
 0x569   :  { %16983 = vmatpush3.msra.mxu0 %v20418_v37  ;;  %18451 = vmatprep.subr.bf16.mxu1 %v19239_v3  ;;  %v18494_v54 = vpack.c.bf16 %v5893_v49, %v5886_v25  ;;  %v8266_v34 = vand.u32 4294901760, %v8265_v62  ;;  %v20806_v49 = vld [vmem:[%s21976_s8 + $0x40] sm:$0xff] }
 0x56a   :  { %18469 = vmatprep.subr.bf16.mxu0 %v19239_v3 }
 0x56b   :  { %16931 = vmatmul.mubr.f32.vlgmr.msra.gmra.mrb[48].mxu1 %v20378_v22 }
 0x56c   :  { %18453 = vmatpush3.bf16.msra.mxu1 %v20402_v9  ;;  %16985 = vmatmul.mubr.f32.vlgmr.msra.gmra.mrb[88].mxu0 %v20381_v4 }
 0x56d   :  { %18471 = vmatpush3.bf16.msra.mxu0 %v20402_v9  ;;  %16937 = vmatprep.subr.mxu1 %v19241_v10 }
 0x56e   :  { %16991 = vmatprep.subr.mxu0 %v19241_v10  ;;  %16939 = vmatprep.mubr.msk.f32.mxu1 %vm19240_vm0, %v19241_v10 }
 0x56f   :  { %16993 = vmatprep.mubr.msk.f32.mxu0 %vm19240_vm0, %v19241_v10 }
 0x570   :  { %16938 = vmatpush3.msra.mxu1 %v20406_v17 }
 0x571   :  { %16992 = vmatpush3.msra.mxu0 %v20406_v17  ;;  %18472 = vmatprep.subr.bf16.mxu1 %v19239_v3 }
 0x572   :  { %18475 = vmatprep.subr.bf16.mxu0 %v19239_v3 }
 0x573   :  { %16940 = vmatmul.mubr.f32.vlgmr.msra.gmra.mrb[48].mxu1 %v20378_v22  ;;  %v5423_v22 = vand.u32 4294901760, %v20532_v40 }
 0x574   :  { %16994 = vmatmul.mubr.f32.vlgmr.msra.gmra.mrb[88].mxu0 %v20381_v4  ;;  %17002 = vmatprep.mubr.msk.f32.mxu1 %vm19240_vm0, %v19241_v10 }
 0x575   :  { %18477 = vmatpush3.bf16.msra.mxu0 %v18476_v55  ;;  %17011 = vmatprep.mubr.msk.f32.mxu0 %vm19240_vm0, %v19241_v10  ;;  %v5424_v4 = vsub.f32 %v20532_v40, %v5423_v22  ;;  %v6352_v55 = vand.u32 4294901760, %v6351_v23 }
 0x576   :  { %17009 = vmatprep.subr.mxu0 %v19241_v10  ;;  %18474 = vmatpush3.bf16.msra.mxu1 %v18473_v58 }
 0x577   :  { %v5425_v8 = vand.u32 4294901760, %v5424_v4  ;;  %17000 = vmatprep.subr.mxu1 %v19241_v10 }
 0x579   :  { %17010 = vmatpush3.msra.mxu0 %v5425_v8 }
 0x57a   :  { %18481 = vmatprep.subr.bf16.mxu0 %v19239_v3  ;;  %17001 = vmatpush3.msra.mxu1 %v5335_v27 }
 0x57b   :  { %18478 = vmatprep.subr.bf16.mxu1 %v19239_v3 }
 0x646   :  { %v4837_v63 = vpop.f32.mrb[48].mxu1 }
 0x647   :  { %v5317_v0 = vpop.f32.mrb[88].mxu0  ;;  %v16941_v15 = vpop.f32.mrb[49].mxu1  ;;  %v5801_v47 = vsel %vm2037_vm14, %v4837_v63, 0  ;;  %v15172_v63 = vld [vmem:[%s21975_s7 + $0x28] sm:$0xff] }
 0x648   :  { %v5326_v57 = vsel %vm2037_vm14, %v5317_v0, 0  ;;  %v16995_v28 = vpop.f32.mrb[89].mxu0  ;;  %v20578_v29 = vand.u32 4294901760, %v5801_v47  ;;  %v9149_v0 = vsel %vm2037_vm14, %v15172_v63, 0 }
 0x649   :  { %v5396_v38 = vand.u32 4294901760, %v5326_v57  ;;  %v20768_v15 = vand.u32 4294901760, %v9149_v0 }
 0x64a   :  { %v5872_v2 = vsub.f32 %v5801_v47, %v20578_v29 }
 0x64b   :  { %v5397_v41 = vsub.f32 %v5326_v57, %v5396_v38  ;;  %17012 = vmatmul.mubr.f32.vlgmr.msra.gmra.mrb[90].mxu0 %v5396_v38  ;;  %v9220_v57 = vsub.f32 %v9149_v0, %v20768_v15 }
 0x64c   :  { %18483 = vmatpush3.bf16.msra.mxu0 %v18473_v58  ;;  %17029 = vmatprep.mubr.msk.f32.mxu0 %vm19240_vm0, %v19241_v10  ;;  %v5873_v26 = vand.u32 4294901760, %v5872_v2 }
 0x64d   :  { %v5398_v1 = vand.u32 4294901760, %v5397_v41  ;;  %17027 = vmatprep.subr.mxu0 %v19241_v10  ;;  %v9221_v28 = vand.u32 4294901760, %v9220_v57 }
 0x64e   :  { %v5874_v60 = vsub.f32 %v5872_v2, %v5873_v26 }
 0x64f   :  { %v5399_v44 = vsub.f32 %v5397_v41, %v5398_v1  ;;  %v9222_v33 = vsub.f32 %v9220_v57, %v9221_v28 }
 0x650   :  { %17028 = vmatpush3.msra.mxu0 %v5335_v27  ;;  %v5875_v6 = vand.u32 4294901760, %v5874_v60 }
 0x651   :  { %v5400_v11 = vand.u32 4294901760, %v5399_v44  ;;  %17030 = vmatmul.mubr.f32.vlgmr.msra.gmra.mrb[92].mxu0 %v5398_v1  ;;  %18487 = vmatprep.subr.bf16.mxu0 %v19239_v3  ;;  %v9223_v25 = vand.u32 4294901760, %v9222_v33 }
 0x652   :  { %18489 = vmatpush3.bf16.msra.mxu0 %v18473_v58  ;;  %17047 = vmatprep.mubr.msk.f32.mxu0 %vm19240_vm0, %v19241_v10 }
 0x653   :  { %17003 = vmatmul.mubr.f32.vlgmr.msra.gmra.mrb[50].mxu1 %v5400_v11  ;;  %17045 = vmatprep.subr.mxu0 %v19241_v10 }
 0x654   :  { %18480 = vmatpush3.bf16.msra.mxu1 %v18479_v46  ;;  %17020 = vmatprep.mubr.msk.f32.mxu1 %vm19240_vm0, %v19241_v10 }
 0x655   :  { %17018 = vmatprep.subr.mxu1 %v19241_v10 }
 0x656   :  { %17046 = vmatpush3.msra.mxu0 %v5335_v27  ;;  %v7235_v27 = vsel %vm2037_vm14, %v15164_v24, 0 }
 0x657   :  { %17048 = vmatmul.mubr.f32.vlgmr.msra.gmra.mrb[94].mxu0 %v5396_v38  ;;  %18493 = vmatprep.subr.bf16.mxu0 %v19239_v3 }
 0x658   :  { %17019 = vmatpush3.msra.mxu1 %v20532_v40  ;;  %18495 = vmatpush3.bf16.msra.mxu0 %v18494_v54  ;;  %v7305_v40 = vand.u32 4294901760, %v7235_v27  ;;  %v20813_v54 = vand.u32 4294901760, %v20806_v49 }
 0x659   :  { %17021 = vmatmul.mubr.f32.vlgmr.msra.gmra.mrb[52].mxu1 %v5397_v41  ;;  %18484 = vmatprep.subr.bf16.mxu1 %v19239_v3 }
 0x65a   :  { %18486 = vmatpush3.bf16.msra.mxu1 %v18485_v21  ;;  %17063 = vmatprep.subr.mxu0 %v19241_v10  ;;  %v6853_v0 = vsub.f32 %v20806_v49, %v20813_v54  ;;  %v15167_v49 = vld [vmem:[%s21976_s8 + $0x58] sm:$0xff] }
 0x65b   :  { %17065 = vmatprep.mubr.msk.f32.mxu0 %vm19240_vm0, %v19241_v10  ;;  %17036 = vmatprep.subr.mxu1 %v19241_v10 }
 0x65c   :  { %17064 = vmatpush3.msra.mxu0 %v5900_v16  ;;  %17038 = vmatprep.mubr.msk.f32.mxu1 %vm19240_vm0, %v19241_v10 }
 0x65d   :  { %17066 = vmatmul.mubr.f32.vlgmr.msra.gmra.mrb[96].mxu0 %v20578_v29  ;;  %18499 = vmatprep.subr.bf16.mxu0 %v19239_v3 }
 0x65e   :  { %17037 = vmatpush3.msra.mxu1 %v5423_v22  ;;  %18501 = vmatpush3.bf16.msra.mxu0 %v18491_v20  ;;  %v7306_v22 = vsub.f32 %v7235_v27, %v7305_v40 }
 0x65f   :  { %17039 = vmatmul.mubr.f32.vlgmr.msra.gmra.mrb[54].mxu1 %v5396_v38  ;;  %18490 = vmatprep.subr.bf16.mxu1 %v19239_v3  ;;  %v6763_v38 = vand.u32 4294901760, %v15162_v35 }
 0x660   :  { %18492 = vmatpush3.bf16.msra.mxu1 %v18491_v20  ;;  %17081 = vmatprep.subr.mxu0 %v19241_v10  ;;  %v7307_v4 = vand.u32 4294901760, %v7306_v22 }
 0x661   :  { %17083 = vmatprep.mubr.msk.f32.mxu0 %vm19240_vm0, %v19241_v10  ;;  %17054 = vmatprep.subr.mxu1 %v19241_v10  ;;  %v20787_v42 = vsub.f32 %v15162_v35, %v6763_v38 }
 0x662   :  { %17082 = vmatpush3.msra.mxu0 %v20557_v36  ;;  %17056 = vmatprep.mubr.msk.f32.mxu1 %vm19240_vm0, %v19241_v10  ;;  %v7308_v8 = vsub.f32 %v7306_v22, %v7307_v4 }
 0x663   :  { %17084 = vmatmul.mubr.f32.vlgmr.msra.gmra.mrb[98].mxu0 %v5873_v26  ;;  %18505 = vmatprep.subr.bf16.mxu0 %v19239_v3  ;;  %v6847_v44 = vand.u32 4294901760, %v20787_v42 }
 0x664   :  { %17055 = vmatpush3.msra.mxu1 %v20557_v36  ;;  %18507 = vmatpush3.bf16.msra.mxu0 %v18491_v20  ;;  %v7309_v58 = vand.u32 4294901760, %v7308_v8 }
 0x665   :  { %17057 = vmatmul.mubr.f32.vlgmr.msra.gmra.mrb[56].mxu1 %v5875_v6  ;;  %18496 = vmatprep.subr.bf16.mxu1 %v19239_v3  ;;  %v6848_v47 = vsub.f32 %v20787_v42, %v6847_v44 }
 0x666   :  { %18498 = vmatpush3.bf16.msra.mxu1 %v18497_v5  ;;  %17099 = vmatprep.subr.mxu0 %v19241_v10 }
 0x667   :  { %17101 = vmatprep.mubr.msk.f32.mxu0 %vm19240_vm0, %v19241_v10  ;;  %17072 = vmatprep.subr.mxu1 %v19241_v10  ;;  %v6849_v11 = vand.u32 4294901760, %v6848_v47 }
 0x668   :  { %17100 = vmatpush3.msra.mxu0 %v20557_v36  ;;  %17074 = vmatprep.mubr.msk.f32.mxu1 %vm19240_vm0, %v19241_v10  ;;  %v6760_v36 = vand.u32 4294901760, %v15161_v32 }
 0x669   :  { %17102 = vmatmul.mubr.f32.vlgmr.msra.gmra.mrb[100].mxu0 %v20578_v29  ;;  %18526 = vmatprep.subr.bf16.mxu0 %v19239_v3 }
 0x66a   :  { %17073 = vmatpush3.msra.mxu1 %v20568_v43  ;;  %17164 = vmatprep.mubr.msk.f32.mxu0 %vm19240_vm0, %v19241_v10  ;;  %v20785_v41 = vsub.f32 %v15161_v32, %v6760_v36  ;;  %v20790_v43 = vpack.c.bf16 %v6763_v38, %v6760_v36 }
 0x66b   :  { %17075 = vmatmul.mubr.f32.vlgmr.msra.gmra.mrb[58].mxu1 %v5872_v2  ;;  %18502 = vmatprep.subr.bf16.mxu1 %v19239_v3 }
 0x66c   :  { %18504 = vmatpush3.bf16.msra.mxu1 %v18503_v14  ;;  %17092 = vmatprep.mubr.msk.f32.mxu1 %vm19240_vm0, %v19241_v10  ;;  %v6840_v1 = vand.u32 4294901760, %v20785_v41  ;;  %v18533_v12 = vpack.c.bf16 %v20787_v42, %v20785_v41  ;;  %v15166_v42 = vld [vmem:[%s21976_s8 + $0x50] sm:$0xff] }
 0x66d   :  { %17090 = vmatprep.subr.mxu1 %v19241_v10  ;;  %18528 = vmatpush3.bf16.msra.mxu0 %v20790_v43 }
 0x66e   :  { %v6841_v46 = vsub.f32 %v20785_v41, %v6840_v1  ;;  %17162 = vmatprep.subr.mxu0 %v19241_v10  ;;  %v15165_v41 = vld [vmem:[%s21976_s8 + $0x48] sm:$0xff] }
 0x670   :  { %17091 = vmatpush3.msra.mxu1 %v5898_v50  ;;  %v6842_v50 = vand.u32 4294901760, %v6841_v46 }
 0x671   :  { %17093 = vmatmul.mubr.f32.vlgmr.msra.gmra.mrb[60].mxu1 %v20578_v29  ;;  %18508 = vmatprep.subr.bf16.mxu1 %v19239_v3 }
 0x672   :  { %18510 = vmatpush3.bf16.msra.mxu1 %v20402_v9  ;;  %17110 = vmatprep.mubr.msk.f32.mxu1 %vm19240_vm0, %v19241_v10  ;;  %v20809_v29 = vpack.c.bf16 %v6849_v11, %v6842_v50  ;;  %v7723_v50 = vand.u32 4294901760, %v15167_v49 }
 0x673   :  { %17108 = vmatprep.subr.mxu1 %v19241_v10  ;;  %17163 = vmatpush3.msra.mxu0 %v20813_v54 }
 0x674   :  { %18529 = vmatprep.subr.bf16.mxu0 %v19239_v3 }
 0x676   :  { %17109 = vmatpush3.msra.mxu1 %v20406_v17 }
 0x677   :  { %17111 = vmatmul.mubr.f32.vlgmr.msra.gmra.mrb[62].mxu1 %v6352_v55  ;;  %18511 = vmatprep.subr.bf16.mxu1 %v19239_v3 }
 0x678   :  { %18513 = vmatpush3.bf16.msra.mxu1 %v20422_v45  ;;  %17119 = vmatprep.mubr.msk.f32.mxu1 %vm19240_vm0, %v19241_v10 }
 0x679   :  { %17117 = vmatprep.subr.mxu1 %v19241_v10 }
 0x67c   :  { %17118 = vmatpush3.msra.mxu1 %v20436_v19 }
 0x67d   :  { %18514 = vmatprep.subr.bf16.mxu1 %v19239_v3 }
 0x67f   :  { %17120 = vmatmul.mubr.f32.vlgmr.msra.gmra.mrb[62].mxu1 %v20620_v7 }
 0x680   :  { %18516 = vmatpush3.bf16.msra.mxu1 %v20404_v52  ;;  %17128 = vmatprep.mubr.msk.f32.mxu1 %vm19240_vm0, %v19241_v10 }
 0x681   :  { %17126 = vmatprep.subr.mxu1 %v19241_v10 }
 0x684   :  { %17127 = vmatpush3.msra.mxu1 %v20415_v51 }
 0x685   :  { %18517 = vmatprep.subr.bf16.mxu1 %v19239_v3 }
 0x687   :  { %17129 = vmatmul.mubr.f32.vlgmr.msra.gmra.mrb[62].mxu1 %v6349_v13 }
 0x688   :  { %18519 = vmatpush3.bf16.msra.mxu1 %v20402_v9  ;;  %17137 = vmatprep.mubr.msk.f32.mxu1 %vm19240_vm0, %v19241_v10 }
 0x689   :  { %17135 = vmatprep.subr.mxu1 %v19241_v10 }
 0x68c   :  { %17136 = vmatpush3.msra.mxu1 %v20406_v17 }
 0x68d   :  { %18520 = vmatprep.subr.bf16.mxu1 %v19239_v3 }
 0x68f   :  { %17138 = vmatmul.mubr.f32.vlgmr.msra.gmra.mrb[62].mxu1 %v6350_v18 }
 0x690   :  { %18522 = vmatpush3.bf16.msra.mxu1 %v20412_v30  ;;  %17146 = vmatprep.mubr.msk.f32.mxu1 %vm19240_vm0, %v19241_v10 }
 0x691   :  { %17144 = vmatprep.subr.mxu1 %v19241_v10 }
 0x694   :  { %17145 = vmatpush3.msra.mxu1 %v20418_v37 }
 0x695   :  { %18523 = vmatprep.subr.bf16.mxu1 %v19239_v3 }
 0x697   :  { %17147 = vmatmul.mubr.f32.vlgmr.msra.gmra.mrb[62].mxu1 %v20620_v7 }
 0x698   :  { %18525 = vmatpush3.bf16.msra.mxu1 %v20402_v9  ;;  %17155 = vmatprep.mubr.msk.f32.mxu1 %vm19240_vm0, %v19241_v10 }
 0x699   :  { %17153 = vmatprep.subr.mxu1 %v19241_v10 }
 0x69c   :  { %17154 = vmatpush3.msra.mxu1 %v20406_v17 }
 0x69d   :  { %18544 = vmatprep.subr.bf16.mxu1 %v19239_v3 }
 0x69f   :  { %17156 = vmatmul.mubr.f32.vlgmr.msra.gmra.mrb[62].mxu1 %v20620_v7 }
 0x6a0   :  { %18546 = vmatpush3.bf16.msra.mxu1 %v20402_v9  ;;  %17218 = vmatprep.mubr.msk.f32.mxu1 %vm19240_vm0, %v19241_v10 }
 0x6a1   :  { %17216 = vmatprep.subr.mxu1 %v19241_v10 }
 0x6a4   :  { %17217 = vmatpush3.msra.mxu1 %v20406_v17 }
 0x6a5   :  { %17219 = vmatmul.mubr.f32.vlgmr.msra.gmra.mrb[64].mxu1 %v7309_v58  ;;  %18547 = vmatprep.subr.bf16.mxu1 %v19239_v3 }
 0x6a6   :  { %18549 = vmatpush3.bf16.msra.mxu1 %v20422_v45  ;;  %17227 = vmatprep.mubr.msk.f32.mxu1 %vm19240_vm0, %v19241_v10 }
 0x6a7   :  { %17225 = vmatprep.subr.mxu1 %v19241_v10 }
 0x6aa   :  { %17226 = vmatpush3.msra.mxu1 %v20436_v19 }
 0x6ab   :  { %18550 = vmatprep.subr.bf16.mxu1 %v19239_v3 }
 0x6ad   :  { %17228 = vmatmul.mubr.f32.vlgmr.msra.gmra.mrb[64].mxu1 %v7305_v40 }
 0x6ae   :  { %18552 = vmatpush3.bf16.msra.mxu1 %v20404_v52  ;;  %17236 = vmatprep.mubr.msk.f32.mxu1 %vm19240_vm0, %v19241_v10 }
 0x6af   :  { %17234 = vmatprep.subr.mxu1 %v19241_v10 }
 0x6b2   :  { %17235 = vmatpush3.msra.mxu1 %v20415_v51 }
 0x6b3   :  { %18553 = vmatprep.subr.bf16.mxu1 %v19239_v3 }
 0x6b5   :  { %17237 = vmatmul.mubr.f32.vlgmr.msra.gmra.mrb[64].mxu1 %v7306_v22 }
 0x6b6   :  { %18555 = vmatpush3.bf16.msra.mxu1 %v20402_v9  ;;  %17245 = vmatprep.mubr.msk.f32.mxu1 %vm19240_vm0, %v19241_v10 }
 0x6b7   :  { %17243 = vmatprep.subr.mxu1 %v19241_v10 }
 0x6ba   :  { %17244 = vmatpush3.msra.mxu1 %v20406_v17 }
 0x6bb   :  { %18556 = vmatprep.subr.bf16.mxu1 %v19239_v3 }
 0x6bd   :  { %17246 = vmatmul.mubr.f32.vlgmr.msra.gmra.mrb[64].mxu1 %v7307_v4 }
 0x6be   :  { %18558 = vmatpush3.bf16.msra.mxu1 %v20412_v30  ;;  %17254 = vmatprep.mubr.msk.f32.mxu1 %vm19240_vm0, %v19241_v10 }
 0x6bf   :  { %17252 = vmatprep.subr.mxu1 %v19241_v10 }
 0x6c2   :  { %17253 = vmatpush3.msra.mxu1 %v20418_v37 }
 0x6c3   :  { %18559 = vmatprep.subr.bf16.mxu1 %v19239_v3 }
 0x6c5   :  { %17255 = vmatmul.mubr.f32.vlgmr.msra.gmra.mrb[64].mxu1 %v7305_v40 }
 0x6c6   :  { %18561 = vmatpush3.bf16.msra.mxu1 %v20402_v9  ;;  %17263 = vmatprep.mubr.msk.f32.mxu1 %vm19240_vm0, %v19241_v10 }
 0x6c7   :  { %17261 = vmatprep.subr.mxu1 %v19241_v10 }
 0x6ca   :  { %17262 = vmatpush3.msra.mxu1 %v20406_v17 }
 0x6cb   :  { %18580 = vmatprep.subr.bf16.mxu1 %v19239_v3 }
 0x6cd   :  { %17264 = vmatmul.mubr.f32.vlgmr.msra.gmra.mrb[64].mxu1 %v7305_v40 }
 0x6ce   :  { %18582 = vmatpush3.bf16.msra.mxu1 %v20402_v9  ;;  %17326 = vmatprep.mubr.msk.f32.mxu1 %vm19240_vm0, %v19241_v10 }
 0x6cf   :  { %17324 = vmatprep.subr.mxu1 %v19241_v10 }
 0x6d2   :  { %17325 = vmatpush3.msra.mxu1 %v20406_v17 }
 0x6d3   :  { %17327 = vmatmul.mubr.f32.vlgmr.msra.gmra.mrb[66].mxu1 %v8266_v34  ;;  %18583 = vmatprep.subr.bf16.mxu1 %v19239_v3 }
 0x6d4   :  { %18585 = vmatpush3.bf16.msra.mxu1 %v20422_v45  ;;  %17335 = vmatprep.mubr.msk.f32.mxu1 %vm19240_vm0, %v19241_v10 }
 0x6d5   :  { %17333 = vmatprep.subr.mxu1 %v19241_v10 }
 0x6d8   :  { %17334 = vmatpush3.msra.mxu1 %v20436_v19 }
 0x6d9   :  { %18586 = vmatprep.subr.bf16.mxu1 %v19239_v3 }
 0x6db   :  { %17336 = vmatmul.mubr.f32.vlgmr.msra.gmra.mrb[66].mxu1 %v20724_v48 }
 0x6dc   :  { %18588 = vmatpush3.bf16.msra.mxu1 %v20404_v52  ;;  %17344 = vmatprep.mubr.msk.f32.mxu1 %vm19240_vm0, %v19241_v10 }
 0x6dd   :  { %17342 = vmatprep.subr.mxu1 %v19241_v10 }
 0x6e0   :  { %17343 = vmatpush3.msra.mxu1 %v20415_v51 }
 0x6e1   :  { %18589 = vmatprep.subr.bf16.mxu1 %v19239_v3 }
 0x6e3   :  { %17345 = vmatmul.mubr.f32.vlgmr.msra.gmra.mrb[66].mxu1 %v8263_v53 }
 0x6e4   :  { %18591 = vmatpush3.bf16.msra.mxu1 %v20402_v9  ;;  %17353 = vmatprep.mubr.msk.f32.mxu1 %vm19240_vm0, %v19241_v10 }
 0x6e5   :  { %17351 = vmatprep.subr.mxu1 %v19241_v10 }
 0x6e8   :  { %17352 = vmatpush3.msra.mxu1 %v20406_v17 }
 0x6e9   :  { %18592 = vmatprep.subr.bf16.mxu1 %v19239_v3 }
 0x6eb   :  { %17354 = vmatmul.mubr.f32.vlgmr.msra.gmra.mrb[66].mxu1 %v8264_v56 }
 0x6ec   :  { %18594 = vmatpush3.bf16.msra.mxu1 %v20412_v30  ;;  %17362 = vmatprep.mubr.msk.f32.mxu1 %vm19240_vm0, %v19241_v10 }
 0x6ed   :  { %17360 = vmatprep.subr.mxu1 %v19241_v10 }
 0x6f0   :  { %17361 = vmatpush3.msra.mxu1 %v20418_v37 }
 0x6f1   :  { %18595 = vmatprep.subr.bf16.mxu1 %v19239_v3 }
 0x6f3   :  { %17363 = vmatmul.mubr.f32.vlgmr.msra.gmra.mrb[66].mxu1 %v20724_v48 }
 0x6f4   :  { %18597 = vmatpush3.bf16.msra.mxu1 %v20402_v9  ;;  %17371 = vmatprep.mubr.msk.f32.mxu1 %vm19240_vm0, %v19241_v10 }
 0x6f5   :  { %17369 = vmatprep.subr.mxu1 %v19241_v10 }
 0x6f8   :  { %17370 = vmatpush3.msra.mxu1 %v20406_v17 }
 0x6f9   :  { %18616 = vmatprep.subr.bf16.mxu1 %v19239_v3 }
 0x6fb   :  { %17372 = vmatmul.mubr.f32.vlgmr.msra.gmra.mrb[66].mxu1 %v20724_v48 }
 0x6fc   :  { %18618 = vmatpush3.bf16.msra.mxu1 %v20402_v9  ;;  %17434 = vmatprep.mubr.msk.f32.mxu1 %vm19240_vm0, %v19241_v10 }
 0x6fd   :  { %17432 = vmatprep.subr.mxu1 %v19241_v10 }
 0x700   :  { %17433 = vmatpush3.msra.mxu1 %v20406_v17 }
 0x701   :  { %17435 = vmatmul.mubr.f32.vlgmr.msra.gmra.mrb[68].mxu1 %v9223_v25  ;;  %18619 = vmatprep.subr.bf16.mxu1 %v19239_v3 }
 0x702   :  { %18621 = vmatpush3.bf16.msra.mxu1 %v20422_v45  ;;  %17443 = vmatprep.mubr.msk.f32.mxu1 %vm19240_vm0, %v19241_v10  ;;  %v20832_v45 = vpack.c.bf16 %v6847_v44, %v6840_v1  ;;  %v7717_v1 = vand.u32 4294901760, %v15165_v41  ;;  %v7720_v44 = vand.u32 4294901760, %v15166_v42 }
 0x703   :  { %17441 = vmatprep.subr.mxu1 %v19241_v10 }
 0x704   :  { %v18563_v46 = vpack.c.bf16 %v7720_v44, %v7717_v1  ;;  %v7796_v47 = vsub.f32 %v15165_v41, %v7717_v1  ;;  %v7803_v25 = vsub.f32 %v15166_v42, %v7720_v44  ;;  %v15174_v41 = vld [vmem:[%s21976_s8 + $0x80] sm:$0xff] }
 0x705   :  { %v9634_v1 = vand.u32 4294901760, %v15174_v41 }
 0x706   :  { %17442 = vmatpush3.msra.mxu1 %v20436_v19  ;;  %v7804_v11 = vand.u32 4294901760, %v7803_v25 }
 0x707   :  { %18622 = vmatprep.subr.bf16.mxu1 %v19239_v3 }
 0x709   :  { %17444 = vmatmul.mubr.f32.vlgmr.msra.gmra.mrb[68].mxu1 %v20768_v15 }
 0x70a   :  { %18624 = vmatpush3.bf16.msra.mxu1 %v20404_v52  ;;  %17452 = vmatprep.mubr.msk.f32.mxu1 %vm19240_vm0, %v19241_v10 }
 0x70b   :  { %17450 = vmatprep.subr.mxu1 %v19241_v10 }
 0x70e   :  { %17451 = vmatpush3.msra.mxu1 %v20415_v51 }
 0x70f   :  { %18625 = vmatprep.subr.bf16.mxu1 %v19239_v3 }
 0x711   :  { %17453 = vmatmul.mubr.f32.vlgmr.msra.gmra.mrb[68].mxu1 %v9220_v57 }
 0x712   :  { %18627 = vmatpush3.bf16.msra.mxu1 %v20402_v9  ;;  %17461 = vmatprep.mubr.msk.f32.mxu1 %vm19240_vm0, %v19241_v10 }
 0x713   :  { %17459 = vmatprep.subr.mxu1 %v19241_v10 }
 0x716   :  { %17460 = vmatpush3.msra.mxu1 %v20406_v17 }
 0x717   :  { %18628 = vmatprep.subr.bf16.mxu1 %v19239_v3 }
 0x719   :  { %17462 = vmatmul.mubr.f32.vlgmr.msra.gmra.mrb[68].mxu1 %v9221_v28  ;;  %v6854_v28 = vand.u32 4294901760, %v6853_v0 }
 0x71a   :  { %18630 = vmatpush3.bf16.msra.mxu1 %v20412_v30  ;;  %17470 = vmatprep.mubr.msk.f32.mxu1 %vm19240_vm0, %v19241_v10 }
 0x71b   :  { %17468 = vmatprep.subr.mxu1 %v19241_v10  ;;  %v6855_v36 = vsub.f32 %v6853_v0, %v6854_v28 }
 0x71d   :  { %v6856_v33 = vand.u32 4294901760, %v6855_v36 }
 0x71e   :  { %17469 = vmatpush3.msra.mxu1 %v20418_v37  ;;  %v5488_v52 = vpop.f32.mrb[90].mxu0 }
 0x71f   :  { %18631 = vmatprep.subr.bf16.mxu1 %v19239_v3  ;;  %v17013_v51 = vpop.f32.mrb[91].mxu0 }
 0x721   :  { %17471 = vmatmul.mubr.f32.vlgmr.msra.gmra.mrb[68].mxu1 %v20768_v15 }
 0x722   :  { %18633 = vmatpush3.bf16.msra.mxu1 %v20402_v9  ;;  %17479 = vmatprep.mubr.msk.f32.mxu1 %vm19240_vm0, %v19241_v10 }
 0x723   :  { %17477 = vmatprep.subr.mxu1 %v19241_v10 }
 0x724   :  { %v5642_v30 = vpop.f32.mrb[92].mxu0 }
 0x725   :  { %v17031_v19 = vpop.f32.mrb[93].mxu0 }
 0x726   :  { %17478 = vmatpush3.msra.mxu1 %v20406_v17  ;;  %v5402_v21 = vpop.f32.mrb[50].mxu1 }
 0x727   :  { %v5489_v2 = vadd.f32 %v5488_v52, %v5402_v21  ;;  %v17004_v37 = vpop.f32.mrb[51].mxu1  ;;  %17536 = vmatprep.subr.mxu1 %v19241_v10  ;;  %v7810_v52 = vsub.f32 %v15167_v49, %v7723_v50 }
 0x729   :  { %17480 = vmatmul.mubr.f32.vlgmr.msra.gmra.mrb[68].mxu1 %v20768_v15  ;;  %v7811_v37 = vand.u32 4294901760, %v7810_v52 }
 0x72a   :  { %v5796_v16 = vpop.f32.mrb[94].mxu0  ;;  %17538 = vmatprep.mubr.msk.f32.mxu1 %vm19240_vm0, %v19241_v10 }
 0x72b   :  { %v17049_v9 = vpop.f32.mrb[95].mxu0 }
 0x72c   :  { %v5566_v20 = vpop.f32.mrb[52].mxu1 }
 0x72d   :  { %v5567_v26 = vadd.f32 %v5566_v20, %v5489_v2  ;;  %v17022_v59 = vpop.f32.mrb[53].mxu1 }
 0x72f   :  { %v5643_v60 = vadd.f32 %v5642_v30, %v5567_v26  ;;  %v7812_v26 = vsub.f32 %v7810_v52, %v7811_v37 }
 0x730   :  { %v5963_v61 = vpop.f32.mrb[96].mxu0 }
 0x731   :  { %v17067_v5 = vpop.f32.mrb[97].mxu0 }
 0x732   :  { %v5722_v6 = vpop.f32.mrb[54].mxu1 }
 0x733   :  { %v5723_v17 = vadd.f32 %v5722_v6, %v5643_v60  ;;  %v17040_v7 = vpop.f32.mrb[55].mxu1  ;;  %v7813_v60 = vand.u32 4294901760, %v7812_v26  ;;  %v15169_v6 = vld [vmem:[%s21976_s8 + $0x60] sm:$0xff] }
 0x734   :  { %v8674_v7 = vand.u32 4294901760, %v15169_v6 }
 0x735   :  { %v5797_v13 = vadd.f32 %v5796_v16, %v5723_v17  ;;  %v15170_v17 = vld [vmem:[%s21976_s8 + $0x68] sm:$0xff] }
 0x736   :  { %v6117_v14 = vpop.f32.mrb[98].mxu0 }
 0x737   :  { %v17085_v18 = vpop.f32.mrb[99].mxu0 }
 0x738   :  { %v5877_v23 = vpop.f32.mrb[56].mxu1  ;;  %v8753_v18 = vsub.f32 %v15169_v6, %v8674_v7 }
 0x739   :  { %v5878_v55 = vadd.f32 %v5877_v23, %v5797_v13  ;;  %v17058_v24 = vpop.f32.mrb[57].mxu1  ;;  %v8677_v13 = vand.u32 4294901760, %v15170_v17 }
 0x73b   :  { %v5964_v27 = vadd.f32 %v5963_v61, %v5878_v55  ;;  %v18569_v61 = vpack.c.bf16 %v7803_v25, %v7796_v47  ;;  %v8760_v23 = vsub.f32 %v15170_v17, %v8677_v13  ;;  %v15171_v55 = vld [vmem:[%s21976_s8 + $0x70] sm:$0xff] }
 0x73c   :  { %v6271_v40 = vpop.f32.mrb[100].mxu0  ;;  %v8680_v24 = vand.u32 4294901760, %v15171_v55 }
 0x73d   :  { %v17103_v22 = vpop.f32.mrb[101].mxu0  ;;  %v18605_v36 = vpack.c.bf16 %v8760_v23, %v8753_v18 }
 0x73e   :  { %v6041_v4 = vpop.f32.mrb[58].mxu1 }
 0x73f   :  { %v6042_v8 = vadd.f32 %v6041_v4, %v5964_v27  ;;  %v17076_v58 = vpop.f32.mrb[59].mxu1  ;;  %v8754_v27 = vand.u32 4294901760, %v8753_v18 }
 0x740   :  { %v8767_v58 = vsub.f32 %v15171_v55, %v8680_v24 }
 0x741   :  { %v6118_v31 = vadd.f32 %v6117_v14, %v6042_v8  ;;  %v18599_v14 = vpack.c.bf16 %v8677_v13, %v8674_v7 }
 0x744   :  { %v6197_v39 = vpop.f32.mrb[60].mxu1 }
 0x745   :  { %v6198_v48 = vadd.f32 %v6197_v39, %v6118_v31  ;;  %v17094_v53 = vpop.f32.mrb[61].mxu1  ;;  %v8755_v31 = vsub.f32 %v8753_v18, %v8754_v27 }
 0x747   :  { %v20856_v56 = vadd.f32 %v6271_v40, %v6198_v48  ;;  %v8761_v40 = vand.u32 4294901760, %v8760_v23 }
 0x749   :  { %v8762_v39 = vsub.f32 %v8760_v23, %v8761_v40 }
 0x772   :  { %v6748_v62 = vpop.f32.mrb[62].mxu1 }
 0x773   :  { %v6757_v34 = vsel %vm2037_vm14, %v6748_v62, 0  ;;  %v17157_v63 = vpop.f32.mrb[63].mxu1  ;;  %v8756_v62 = vand.u32 4294901760, %v8755_v31 }
 0x774   :  { %v6827_v15 = vand.u32 4294901760, %v6757_v34  ;;  %v8768_v63 = vand.u32 4294901760, %v8767_v58 }
 0x776   :  { %v6828_v57 = vsub.f32 %v6757_v34, %v6827_v15  ;;  %v8763_v34 = vand.u32 4294901760, %v8762_v39 }
 0x778   :  { %v6829_v32 = vand.u32 4294901760, %v6828_v57 }
 0x77a   :  { %v6830_v35 = vsub.f32 %v6828_v57, %v6829_v32 }
 0x77c   :  { %v6831_v38 = vand.u32 4294901760, %v6830_v35 }
 0x77e   :  { %17165 = vmatmul.mubr.f32.vlgmr.msra.gmra.mrb[102].mxu0 %v6831_v38  ;;  %v18611_v38 = vpack.c.bf16 %v8761_v40, %v8754_v27 }
 0x77f   :  { %18531 = vmatpush3.bf16.msra.mxu0 %v20809_v29  ;;  %17173 = vmatprep.mubr.msk.f32.mxu0 %vm19240_vm0, %v19241_v10 }
 0x780   :  { %17171 = vmatprep.subr.mxu0 %v19241_v10 }
 0x783   :  { %17172 = vmatpush3.msra.mxu0 %v6856_v33  ;;  %v15173_v33 = vld [vmem:[%s21976_s8 + $0x78] sm:$0xff] }
 0x784   :  { %17174 = vmatmul.mubr.f32.vlgmr.msra.gmra.mrb[104].mxu0 %v6827_v15  ;;  %18532 = vmatprep.subr.bf16.mxu0 %v19239_v3  ;;  %v9631_v42 = vand.u32 4294901760, %v15173_v33 }
 0x785   :  { %18534 = vmatpush3.bf16.msra.mxu0 %v18533_v12  ;;  %17182 = vmatprep.mubr.msk.f32.mxu0 %vm19240_vm0, %v19241_v10 }
 0x786   :  { %17180 = vmatprep.subr.mxu0 %v19241_v10  ;;  %v18635_v44 = vpack.c.bf16 %v9634_v1, %v9631_v42 }
 0x789   :  { %17181 = vmatpush3.msra.mxu0 %v6853_v0 }
 0x78a   :  { %17183 = vmatmul.mubr.f32.vlgmr.msra.gmra.mrb[106].mxu0 %v6828_v57  ;;  %18535 = vmatprep.subr.bf16.mxu0 %v19239_v3  ;;  %v18602_v57 = vpack.c.bf16 %v8763_v34, %v8756_v62 }
 0x78b   :  { %18537 = vmatpush3.bf16.msra.mxu0 %v20790_v43  ;;  %17191 = vmatprep.mubr.msk.f32.mxu0 %vm19240_vm0, %v19241_v10 }
 0x78c   :  { %17189 = vmatprep.subr.mxu0 %v19241_v10 }
 0x78f   :  { %17190 = vmatpush3.msra.mxu0 %v20813_v54 }
 0x790   :  { %17192 = vmatmul.mubr.f32.vlgmr.msra.gmra.mrb[108].mxu0 %v6829_v32  ;;  %18538 = vmatprep.subr.bf16.mxu0 %v19239_v3 }
 0x791   :  { %18540 = vmatpush3.bf16.msra.mxu0 %v20832_v45  ;;  %17200 = vmatprep.mubr.msk.f32.mxu0 %vm19240_vm0, %v19241_v10 }
 0x792   :  { %17198 = vmatprep.subr.mxu0 %v19241_v10 }
 0x795   :  { %17199 = vmatpush3.msra.mxu0 %v6854_v28  ;;  %v8769_v28 = vsub.f32 %v8767_v58, %v8768_v63 }
 0x796   :  { %17201 = vmatmul.mubr.f32.vlgmr.msra.gmra.mrb[110].mxu0 %v6827_v15  ;;  %18541 = vmatprep.subr.bf16.mxu0 %v19239_v3 }
 0x797   :  { %18543 = vmatpush3.bf16.msra.mxu0 %v20790_v43  ;;  %17209 = vmatprep.mubr.msk.f32.mxu0 %vm19240_vm0, %v19241_v10  ;;  %v7797_v43 = vand.u32 4294901760, %v7796_v47  ;;  %v8770_v35 = vand.u32 4294901760, %v8769_v28 }
 0x798   :  { %17207 = vmatprep.subr.mxu0 %v19241_v10 }
 0x799   :  { %v7798_v51 = vsub.f32 %v7796_v47, %v7797_v43  ;;  %v18575_v5 = vpack.c.bf16 %v7804_v11, %v7797_v43  ;;  %v9717_v47 = vsub.f32 %v15174_v41, %v9634_v1 }
 0x79b   :  { %17208 = vmatpush3.msra.mxu0 %v20813_v54  ;;  %v7805_v54 = vsub.f32 %v7803_v25, %v7804_v11  ;;  %v7799_v21 = vand.u32 4294901760, %v7798_v51  ;;  %v15175_v25 = vld [vmem:[%s21976_s8 + $0x88] sm:$0xff]  ;;  %v9718_v43 = vand.u32 4294901760, %v9717_v47 }
 0x79c   :  { %17210 = vmatmul.mubr.f32.vlgmr.msra.gmra.mrb[112].mxu0 %v6827_v15  ;;  %18562 = vmatprep.subr.bf16.mxu0 %v19239_v3  ;;  %v9637_v49 = vand.u32 4294901760, %v15175_v25 }
 0x79d   :  { %18564 = vmatpush3.bf16.msra.mxu0 %v18563_v46  ;;  %17272 = vmatprep.mubr.msk.f32.mxu0 %vm19240_vm0, %v19241_v10  ;;  %v7806_v2 = vand.u32 4294901760, %v7805_v54  ;;  %v9719_v51 = vsub.f32 %v9717_v47, %v9718_v43 }
 0x79e   :  { %17270 = vmatprep.subr.mxu0 %v19241_v10 }
 0x79f   :  { %v18566_v20 = vpack.c.bf16 %v7806_v2, %v7799_v21  ;;  %v9720_v21 = vand.u32 4294901760, %v9719_v51 }
 0x7a0   :  { %v7705_v29 = vpop.f32.mrb[64].mxu1 }
 0x7a1   :  { %v7714_v12 = vsel %vm2037_vm14, %v7705_v29, 0  ;;  %v17265_v45 = vpop.f32.mrb[65].mxu1  ;;  %17271 = vmatpush3.msra.mxu0 %v7723_v50 }
 0x7a2   :  { %v7784_v30 = vand.u32 4294901760, %v7714_v12  ;;  %18565 = vmatprep.subr.bf16.mxu0 %v19239_v3  ;;  %v9724_v45 = vsub.f32 %v15175_v25, %v9637_v49 }
 0x7a4   :  { %v7785_v19 = vsub.f32 %v7714_v12, %v7784_v30  ;;  %v9725_v2 = vand.u32 4294901760, %v9724_v45 }
 0x7a6   :  { %v7786_v16 = vand.u32 4294901760, %v7785_v19 }
 0x7a8   :  { %v7787_v9 = vsub.f32 %v7785_v19, %v7786_v16 }
 0x7aa   :  { %v7788_v59 = vand.u32 4294901760, %v7787_v9 }
 0x7ac   :  { %17273 = vmatmul.mubr.f32.vlgmr.msra.gmra.mrb[114].mxu0 %v7788_v59 }
 0x7ad   :  { %18567 = vmatpush3.bf16.msra.mxu0 %v18566_v20  ;;  %17281 = vmatprep.mubr.msk.f32.mxu0 %vm19240_vm0, %v19241_v10  ;;  %v9726_v20 = vsub.f32 %v9724_v45, %v9725_v2 }
 0x7ae   :  { %17279 = vmatprep.subr.mxu0 %v19241_v10 }
 0x7af   :  { %v9727_v59 = vand.u32 4294901760, %v9726_v20 }
 0x7b1   :  { %17280 = vmatpush3.msra.mxu0 %v7813_v60 }
 0x7b2   :  { %17282 = vmatmul.mubr.f32.vlgmr.msra.gmra.mrb[116].mxu0 %v7784_v30  ;;  %18568 = vmatprep.subr.bf16.mxu0 %v19239_v3 }
 0x7b3   :  { %18570 = vmatpush3.bf16.msra.mxu0 %v18569_v61  ;;  %17290 = vmatprep.mubr.msk.f32.mxu0 %vm19240_vm0, %v19241_v10 }
 0x7b4   :  { %17288 = vmatprep.subr.mxu0 %v19241_v10 }
 0x7b7   :  { %17289 = vmatpush3.msra.mxu0 %v7810_v52 }
 0x7b8   :  { %17291 = vmatmul.mubr.f32.vlgmr.msra.gmra.mrb[118].mxu0 %v7785_v19  ;;  %18571 = vmatprep.subr.bf16.mxu0 %v19239_v3 }
 0x7b9   :  { %18573 = vmatpush3.bf16.msra.mxu0 %v18563_v46  ;;  %17299 = vmatprep.mubr.msk.f32.mxu0 %vm19240_vm0, %v19241_v10 }
 0x7ba   :  { %17297 = vmatprep.subr.mxu0 %v19241_v10 }
 0x7bd   :  { %17298 = vmatpush3.msra.mxu0 %v7723_v50 }
 0x7be   :  { %17300 = vmatmul.mubr.f32.vlgmr.msra.gmra.mrb[120].mxu0 %v7786_v16  ;;  %18574 = vmatprep.subr.bf16.mxu0 %v19239_v3 }
 0x7bf   :  { %18576 = vmatpush3.bf16.msra.mxu0 %v18575_v5  ;;  %17308 = vmatprep.mubr.msk.f32.mxu0 %vm19240_vm0, %v19241_v10 }
 0x7c0   :  { %17306 = vmatprep.subr.mxu0 %v19241_v10 }
 0x7c3   :  { %17307 = vmatpush3.msra.mxu0 %v7811_v37 }
 0x7c4   :  { %17309 = vmatmul.mubr.f32.vlgmr.msra.gmra.mrb[122].mxu0 %v7784_v30  ;;  %18577 = vmatprep.subr.bf16.mxu0 %v19239_v3 }
 0x7c5   :  { %18579 = vmatpush3.bf16.msra.mxu0 %v18563_v46  ;;  %17317 = vmatprep.mubr.msk.f32.mxu0 %vm19240_vm0, %v19241_v10  ;;  %v9710_v46 = vsub.f32 %v15173_v33, %v9631_v42 }
 0x7c6   :  { %17315 = vmatprep.subr.mxu0 %v19241_v10 }
 0x7c7   :  { %v18641_v60 = vpack.c.bf16 %v9717_v47, %v9710_v46 }
 0x7c9   :  { %17316 = vmatpush3.msra.mxu0 %v7723_v50  ;;  %v9711_v50 = vand.u32 4294901760, %v9710_v46 }
 0x7ca   :  { %17318 = vmatmul.mubr.f32.vlgmr.msra.gmra.mrb[124].mxu0 %v7784_v30  ;;  %18598 = vmatprep.subr.bf16.mxu0 %v19239_v3 }
 0x7cb   :  { %18600 = vmatpush3.bf16.msra.mxu0 %v18599_v14  ;;  %17380 = vmatprep.mubr.msk.f32.mxu0 %vm19240_vm0, %v19241_v10  ;;  %v9712_v52 = vsub.f32 %v9710_v46, %v9711_v50  ;;  %v18647_v61 = vpack.c.bf16 %v9718_v43, %v9711_v50 }
 0x7cc   :  { %17378 = vmatprep.subr.mxu0 %v19241_v10 }
 0x7cd   :  { %v9713_v19 = vand.u32 4294901760, %v9712_v52 }
 0x7ce   :  { %v8662_v22 = vpop.f32.mrb[66].mxu1 }
 0x7cf   :  { %v8671_v4 = vsel %vm2037_vm14, %v8662_v22, 0  ;;  %v17373_v8 = vpop.f32.mrb[67].mxu1  ;;  %17379 = vmatpush3.msra.mxu0 %v8680_v24  ;;  %v18638_v9 = vpack.c.bf16 %v9720_v21, %v9713_v19 }
 0x7d0   :  { %v8741_v48 = vand.u32 4294901760, %v8671_v4  ;;  %18601 = vmatprep.subr.bf16.mxu0 %v19239_v3 }
 0x7d2   :  { %v8742_v53 = vsub.f32 %v8671_v4, %v8741_v48 }
 0x7d4   :  { %v8743_v0 = vand.u32 4294901760, %v8742_v53 }
 0x7d6   :  { %v8744_v15 = vsub.f32 %v8742_v53, %v8743_v0 }
 0x7d8   :  { %v8745_v32 = vand.u32 4294901760, %v8744_v15 }
 0x7da   :  { %17381 = vmatmul.mubr.f32.vlgmr.msra.gmra.mrb[126].mxu0 %v8745_v32 }
 0x7db   :  { %18603 = vmatpush3.bf16.msra.mxu0 %v18602_v57  ;;  %17389 = vmatprep.mubr.msk.f32.mxu0 %vm19240_vm0, %v19241_v10 }
 0x7dc   :  { %17387 = vmatprep.subr.mxu0 %v19241_v10 }
 0x7df   :  { %17388 = vmatpush3.msra.mxu0 %v8770_v35 }
 0x7e0   :  { %17390 = vmatmul.mubr.f32.vlgmr.msra.gmra.mrb[128].mxu0 %v8741_v48  ;;  %18604 = vmatprep.subr.bf16.mxu0 %v19239_v3 }
 0x7e1   :  { %18606 = vmatpush3.bf16.msra.mxu0 %v18605_v36  ;;  %17398 = vmatprep.mubr.msk.f32.mxu0 %vm19240_vm0, %v19241_v10 }
 0x7e2   :  { %17396 = vmatprep.subr.mxu0 %v19241_v10 }
 0x7e5   :  { %17397 = vmatpush3.msra.mxu0 %v8767_v58 }
 0x7e6   :  { %17399 = vmatmul.mubr.f32.vlgmr.msra.gmra.mrb[130].mxu0 %v8742_v53  ;;  %18607 = vmatprep.subr.bf16.mxu0 %v19239_v3 }
 0x7e7   :  { %18609 = vmatpush3.bf16.msra.mxu0 %v18599_v14  ;;  %17407 = vmatprep.mubr.msk.f32.mxu0 %vm19240_vm0, %v19241_v10 }
 0x7e8   :  { %17405 = vmatprep.subr.mxu0 %v19241_v10 }
 0x7eb   :  { %17406 = vmatpush3.msra.mxu0 %v8680_v24 }
 0x7ec   :  { %17408 = vmatmul.mubr.f32.vlgmr.msra.gmra.mrb[132].mxu0 %v8743_v0  ;;  %18610 = vmatprep.subr.bf16.mxu0 %v19239_v3 }
 0x7ed   :  { %18612 = vmatpush3.bf16.msra.mxu0 %v18611_v38  ;;  %17416 = vmatprep.mubr.msk.f32.mxu0 %vm19240_vm0, %v19241_v10 }
 0x7ee   :  { %17414 = vmatprep.subr.mxu0 %v19241_v10 }
 0x7f1   :  { %17415 = vmatpush3.msra.mxu0 %v8768_v63 }
 0x7f2   :  { %17417 = vmatmul.mubr.f32.vlgmr.msra.gmra.mrb[134].mxu0 %v8741_v48  ;;  %18613 = vmatprep.subr.bf16.mxu0 %v19239_v3 }
 0x7f3   :  { %18615 = vmatpush3.bf16.msra.mxu0 %v18599_v14  ;;  %17425 = vmatprep.mubr.msk.f32.mxu0 %vm19240_vm0, %v19241_v10 }
 0x7f4   :  { %17423 = vmatprep.subr.mxu0 %v19241_v10 }
 0x7f7   :  { %17424 = vmatpush3.msra.mxu0 %v8680_v24 }
 0x7f8   :  { %17426 = vmatmul.mubr.f32.vlgmr.msra.gmra.mrb[136].mxu0 %v8741_v48  ;;  %18634 = vmatprep.subr.bf16.mxu0 %v19239_v3 }
 0x7f9   :  { %18636 = vmatpush3.bf16.msra.mxu0 %v18635_v44  ;;  %17488 = vmatprep.mubr.msk.f32.mxu0 %vm19240_vm0, %v19241_v10 }
 0x7fa   :  { %17486 = vmatprep.subr.mxu0 %v19241_v10 }
 0x7fc   :  { %v9619_v11 = vpop.f32.mrb[68].mxu1 }
 0x7fd   :  { %v9628_v29 = vsel %vm2037_vm14, %v9619_v11, 0  ;;  %v17481_v12 = vpop.f32.mrb[69].mxu1  ;;  %17487 = vmatpush3.msra.mxu0 %v9637_v49 }
 0x7fe   :  { %v9698_v54 = vand.u32 4294901760, %v9628_v29  ;;  %18637 = vmatprep.subr.bf16.mxu0 %v19239_v3 }
 0x800   :  { %v9699_v30 = vsub.f32 %v9628_v29, %v9698_v54 }
 0x802   :  { %v9700_v37 = vand.u32 4294901760, %v9699_v30 }
 0x804   :  { %v9701_v16 = vsub.f32 %v9699_v30, %v9700_v37 }
 0x806   :  { %v9702_v26 = vand.u32 4294901760, %v9701_v16 }
 0x808   :  { %17489 = vmatmul.mubr.f32.vlgmr.msra.gmra.mrb[138].mxu0 %v9702_v26 }
 0x809   :  { %18639 = vmatpush3.bf16.msra.mxu0 %v18638_v9  ;;  %17497 = vmatprep.mubr.msk.f32.mxu0 %vm19240_vm0, %v19241_v10 }
 0x80a   :  { %17495 = vmatprep.subr.mxu0 %v19241_v10 }
 0x80d   :  { %17496 = vmatpush3.msra.mxu0 %v9727_v59 }
 0x80e   :  { %17498 = vmatmul.mubr.f32.vlgmr.msra.gmra.mrb[140].mxu0 %v9698_v54  ;;  %18640 = vmatprep.subr.bf16.mxu0 %v19239_v3 }
 0x80f   :  { %18642 = vmatpush3.bf16.msra.mxu0 %v18641_v60  ;;  %17506 = vmatprep.mubr.msk.f32.mxu0 %vm19240_vm0, %v19241_v10 }
 0x810   :  { %17504 = vmatprep.subr.mxu0 %v19241_v10 }
 0x813   :  { %17505 = vmatpush3.msra.mxu0 %v9724_v45 }
 0x814   :  { %17507 = vmatmul.mubr.f32.vlgmr.msra.gmra.mrb[142].mxu0 %v9699_v30  ;;  %18643 = vmatprep.subr.bf16.mxu0 %v19239_v3 }
 0x815   :  { %18645 = vmatpush3.bf16.msra.mxu0 %v18635_v44  ;;  %17515 = vmatprep.mubr.msk.f32.mxu0 %vm19240_vm0, %v19241_v10 }
 0x816   :  { %17513 = vmatprep.subr.mxu0 %v19241_v10 }
 0x819   :  { %17514 = vmatpush3.msra.mxu0 %v9637_v49 }
 0x81a   :  { %17516 = vmatmul.mubr.f32.vlgmr.msra.gmra.mrb[144].mxu0 %v9700_v37  ;;  %18646 = vmatprep.subr.bf16.mxu0 %v19239_v3 }
 0x81b   :  { %18648 = vmatpush3.bf16.msra.mxu0 %v18647_v61  ;;  %17524 = vmatprep.mubr.msk.f32.mxu0 %vm19240_vm0, %v19241_v10 }
 0x81c   :  { %17522 = vmatprep.subr.mxu0 %v19241_v10 }
 0x81f   :  { %17523 = vmatpush3.msra.mxu0 %v9725_v2 }
 0x820   :  { %17525 = vmatmul.mubr.f32.vlgmr.msra.gmra.mrb[146].mxu0 %v9698_v54  ;;  %18649 = vmatprep.subr.bf16.mxu0 %v19239_v3 }
 0x821   :  { %18651 = vmatpush3.bf16.msra.mxu0 %v18635_v44  ;;  %17533 = vmatprep.mubr.msk.f32.mxu0 %vm19240_vm0, %v19241_v10 }
 0x822   :  { %17531 = vmatprep.subr.mxu0 %v19241_v10 }
 0x825   :  { %17532 = vmatpush3.msra.mxu0 %v9637_v49 }
 0x826   :  { %17534 = vmatmul.mubr.f32.vlgmr.msra.gmra.mrb[148].mxu0 %v9698_v54  ;;  %17566 = vmatprep.subr.mxu0 %v19241_v10 }
 0x827   :  { %17568 = vmatprep.mubr.msk.f32.mxu0 %vm19240_vm0, %v19241_v10 }
 0x851   :  { %v6833_v5 = vpop.f32.mrb[102].mxu0 }
 0x852   :  { %v17166_v6 = vpop.f32.mrb[103].mxu0 }
 0x853   :  { %v15178_v6 = vld [vmem:[%s21978_s10 + $0x2] sm:$0x3] }
 0x857   :  { %v6919_v17 = vpop.f32.mrb[104].mxu0 }
 0x858   :  { %v6920_v7 = vadd.f32 %v6919_v17, %v6833_v5  ;;  %v17175_v13 = vpop.f32.mrb[105].mxu0  ;;  %v10117_v5 = vld [vmem:[%s21978_s10] sm:$0x3] }
 0x85d   :  { %v6997_v14 = vpop.f32.mrb[106].mxu0 }
 0x85e   :  { %v6998_v18 = vadd.f32 %v6997_v14, %v6920_v7  ;;  %v17184_v23 = vpop.f32.mrb[107].mxu0  ;;  %v10120_v14 = vsel %vm10118_vm3, %v10117_v5, 0 }
 0x85f   :  { %v21003_v23 = vand.u32 4294901760, %v10120_v14 }
 0x863   :  { %v7073_v55 = vpop.f32.mrb[108].mxu0 }
 0x864   :  { %v7074_v24 = vadd.f32 %v7073_v55, %v6998_v18  ;;  %v17193_v27 = vpop.f32.mrb[109].mxu0  ;;  %v10574_v18 = vsel %vm10118_vm3, %v15178_v6, 0 }
 0x865   :  { %v21005_v55 = vand.u32 4294901760, %v10574_v18 }
 0x869   :  { %v7153_v40 = vpop.f32.mrb[110].mxu0 }
 0x86a   :  { %v7154_v22 = vadd.f32 %v7153_v40, %v7074_v24  ;;  %v17202_v4 = vpop.f32.mrb[111].mxu0 }
 0x86b   :  { %v10643_v4 = vsub.f32 %v10574_v18, %v21005_v55 }
 0x86f   :  { %v7227_v8 = vpop.f32.mrb[112].mxu0 }
 0x870   :  { %v7228_v58 = vadd.f32 %v7227_v8, %v7154_v22  ;;  %v17211_v31 = vpop.f32.mrb[113].mxu0  ;;  %v10189_v22 = vsub.f32 %v10120_v14, %v21003_v23 }
 0x872   :  { %v7231_v39 = vadd.f32 %v7228_v58, %v20856_v56 }
 0x87f   :  { %v7790_v48 = vpop.f32.mrb[114].mxu0 }
 0x880   :  { %v17274_v53 = vpop.f32.mrb[115].mxu0 }
 0x881   :  { %v15176_v53 = vld [vmem:[%s21977_s9] ss:$0 sm:$0xff] }
 0x885   :  { %v7876_v62 = vpop.f32.mrb[116].mxu0 }
 0x886   :  { %v7877_v34 = vadd.f32 %v7876_v62, %v7790_v48  ;;  %v17283_v63 = vpop.f32.mrb[117].mxu0  ;;  %v10644_v48 = vand.u32 4294901760, %v10643_v4 }
 0x88b   :  { %v7954_v0 = vpop.f32.mrb[118].mxu0 }
 0x88c   :  { %v7955_v15 = vadd.f32 %v7954_v0, %v7877_v34  ;;  %v17292_v57 = vpop.f32.mrb[119].mxu0  ;;  %v15177_v34 = vld [vmem:[%s21977_s9 + $0x1] ss:$0 sm:$0xff] }
 0x891   :  { %v8030_v28 = vpop.f32.mrb[120].mxu0 }
 0x892   :  { %v8031_v32 = vadd.f32 %v8030_v28, %v7955_v15  ;;  %v17301_v35 = vpop.f32.mrb[121].mxu0  ;;  %v10645_v15 = vsub.f32 %v10643_v4, %v10644_v48 }
 0x894   :  { %v10646_v35 = vand.u32 4294901760, %v10645_v15 }
 0x897   :  { %v8110_v36 = vpop.f32.mrb[122].mxu0 }
 0x898   :  { %v8111_v38 = vadd.f32 %v8110_v36, %v8031_v32  ;;  %v17310_v33 = vpop.f32.mrb[123].mxu0 }
 0x89d   :  { %v8184_v41 = vpop.f32.mrb[124].mxu0 }
 0x89e   :  { %v8185_v42 = vadd.f32 %v8184_v41, %v8111_v38  ;;  %v17319_v1 = vpop.f32.mrb[125].mxu0 }
 0x89f   :  { %v15179_v1 = vld [vmem:[%s21979_s11 + $0x18] sm:$0xff] }
 0x8a0   :  { %v8188_v44 = vadd.f32 %v8185_v42, %v7231_v39  ;;  %v10190_v39 = vand.u32 4294901760, %v10189_v22 }
 0x8a2   :  { %v10191_v0 = vsub.f32 %v10189_v22, %v10190_v39 }
 0x8a4   :  { %v10192_v32 = vand.u32 4294901760, %v10191_v0 }
 0x8ad   :  { %v8747_v46 = vpop.f32.mrb[126].mxu0 }
 0x8ae   :  { %v17382_v56 = vpop.f32.mrb[127].mxu0 }
 0x8b3   :  { %v8833_v47 = vpop.f32.mrb[128].mxu0 }
 0x8b4   :  { %v8834_v25 = vadd.f32 %v8833_v47, %v8747_v46  ;;  %v17391_v49 = vpop.f32.mrb[129].mxu0  ;;  %v11030_v46 = vand.u32 4294901760, %v15179_v1 }
 0x8b6   :  { %v21063_v47 = vsub.f32 %v15179_v1, %v11030_v46 }
 0x8b8   :  { %v11110_v49 = vand.u32 4294901760, %v21063_v47 }
 0x8b9   :  { %v8911_v50 = vpop.f32.mrb[130].mxu0 }
 0x8ba   :  { %v8912_v43 = vadd.f32 %v8911_v50, %v8834_v25  ;;  %v17400_v11 = vpop.f32.mrb[131].mxu0 }
 0x8bf   :  { %v8987_v29 = vpop.f32.mrb[132].mxu0 }
 0x8c0   :  { %v8988_v12 = vadd.f32 %v8987_v29, %v8912_v43  ;;  %v17409_v45 = vpop.f32.mrb[133].mxu0  ;;  %v11111_v43 = vsub.f32 %v21063_v47, %v11110_v49 }
 0x8c2   :  { %v11112_v29 = vand.u32 4294901760, %v11111_v43 }
 0x8c5   :  { %v9067_v52 = vpop.f32.mrb[134].mxu0 }
 0x8c6   :  { %v9068_v51 = vadd.f32 %v9067_v52, %v8988_v12  ;;  %v17418_v54 = vpop.f32.mrb[135].mxu0  ;;  %v15181_v52 = vld [vmem:[%s21979_s11 + $0x28] sm:$0xff] }
 0x8cb   :  { %v9141_v30 = vpop.f32.mrb[136].mxu0 }
 0x8cc   :  { %v9142_v19 = vadd.f32 %v9141_v30, %v9068_v51  ;;  %v17427_v21 = vpop.f32.mrb[137].mxu0  ;;  %v11036_v51 = vand.u32 4294901760, %v15181_v52 }
 0x8ce   :  { %v9145_v2 = vadd.f32 %v9142_v19, %v8188_v44  ;;  %v15180_v44 = vld [vmem:[%s21979_s11 + $0x20] sm:$0xff]  ;;  %v21103_v54 = vsub.f32 %v15181_v52, %v11036_v51 }
 0x8cf   :  { %v11033_v56 = vand.u32 4294901760, %v15180_v44 }
 0x8d0   :  { %v11124_v30 = vand.u32 4294901760, %v21103_v54 }
 0x8d1   :  { %v21065_v25 = vsub.f32 %v15180_v44, %v11033_v56 }
 0x8d2   :  { %v11125_v19 = vsub.f32 %v21103_v54, %v11124_v30 }
 0x8d3   :  { %v11117_v50 = vand.u32 4294901760, %v21065_v25 }
 0x8d4   :  { %v11126_v21 = vand.u32 4294901760, %v11125_v19 }
 0x8d5   :  { %v11118_v11 = vsub.f32 %v21065_v25, %v11117_v50  ;;  %v18665_v0 = vpack.c.bf16 %v11117_v50, %v11110_v49 }
 0x8d7   :  { %v11119_v12 = vand.u32 4294901760, %v11118_v11  ;;  %v15183_v11 = vld [vmem:[%s21979_s11 + $0x30] sm:$0xff] }
 0x8d9   :  { %v18656_v45 = vpack.c.bf16 %v11119_v12, %v11112_v29  ;;  %v15184_v29 = vld [vmem:[%s21979_s11 + $0x38] sm:$0xff]  ;;  %v12435_v12 = vand.u32 4294901760, %v15183_v11 }
 0x8db   :  { %v9704_v37 = vpop.f32.mrb[138].mxu0  ;;  %v21249_v52 = vsub.f32 %v15183_v11, %v12435_v12 }
 0x8dc   :  { %v17490_v16 = vpop.f32.mrb[139].mxu0 }
 0x8dd   :  { %v10569_v16 = vld [vmem:[%s21979_s11 + $0x8] sm:$0xff] }
 0x8e1   :  { %v9790_v9 = vpop.f32.mrb[140].mxu0 }
 0x8e2   :  { %v9791_v20 = vadd.f32 %v9790_v9, %v9704_v37  ;;  %v17499_v26 = vpop.f32.mrb[141].mxu0  ;;  %v10568_v37 = vld [vmem:[%s21979_s11] sm:$0xff] }
 0x8e3   :  { %v11505_v9 = vand.u32 4294901760, %v10568_v37 }
 0x8e5   :  { %v21118_v26 = vsub.f32 %v10568_v37, %v11505_v9 }
 0x8e7   :  { %v9868_v59 = vpop.f32.mrb[142].mxu0 }
 0x8e8   :  { %v9869_v60 = vadd.f32 %v9868_v59, %v9791_v20  ;;  %v17508_v61 = vpop.f32.mrb[143].mxu0  ;;  %v11508_v20 = vand.u32 4294901760, %v10569_v16 }
 0x8ea   :  { %v21120_v59 = vsub.f32 %v10569_v16, %v11508_v20 }
 0x8ec   :  { %v11592_v14 = vand.u32 4294901760, %v21120_v59 }
 0x8ed   :  { %v9944_v17 = vpop.f32.mrb[144].mxu0 }
 0x8ee   :  { %v9945_v7 = vadd.f32 %v9944_v17, %v9869_v60  ;;  %v17517_v13 = vpop.f32.mrb[145].mxu0  ;;  %v10570_v60 = vld [vmem:[%s21979_s11 + $0x10] sm:$0xff] }
 0x8ef   :  { %v11585_v13 = vand.u32 4294901760, %v21118_v26  ;;  %v21128_v18 = vand.u32 4294901760, %v10570_v60 }
 0x8f3   :  { %v10024_v24 = vpop.f32.mrb[146].mxu0 }
 0x8f4   :  { %v10025_v27 = vadd.f32 %v10024_v24, %v9945_v7  ;;  %v17526_v40 = vpop.f32.mrb[147].mxu0  ;;  %v11586_v24 = vsub.f32 %v21118_v26, %v11585_v13 }
 0x8f5   :  { %v21139_v40 = vsub.f32 %v10570_v60, %v21128_v18 }
 0x8f9   :  { %v10098_v8 = vpop.f32.mrb[148].mxu0 }
 0x8fa   :  { %v10099_v58 = vadd.f32 %v10098_v8, %v10025_v27  ;;  %v17535_v31 = vpop.f32.mrb[149].mxu0  ;;  %v11593_v27 = vsub.f32 %v21120_v59, %v11592_v14  ;;  %v18659_v8 = vpack.c.bf16 %v21065_v25, %v21063_v47  ;;  %v18683_v25 = vpack.c.bf16 %v11592_v14, %v11585_v13 }
 0x8fb   :  { %v11587_v31 = vand.u32 4294901760, %v11586_v24 }
 0x8fc   :  { %v10102_v62 = vadd.f32 %v10099_v58, %v9145_v2  ;;  %v18653_v2 = vpack.c.bf16 %v11033_v56, %v11030_v46  ;;  %v18677_v46 = vpack.c.bf16 %v21120_v59, %v21118_v26 }
 0x8fe   :  { %v10108_v63 = vadd.f32 %v15176_v53, %v10102_v62 }
 0x900   :  { %vm10110_vm4 = vcmp.gt.f32.partialorder %v10108_v63, 0.0  ;;  %v10115_v57 = vmul.f32 %v15177_v34, %v10108_v63 }
 0x902   :  { %v10116_v28 = vsel %vm10110_vm4, %v10108_v63, %v10115_v57 }
 0x903   :  { %v21015_v36 = vand.u32 4294901760, %v10116_v28 }
 0x905   :  { %v21018_v38 = vsub.f32 %v10116_v28, %v21015_v36  ;;  %17537 = vmatpush3.msra.mxu1 %v21015_v36  ;;  %17567 = vmatpush3.msra.mxu0 %v21015_v36  ;;  %v18671_v28 = vpack.c.bf16 %v11508_v20, %v11505_v9 }
 0x906   :  { %17539 = vmatmul.mubr.f32.vlgmr.msra.gmra.mrb[70].mxu1 %v10192_v32  ;;  %17569 = vmatmul.mubr.f32.vlgmr.msra.gmra.mrb[150].mxu0 %v10646_v35  ;;  %v15182_v35 = vld [vmem:[%s21978_s10 + $0x4] sm:$0x3] }
 0x907   :  { %17541 = vmatprep.subr.mxu1 %v19241_v10  ;;  %17571 = vmatprep.subr.mxu0 %v19241_v10  ;;  %v21025_v33 = vand.u32 4294901760, %v21018_v38 }
 0x908   :  { %17543 = vmatprep.mubr.msk.f32.mxu1 %vm19240_vm0, %v19241_v10  ;;  %17573 = vmatprep.mubr.msk.f32.mxu0 %vm19240_vm0, %v19241_v10 }
 0x909   :  { %v10202_v41 = vsub.f32 %v21018_v38, %v21025_v33 }
 0x90b   :  { %v21033_v42 = vand.u32 4294901760, %v10202_v41  ;;  %v11979_v41 = vsel %vm10118_vm3, %v15182_v35, 0 }
 0x90c   :  { %v12047_v44 = vand.u32 4294901760, %v11979_v41 }
 0x90d   :  { %17542 = vmatpush3.msra.mxu1 %v21033_v42  ;;  %17572 = vmatpush3.msra.mxu0 %v21033_v42 }
 0x90e   :  { %17544 = vmatmul.mubr.f32.vlgmr.msra.gmra.mrb[70].mxu1 %v21003_v23  ;;  %17546 = vmatprep.subr.mxu1 %v19241_v10  ;;  %v12048_v47 = vsub.f32 %v11979_v41, %v12047_v44 }
 0x90f   :  { %17574 = vmatmul.mubr.f32.vlgmr.msra.gmra.mrb[150].mxu0 %v21005_v55  ;;  %17576 = vmatprep.subr.mxu0 %v19241_v10 }
 0x910   :  { %17547 = vmatpush3.msra.mxu1 %v21018_v38  ;;  %17577 = vmatpush3.msra.mxu0 %v21018_v38  ;;  %v12049_v49 = vand.u32 4294901760, %v12048_v47 }
 0x911   :  { %17548 = vmatprep.mubr.msk.f32.mxu1 %vm19240_vm0, %v19241_v10  ;;  %17551 = vmatprep.subr.mxu1 %v19241_v10 }
 0x912   :  { %17578 = vmatprep.mubr.msk.f32.mxu0 %vm19240_vm0, %v19241_v10  ;;  %17581 = vmatprep.subr.mxu0 %v19241_v10  ;;  %v12050_v50 = vsub.f32 %v12048_v47, %v12049_v49 }
 0x914   :  { %v12051_v43 = vand.u32 4294901760, %v12050_v50 }
 0x916   :  { %17549 = vmatmul.mubr.f32.vlgmr.msra.gmra.mrb[70].mxu1 %v10189_v22 }
 0x917   :  { %17552 = vmatpush3.msra.mxu1 %v21015_v36  ;;  %17579 = vmatmul.mubr.f32.vlgmr.msra.gmra.mrb[150].mxu0 %v10643_v4 }
 0x918   :  { %17582 = vmatpush3.msra.mxu0 %v21015_v36  ;;  %17553 = vmatprep.mubr.msk.f32.mxu1 %vm19240_vm0, %v19241_v10 }
 0x919   :  { %17556 = vmatprep.subr.mxu1 %v19241_v10  ;;  %17583 = vmatprep.mubr.msk.f32.mxu0 %vm19240_vm0, %v19241_v10 }
 0x91a   :  { %17586 = vmatprep.subr.mxu0 %v19241_v10 }
 0x91e   :  { %17554 = vmatmul.mubr.f32.vlgmr.msra.gmra.mrb[70].mxu1 %v10190_v39  ;;  %v11594_v39 = vand.u32 4294901760, %v11593_v27 }
 0x91f   :  { %17557 = vmatpush3.msra.mxu1 %v21025_v33  ;;  %17584 = vmatmul.mubr.f32.vlgmr.msra.gmra.mrb[150].mxu0 %v10644_v48  ;;  %v11599_v48 = vand.u32 4294901760, %v21139_v40 }
 0x920   :  { %17587 = vmatpush3.msra.mxu0 %v21025_v33  ;;  %17558 = vmatprep.mubr.msk.f32.mxu1 %vm19240_vm0, %v19241_v10  ;;  %v18674_v34 = vpack.c.bf16 %v11594_v39, %v11587_v31 }
 0x921   :  { %17561 = vmatprep.subr.mxu1 %v19241_v10  ;;  %17588 = vmatprep.mubr.msk.f32.mxu0 %vm19240_vm0, %v19241_v10  ;;  %v11600_v63 = vsub.f32 %v21139_v40, %v11599_v48 }
 0x922   :  { %17591 = vmatprep.subr.mxu0 %v19241_v10 }
 0x923   :  { %v11601_v57 = vand.u32 4294901760, %v11600_v63 }
 0x926   :  { %17559 = vmatmul.mubr.f32.vlgmr.msra.gmra.mrb[70].mxu1 %v21003_v23 }
 0x927   :  { %17562 = vmatpush3.msra.mxu1 %v21015_v36  ;;  %17589 = vmatmul.mubr.f32.vlgmr.msra.gmra.mrb[150].mxu0 %v21005_v55 }
 0x928   :  { %17592 = vmatpush3.msra.mxu0 %v21015_v36  ;;  %17563 = vmatprep.mubr.msk.f32.mxu1 %vm19240_vm0, %v19241_v10 }
 0x929   :  { %17593 = vmatprep.mubr.msk.f32.mxu0 %vm19240_vm0, %v19241_v10  ;;  %18655 = vmatprep.subr.bf16.mxu0 %v19239_v3 }
 0x92a   :  { %18652 = vmatprep.subr.bf16.mxu1 %v19239_v3 }
 0x92e   :  { %17564 = vmatmul.mubr.f32.vlgmr.msra.gmra.mrb[70].mxu1 %v21003_v23 }
 0x92f   :  { %17594 = vmatmul.mubr.f32.vlgmr.msra.gmra.mrb[150].mxu0 %v21005_v55  ;;  %17602 = vmatprep.mubr.msk.f32.mxu1 %vm19240_vm0, %v19241_v10 }
 0x930   :  { %18657 = vmatpush3.bf16.msra.mxu0 %v18656_v45  ;;  %17611 = vmatprep.mubr.msk.f32.mxu0 %vm19240_vm0, %v19241_v10  ;;  %v12438_v45 = vand.u32 4294901760, %v15184_v29 }
 0x931   :  { %17609 = vmatprep.subr.mxu0 %v19241_v10  ;;  %18654 = vmatpush3.bf16.msra.mxu1 %v18653_v2 }
 0x932   :  { %17600 = vmatprep.subr.mxu1 %v19241_v10  ;;  %v21268_v9 = vpack.c.bf16 %v12438_v45, %v12435_v12 }
 0x934   :  { %17610 = vmatpush3.msra.mxu0 %v11126_v21  ;;  %v15185_v21 = vld [vmem:[%s21979_s11 + $0x40] sm:$0xff] }
 0x935   :  { %18661 = vmatprep.subr.bf16.mxu0 %v19239_v3  ;;  %17601 = vmatpush3.msra.mxu1 %v11036_v51 }
 0x936   :  { %18658 = vmatprep.subr.bf16.mxu1 %v19239_v3 }
 0xa01   :  { %v10564_v61 = vpop.f32.mrb[70].mxu1 }
 0xa02   :  { %v11018_v5 = vpop.f32.mrb[150].mxu0  ;;  %v17565_v6 = vpop.f32.mrb[71].mxu1  ;;  %v11502_v58 = vsel %vm2037_vm14, %v10564_v61, 0 }
 0xa03   :  { %v11027_v17 = vsel %vm2037_vm14, %v11018_v5, 0  ;;  %v17595_v7 = vpop.f32.mrb[151].mxu0  ;;  %v21149_v62 = vand.u32 4294901760, %v11502_v58 }
 0xa04   :  { %v11097_v23 = vand.u32 4294901760, %v11027_v17 }
 0xa05   :  { %v11573_v15 = vsub.f32 %v11502_v58, %v21149_v62 }
 0xa06   :  { %v11098_v55 = vsub.f32 %v11027_v17, %v11097_v23  ;;  %17612 = vmatmul.mubr.f32.vlgmr.msra.gmra.mrb[152].mxu0 %v11097_v23 }
 0xa07   :  { %18663 = vmatpush3.bf16.msra.mxu0 %v18653_v2  ;;  %17629 = vmatprep.mubr.msk.f32.mxu0 %vm19240_vm0, %v19241_v10  ;;  %v11574_v32 = vand.u32 4294901760, %v11573_v15 }
 0xa08   :  { %v11099_v22 = vand.u32 4294901760, %v11098_v55  ;;  %17627 = vmatprep.subr.mxu0 %v19241_v10 }
 0xa09   :  { %v11575_v1 = vsub.f32 %v11573_v15, %v11574_v32 }
 0xa0a   :  { %v11100_v4 = vsub.f32 %v11098_v55, %v11099_v22 }
 0xa0b   :  { %17628 = vmatpush3.msra.mxu0 %v11036_v51  ;;  %v11576_v56 = vand.u32 4294901760, %v11575_v1 }
 0xa0c   :  { %v11101_v53 = vand.u32 4294901760, %v11100_v4  ;;  %17630 = vmatmul.mubr.f32.vlgmr.msra.gmra.mrb[154].mxu0 %v11099_v22  ;;  %18667 = vmatprep.subr.bf16.mxu0 %v19239_v3 }
 0xa0d   :  { %18669 = vmatpush3.bf16.msra.mxu0 %v18653_v2  ;;  %17647 = vmatprep.mubr.msk.f32.mxu0 %vm19240_vm0, %v19241_v10  ;;  %v21259_v2 = vand.u32 4294901760, %v15185_v21 }
 0xa0e   :  { %17603 = vmatmul.mubr.f32.vlgmr.msra.gmra.mrb[72].mxu1 %v11101_v53  ;;  %17645 = vmatprep.subr.mxu0 %v19241_v10 }
 0xa0f   :  { %18660 = vmatpush3.bf16.msra.mxu1 %v18659_v8  ;;  %17620 = vmatprep.mubr.msk.f32.mxu1 %vm19240_vm0, %v19241_v10  ;;  %v21262_v37 = vsub.f32 %v15185_v21, %v21259_v2 }
 0xa10   :  { %17618 = vmatprep.subr.mxu1 %v19241_v10 }
 0xa11   :  { %17646 = vmatpush3.msra.mxu0 %v11036_v51  ;;  %v21251_v51 = vsub.f32 %v15184_v29, %v12438_v45  ;;  %v12529_v16 = vand.u32 4294901760, %v21262_v37 }
 0xa12   :  { %17648 = vmatmul.mubr.f32.vlgmr.msra.gmra.mrb[156].mxu0 %v11097_v23  ;;  %18673 = vmatprep.subr.bf16.mxu0 %v19239_v3 }
 0xa13   :  { %17619 = vmatpush3.msra.mxu1 %v21103_v54  ;;  %18675 = vmatpush3.bf16.msra.mxu0 %v18674_v34  ;;  %v12515_v54 = vand.u32 4294901760, %v21249_v52  ;;  %v18695_v5 = vpack.c.bf16 %v21251_v51, %v21249_v52 }
 0xa14   :  { %17621 = vmatmul.mubr.f32.vlgmr.msra.gmra.mrb[74].mxu1 %v11098_v55  ;;  %18664 = vmatprep.subr.bf16.mxu1 %v19239_v3 }
 0xa15   :  { %18666 = vmatpush3.bf16.msra.mxu1 %v18665_v0  ;;  %17663 = vmatprep.subr.mxu0 %v19241_v10  ;;  %v12516_v20 = vsub.f32 %v21249_v52, %v12515_v54 }
 0xa16   :  { %17665 = vmatprep.mubr.msk.f32.mxu0 %vm19240_vm0, %v19241_v10  ;;  %17636 = vmatprep.subr.mxu1 %v19241_v10 }
 0xa17   :  { %17664 = vmatpush3.msra.mxu0 %v11601_v57  ;;  %17638 = vmatprep.mubr.msk.f32.mxu1 %vm19240_vm0, %v19241_v10  ;;  %v12517_v59 = vand.u32 4294901760, %v12516_v20 }
 0xa18   :  { %17666 = vmatmul.mubr.f32.vlgmr.msra.gmra.mrb[158].mxu0 %v21149_v62  ;;  %18679 = vmatprep.subr.bf16.mxu0 %v19239_v3 }
 0xa19   :  { %17637 = vmatpush3.msra.mxu1 %v11124_v30  ;;  %18681 = vmatpush3.bf16.msra.mxu0 %v18671_v28  ;;  %v12522_v30 = vand.u32 4294901760, %v21251_v51 }
 0xa1a   :  { %17639 = vmatmul.mubr.f32.vlgmr.msra.gmra.mrb[76].mxu1 %v11097_v23  ;;  %18670 = vmatprep.subr.bf16.mxu1 %v19239_v3 }
 0xa1b   :  { %18672 = vmatpush3.bf16.msra.mxu1 %v18671_v28  ;;  %17681 = vmatprep.subr.mxu0 %v19241_v10  ;;  %v18701_v19 = vpack.c.bf16 %v12522_v30, %v12515_v54  ;;  %v12523_v26 = vsub.f32 %v21251_v51, %v12522_v30 }
 0xa1c   :  { %17683 = vmatprep.mubr.msk.f32.mxu0 %vm19240_vm0, %v19241_v10  ;;  %17654 = vmatprep.subr.mxu1 %v19241_v10 }
 0xa1d   :  { %17682 = vmatpush3.msra.mxu0 %v21128_v18  ;;  %17656 = vmatprep.mubr.msk.f32.mxu1 %vm19240_vm0, %v19241_v10  ;;  %v12524_v60 = vand.u32 4294901760, %v12523_v26 }
 0xa1e   :  { %17684 = vmatmul.mubr.f32.vlgmr.msra.gmra.mrb[160].mxu0 %v11574_v32  ;;  %18685 = vmatprep.subr.bf16.mxu0 %v19239_v3 }
 0xa1f   :  { %17655 = vmatpush3.msra.mxu1 %v21128_v18  ;;  %18687 = vmatpush3.bf16.msra.mxu0 %v18671_v28  ;;  %v18692_v61 = vpack.c.bf16 %v12524_v60, %v12517_v59  ;;  %v12530_v60 = vsub.f32 %v21262_v37, %v12529_v16 }
 0xa20   :  { %17657 = vmatmul.mubr.f32.vlgmr.msra.gmra.mrb[78].mxu1 %v11576_v56  ;;  %18676 = vmatprep.subr.bf16.mxu1 %v19239_v3 }
 0xa21   :  { %18678 = vmatpush3.bf16.msra.mxu1 %v18677_v46  ;;  %17699 = vmatprep.subr.mxu0 %v19241_v10 }
 0xa22   :  { %17701 = vmatprep.mubr.msk.f32.mxu0 %vm19240_vm0, %v19241_v10  ;;  %17672 = vmatprep.subr.mxu1 %v19241_v10 }
 0xa23   :  { %17700 = vmatpush3.msra.mxu0 %v21128_v18  ;;  %17674 = vmatprep.mubr.msk.f32.mxu1 %vm19240_vm0, %v19241_v10 }
 0xa24   :  { %17702 = vmatmul.mubr.f32.vlgmr.msra.gmra.mrb[162].mxu0 %v21149_v62  ;;  %18688 = vmatprep.subr.bf16.mxu0 %v19239_v3 }
 0xa25   :  { %17673 = vmatpush3.msra.mxu1 %v21139_v40  ;;  %17740 = vmatprep.mubr.msk.f32.mxu0 %vm19240_vm0, %v19241_v10 }
 0xa26   :  { %17675 = vmatmul.mubr.f32.vlgmr.msra.gmra.mrb[80].mxu1 %v11573_v15  ;;  %18682 = vmatprep.subr.bf16.mxu1 %v19239_v3 }
 0xa27   :  { %18684 = vmatpush3.bf16.msra.mxu1 %v18683_v25  ;;  %17692 = vmatprep.mubr.msk.f32.mxu1 %vm19240_vm0, %v19241_v10 }
 0xa28   :  { %17690 = vmatprep.subr.mxu1 %v19241_v10  ;;  %18690 = vmatpush3.bf16.msra.mxu0 %v21268_v9 }
 0xa29   :  { %17738 = vmatprep.subr.mxu0 %v19241_v10 }
 0xa2b   :  { %17691 = vmatpush3.msra.mxu1 %v11599_v48 }
 0xa2c   :  { %17693 = vmatmul.mubr.f32.vlgmr.msra.gmra.mrb[82].mxu1 %v21149_v62  ;;  %17704 = vmatprep.subr.mxu1 %v19241_v10 }
 0xa2d   :  { %17705 = vmatpush3.msra.mxu1 %v21015_v36  ;;  %17706 = vmatprep.mubr.msk.f32.mxu1 %vm19240_vm0, %v19241_v10 }
 0xa2e   :  { %17709 = vmatprep.subr.mxu1 %v19241_v10  ;;  %17739 = vmatpush3.msra.mxu0 %v21259_v2 }
 0xa2f   :  { %18691 = vmatprep.subr.bf16.mxu0 %v19239_v3 }
 0xa30   :  { %17707 = vmatmul.mubr.f32.vlgmr.msra.gmra.mrb[84].mxu1 %v12051_v43 }
 0xa31   :  { %17710 = vmatpush3.msra.mxu1 %v21033_v42  ;;  %17711 = vmatprep.mubr.msk.f32.mxu1 %vm19240_vm0, %v19241_v10 }
 0xa32   :  { %17714 = vmatprep.subr.mxu1 %v19241_v10 }
 0xa38   :  { %17712 = vmatmul.mubr.f32.vlgmr.msra.gmra.mrb[84].mxu1 %v12047_v44 }
 0xa39   :  { %17715 = vmatpush3.msra.mxu1 %v21018_v38  ;;  %17716 = vmatprep.mubr.msk.f32.mxu1 %vm19240_vm0, %v19241_v10 }
 0xa3a   :  { %17719 = vmatprep.subr.mxu1 %v19241_v10 }
 0xa40   :  { %17717 = vmatmul.mubr.f32.vlgmr.msra.gmra.mrb[84].mxu1 %v12048_v47 }
 0xa41   :  { %17720 = vmatpush3.msra.mxu1 %v21015_v36  ;;  %17721 = vmatprep.mubr.msk.f32.mxu1 %vm19240_vm0, %v19241_v10 }
 0xa42   :  { %17724 = vmatprep.subr.mxu1 %v19241_v10 }
 0xa48   :  { %17722 = vmatmul.mubr.f32.vlgmr.msra.gmra.mrb[84].mxu1 %v12049_v49  ;;  %v15186_v49 = vld [vmem:[%s21978_s10 + $0x6] sm:$0x3] }
 0xa49   :  { %17725 = vmatpush3.msra.mxu1 %v21025_v33  ;;  %17726 = vmatprep.mubr.msk.f32.mxu1 %vm19240_vm0, %v19241_v10  ;;  %v12910_v50 = vsel %vm10118_vm3, %v15186_v49, 0 }
 0xa4a   :  { %17729 = vmatprep.subr.mxu1 %v19241_v10  ;;  %v21284_v43 = vand.u32 4294901760, %v12910_v50 }
 0xa4c   :  { %v12979_v11 = vsub.f32 %v12910_v50, %v21284_v43 }
 0xa4e   :  { %v12980_v29 = vand.u32 4294901760, %v12979_v11 }
 0xa50   :  { %17727 = vmatmul.mubr.f32.vlgmr.msra.gmra.mrb[84].mxu1 %v12047_v44  ;;  %v12981_v45 = vsub.f32 %v12979_v11, %v12980_v29 }
 0xa51   :  { %17730 = vmatpush3.msra.mxu1 %v21015_v36  ;;  %17731 = vmatprep.mubr.msk.f32.mxu1 %vm19240_vm0, %v19241_v10 }
 0xa52   :  { %18700 = vmatprep.subr.bf16.mxu1 %v19239_v3  ;;  %v12982_v20 = vand.u32 4294901760, %v12981_v45 }
 0xa58   :  { %17732 = vmatmul.mubr.f32.vlgmr.msra.gmra.mrb[84].mxu1 %v12047_v44 }
 0xa59   :  { %17776 = vmatprep.mubr.msk.f32.mxu1 %vm19240_vm0, %v19241_v10  ;;  %18702 = vmatpush3.bf16.msra.mxu1 %v18701_v19 }
 0xa5a   :  { %17774 = vmatprep.subr.mxu1 %v19241_v10 }
 0xa5d   :  { %17775 = vmatpush3.msra.mxu1 %v12529_v16 }
 0xa5e   :  { %17788 = vmatprep.subr.mxu1 %v19241_v10 }
 0xad9   :  { %v11189_v6 = vpop.f32.mrb[152].mxu0 }
 0xada   :  { %v17613_v17 = vpop.f32.mrb[153].mxu0 }
 0xadb   :  { %v12531_v17 = vand.u32 4294901760, %v12530_v60 }
 0xadf   :  { %v11343_v7 = vpop.f32.mrb[154].mxu0 }
 0xae0   :  { %v17631_v13 = vpop.f32.mrb[155].mxu0 }
 0xae1   :  { %v11103_v14 = vpop.f32.mrb[72].mxu1 }
 0xae2   :  { %v11190_v18 = vadd.f32 %v11189_v6, %v11103_v14  ;;  %v17604_v23 = vpop.f32.mrb[73].mxu1 }
 0xae5   :  { %v11497_v55 = vpop.f32.mrb[156].mxu0 }
 0xae6   :  { %v17649_v24 = vpop.f32.mrb[157].mxu0 }
 0xae7   :  { %v11267_v27 = vpop.f32.mrb[74].mxu1 }
 0xae8   :  { %v11268_v40 = vadd.f32 %v11267_v27, %v11190_v18  ;;  %v17622_v22 = vpop.f32.mrb[75].mxu1 }
 0xaea   :  { %v11344_v4 = vadd.f32 %v11343_v7, %v11268_v40 }
 0xaeb   :  { %v11664_v8 = vpop.f32.mrb[158].mxu0 }
 0xaec   :  { %v17667_v58 = vpop.f32.mrb[159].mxu0 }
 0xaed   :  { %v11423_v31 = vpop.f32.mrb[76].mxu1 }
 0xaee   :  { %v11424_v39 = vadd.f32 %v11423_v31, %v11344_v4  ;;  %v17640_v48 = vpop.f32.mrb[77].mxu1 }
 0xaf0   :  { %v11498_v53 = vadd.f32 %v11497_v55, %v11424_v39 }
 0xaf1   :  { %v11818_v62 = vpop.f32.mrb[160].mxu0 }
 0xaf2   :  { %v17685_v34 = vpop.f32.mrb[161].mxu0 }
 0xaf3   :  { %v11578_v63 = vpop.f32.mrb[78].mxu1 }
 0xaf4   :  { %v11579_v0 = vadd.f32 %v11578_v63, %v11498_v53  ;;  %v17658_v15 = vpop.f32.mrb[79].mxu1 }
 0xaf6   :  { %v11665_v57 = vadd.f32 %v11664_v8, %v11579_v0 }
 0xaf7   :  { %v11972_v28 = vpop.f32.mrb[162].mxu0 }
 0xaf8   :  { %v17703_v32 = vpop.f32.mrb[163].mxu0 }
 0xaf9   :  { %v11742_v35 = vpop.f32.mrb[80].mxu1 }
 0xafa   :  { %v11743_v41 = vadd.f32 %v11742_v35, %v11665_v57  ;;  %v17676_v1 = vpop.f32.mrb[81].mxu1 }
 0xafc   :  { %v11819_v44 = vadd.f32 %v11818_v62, %v11743_v41 }
 0xaff   :  { %v11898_v46 = vpop.f32.mrb[82].mxu1 }
 0xb00   :  { %v11899_v56 = vadd.f32 %v11898_v46, %v11819_v44  ;;  %v17694_v47 = vpop.f32.mrb[83].mxu1 }
 0xb02   :  { %v21278_v25 = vadd.f32 %v11972_v28, %v11899_v56 }
 0xb2b   :  { %v12423_v12 = vpop.f32.mrb[84].mxu1 }
 0xb2c   :  { %v12432_v54 = vsel %vm2037_vm14, %v12423_v12, 0  ;;  %v17733_v30 = vpop.f32.mrb[85].mxu1 }
 0xb2d   :  { %v12502_v19 = vand.u32 4294901760, %v12432_v54  ;;  %v13854_v30 = vld [vmem:[%s21981_s13 + $0x10] sm:$0xff] }
 0xb2f   :  { %v12503_v21 = vsub.f32 %v12432_v54, %v12502_v19  ;;  %17777 = vmatmul.mubr.f32.vlgmr.msra.gmra.mrb[86].mxu1 %v12502_v19 }
 0xb30   :  { %17789 = vmatpush3.msra.mxu1 %v21015_v36  ;;  %17790 = vmatprep.mubr.msk.f32.mxu1 %vm19240_vm0, %v19241_v10 }
 0xb31   :  { %v12504_v26 = vand.u32 4294901760, %v12503_v21  ;;  %17793 = vmatprep.subr.mxu1 %v19241_v10 }
 0xb33   :  { %v12505_v59 = vsub.f32 %v12503_v21, %v12504_v26  ;;  %17791 = vmatmul.mubr.f32.vlgmr.msra.gmra.mrb[88].mxu1 %v12982_v20 }
 0xb34   :  { %17794 = vmatpush3.msra.mxu1 %v21033_v42  ;;  %17795 = vmatprep.mubr.msk.f32.mxu1 %vm19240_vm0, %v19241_v10 }
 0xb35   :  { %v12506_v6 = vand.u32 4294901760, %v12505_v59  ;;  %17798 = vmatprep.subr.mxu1 %v19241_v10 }
 0xb37   :  { %17741 = vmatmul.mubr.f32.vlgmr.msra.gmra.mrb[164].mxu0 %v12506_v6 }
 0xb38   :  { %18693 = vmatpush3.bf16.msra.mxu0 %v18692_v61  ;;  %17749 = vmatprep.mubr.msk.f32.mxu0 %vm19240_vm0, %v19241_v10 }
 0xb39   :  { %17747 = vmatprep.subr.mxu0 %v19241_v10 }
 0xb3b   :  { %17796 = vmatmul.mubr.f32.vlgmr.msra.gmra.mrb[88].mxu1 %v21284_v43 }
 0xb3c   :  { %17748 = vmatpush3.msra.mxu0 %v12531_v17  ;;  %17799 = vmatpush3.msra.mxu1 %v21018_v38  ;;  %v15187_v38 = vld [vmem:[%s21979_s11 + $0x48] sm:$0xff] }
 0xb3d   :  { %17750 = vmatmul.mubr.f32.vlgmr.msra.gmra.mrb[166].mxu0 %v12502_v19  ;;  %18694 = vmatprep.subr.bf16.mxu0 %v19239_v3  ;;  %v13366_v42 = vand.u32 4294901760, %v15187_v38 }
 0xb3e   :  { %18696 = vmatpush3.bf16.msra.mxu0 %v18695_v5  ;;  %17758 = vmatprep.mubr.msk.f32.mxu0 %vm19240_vm0, %v19241_v10 }
 0xb3f   :  { %17756 = vmatprep.subr.mxu0 %v19241_v10  ;;  %17800 = vmatprep.mubr.msk.f32.mxu1 %vm19240_vm0, %v19241_v10  ;;  %v13445_v52 = vsub.f32 %v15187_v38, %v13366_v42  ;;  %v13856_v38 = vld [vmem:[%s21981_s13 + $0x20] sm:$0xff] }
 0xb40   :  { %17803 = vmatprep.subr.mxu1 %v19241_v10 }
 0xb42   :  { %17757 = vmatpush3.msra.mxu0 %v21262_v37 }
 0xb43   :  { %17759 = vmatmul.mubr.f32.vlgmr.msra.gmra.mrb[168].mxu0 %v12503_v21  ;;  %18697 = vmatprep.subr.bf16.mxu0 %v19239_v3 }
 0xb44   :  { %18699 = vmatpush3.bf16.msra.mxu0 %v21268_v9  ;;  %17801 = vmatmul.mubr.f32.vlgmr.msra.gmra.mrb[88].mxu1 %v12979_v11 }
 0xb45   :  { %17804 = vmatpush3.msra.mxu1 %v21015_v36  ;;  %17765 = vmatprep.subr.mxu0 %v19241_v10 }
 0xb46   :  { %17767 = vmatprep.mubr.msk.f32.mxu0 %vm19240_vm0, %v19241_v10  ;;  %17805 = vmatprep.mubr.msk.f32.mxu1 %vm19240_vm0, %v19241_v10 }
 0xb47   :  { %17808 = vmatprep.subr.mxu1 %v19241_v10 }
 0xb48   :  { %17766 = vmatpush3.msra.mxu0 %v21259_v2 }
 0xb49   :  { %17768 = vmatmul.mubr.f32.vlgmr.msra.gmra.mrb[170].mxu0 %v12504_v26  ;;  %18703 = vmatprep.subr.bf16.mxu0 %v19239_v3  ;;  %v13884_v26 = vand.u32 4294901760, %v13854_v30 }
 0xb4a   :  { %18705 = vmatpush3.bf16.msra.mxu0 %v21268_v9  ;;  %17785 = vmatprep.mubr.msk.f32.mxu0 %vm19240_vm0, %v19241_v10  ;;  %v15189_v9 = vld [vmem:[%s21979_s11 + $0x58] sm:$0xff] }
 0xb4b   :  { %17783 = vmatprep.subr.mxu0 %v19241_v10  ;;  %v21355_v61 = vand.u32 4294901760, %v15189_v9  ;;  %v21411_v6 = vsub.f32 %v13854_v30, %v13884_v26 }
 0xb4c   :  { %17806 = vmatmul.mubr.f32.vlgmr.msra.gmra.mrb[88].mxu1 %v12980_v29  ;;  %v13853_v29 = vld [vmem:[%s21981_s13 + $0x8] sm:$0xff] }
 0xb4d   :  { %17809 = vmatpush3.msra.mxu1 %v21025_v33  ;;  %17810 = vmatprep.mubr.msk.f32.mxu1 %vm19240_vm0, %v19241_v10  ;;  %v15188_v33 = vld [vmem:[%s21979_s11 + $0x50] sm:$0xff]  ;;  %v13459_v5 = vsub.f32 %v15189_v9, %v21355_v61  ;;  %v13881_v45 = vand.u32 4294901760, %v13853_v29 }
 0xb4e   :  { %17784 = vmatpush3.msra.mxu0 %v21259_v2  ;;  %17813 = vmatprep.subr.mxu1 %v19241_v10  ;;  %v13446_v2 = vand.u32 4294901760, %v13445_v52 }
 0xb4f   :  { %17786 = vmatmul.mubr.f32.vlgmr.msra.gmra.mrb[172].mxu0 %v12502_v19  ;;  %18706 = vmatprep.subr.bf16.mxu0 %v19239_v3  ;;  %v13460_v7 = vand.u32 4294901760, %v13459_v5  ;;  %v13855_v19 = vld [vmem:[%s21981_s13 + $0x18] sm:$0xff]  ;;  %v21406_v20 = vsub.f32 %v13853_v29, %v13881_v45 }
 0xb50   :  { %17824 = vmatprep.mubr.msk.f32.mxu0 %vm19240_vm0, %v19241_v10  ;;  %v13447_v14 = vsub.f32 %v13445_v52, %v13446_v2  ;;  %v13887_v59 = vand.u32 4294901760, %v13855_v19 }
 0xb51   :  { %v13461_v50 = vsub.f32 %v13459_v5, %v13460_v7 }
 0xb52   :  { %v13448_v23 = vand.u32 4294901760, %v13447_v14  ;;  %v21409_v60 = vpack.c.bf16 %v13887_v59, %v13884_v26  ;;  %v21413_v17 = vsub.f32 %v13855_v19, %v13887_v59 }
 0xb53   :  { %v13462_v11 = vand.u32 4294901760, %v13461_v50 }
 0xb54   :  { %17811 = vmatmul.mubr.f32.vlgmr.msra.gmra.mrb[88].mxu1 %v21284_v43 }
 0xb55   :  { %17814 = vmatpush3.msra.mxu1 %v21015_v36  ;;  %17815 = vmatprep.mubr.msk.f32.mxu1 %vm19240_vm0, %v19241_v10  ;;  %v13369_v36 = vand.u32 4294901760, %v15188_v33 }
 0xb56   :  { %18718 = vmatprep.subr.bf16.mxu1 %v19239_v3 }
 0xb57   :  { %v13452_v51 = vsub.f32 %v15188_v33, %v13369_v36  ;;  %v18707_v13 = vpack.c.bf16 %v13369_v36, %v13366_v42  ;;  %v13857_v33 = vld [vmem:[%s21981_s13 + $0x28] sm:$0xff]  ;;  %v13890_v42 = vand.u32 4294901760, %v13856_v38 }
 0xb58   :  { %v13893_v36 = vand.u32 4294901760, %v13857_v33 }
 0xb59   :  { %v13453_v37 = vand.u32 4294901760, %v13452_v51  ;;  %18708 = vmatpush3.bf16.msra.mxu0 %v18707_v13  ;;  %v18713_v27 = vpack.c.bf16 %v13452_v51, %v13445_v52 }
 0xb5a   :  { %17822 = vmatprep.subr.mxu0 %v19241_v10  ;;  %v21423_v52 = vpack.c.bf16 %v13893_v36, %v13890_v42 }
 0xb5b   :  { %v18719_v16 = vpack.c.bf16 %v13453_v37, %v13446_v2  ;;  %v13454_v18 = vsub.f32 %v13452_v51, %v13453_v37  ;;  %v13858_v51 = vld [vmem:[%s21981_s13 + $0x30] sm:$0xff]  ;;  %v13859_v2 = vld [vmem:[%s21981_s13 + $0x38] sm:$0xff] }
 0xb5c   :  { %17816 = vmatmul.mubr.f32.vlgmr.msra.gmra.mrb[88].mxu1 %v21284_v43  ;;  %v13896_v37 = vand.u32 4294901760, %v13858_v51 }
 0xb5d   :  { %17860 = vmatprep.mubr.msk.f32.mxu1 %vm19240_vm0, %v19241_v10  ;;  %18720 = vmatpush3.bf16.msra.mxu1 %v18719_v16  ;;  %v13455_v55 = vand.u32 4294901760, %v13454_v18  ;;  %v13899_v16 = vand.u32 4294901760, %v13859_v2  ;;  %v13862_v18 = vld [vmem:[%s21981_s13 + $0x50] sm:$0xff] }
 0xb5e   :  { %17858 = vmatprep.subr.mxu1 %v19241_v10  ;;  %17823 = vmatpush3.msra.mxu0 %v21355_v61 }
 0xb5f   :  { %v18710_v24 = vpack.c.bf16 %v13455_v55, %v13448_v23  ;;  %18709 = vmatprep.subr.bf16.mxu0 %v19239_v3  ;;  %v21433_v9 = vpack.c.bf16 %v13899_v16, %v13896_v37  ;;  %v13863_v23 = vld [vmem:[%s21981_s13 + $0x58] sm:$0xff]  ;;  %v13908_v55 = vand.u32 4294901760, %v13862_v18 }
 0xb61   :  { %17859 = vmatpush3.msra.mxu1 %v13460_v7 }
 0xb62   :  { %18724 = vmatprep.subr.bf16.mxu1 %v19239_v3 }
 0xc02   :  { %v12828_v40 = vpop.f32.mrb[86].mxu1 }
 0xc03   :  { %v17778_v22 = vpop.f32.mrb[87].mxu1 }
 0xc04   :  { %v21457_v22 = vsub.f32 %v13858_v51, %v13896_v37 }
 0xc06   :  { %v14010_v30 = vand.u32 4294901760, %v21457_v22 }
 0xc08   :  { %v14011_v59 = vsub.f32 %v21457_v22, %v14010_v30 }
 0xc0a   :  { %v12508_v4 = vpop.f32.mrb[164].mxu0 }
 0xc0b   :  { %v17742_v8 = vpop.f32.mrb[165].mxu0 }
 0xc0c   :  { %v13864_v8 = vld [vmem:[%s21981_s13 + $0x60] sm:$0xf] }
 0xc10   :  { %v12594_v58 = vpop.f32.mrb[166].mxu0 }
 0xc11   :  { %v12595_v31 = vadd.f32 %v12594_v58, %v12508_v4  ;;  %v17751_v39 = vpop.f32.mrb[167].mxu0  ;;  %v21459_v4 = vsub.f32 %v13859_v2, %v13899_v16 }
 0xc13   :  { %v14017_v19 = vand.u32 4294901760, %v21459_v4 }
 0xc16   :  { %v12672_v48 = vpop.f32.mrb[168].mxu0 }
 0xc17   :  { %v12673_v53 = vadd.f32 %v12672_v48, %v12595_v31  ;;  %v17760_v62 = vpop.f32.mrb[169].mxu0  ;;  %v21470_v48 = vsub.f32 %v13862_v18, %v13908_v55 }
 0xc18   :  { %v21475_v62 = vsel %vm845_vm12, %v13864_v8, 0 }
 0xc1c   :  { %v12748_v34 = vpop.f32.mrb[170].mxu0 }
 0xc1d   :  { %v12749_v63 = vadd.f32 %v12748_v34, %v12673_v53  ;;  %v17769_v0 = vpop.f32.mrb[171].mxu0 }
 0xc1e   :  { %v21481_v0 = vand.u32 4294901760, %v21475_v62 }
 0xc1f   :  { %v12829_v15 = vadd.f32 %v12828_v40, %v12749_v63  ;;  %v21455_v40 = vsub.f32 %v13857_v33, %v13893_v36  ;;  %v13975_v63 = vand.u32 4294901760, %v21406_v20  ;;  %v14012_v33 = vand.u32 4294901760, %v14011_v59 }
 0xc22   :  { %v12902_v57 = vpop.f32.mrb[172].mxu0 }
 0xc23   :  { %v12903_v28 = vadd.f32 %v12902_v57, %v12829_v15  ;;  %v17787_v32 = vpop.f32.mrb[173].mxu0  ;;  %v13976_v57 = vsub.f32 %v21406_v20, %v13975_v63 }
 0xc24   :  { %v13989_v32 = vand.u32 4294901760, %v21413_v17 }
 0xc25   :  { %v21364_v35 = vadd.f32 %v12903_v28, %v21278_v25  ;;  %v13852_v25 = vld [vmem:[%s21981_s13] sm:$0xff]  ;;  %v13982_v28 = vand.u32 4294901760, %v21411_v6 }
 0xc26   :  { %v13878_v12 = vand.u32 4294901760, %v13852_v25 }
 0xc28   :  { %v21395_v54 = vpack.c.bf16 %v13881_v45, %v13878_v12  ;;  %v21404_v21 = vsub.f32 %v13852_v25, %v13878_v12 }
 0xc2a   :  { %v13968_v34 = vand.u32 4294901760, %v21404_v21 }
 0xc2c   :  { %v13969_v15 = vsub.f32 %v21404_v21, %v13968_v34 }
 0xc2f   :  { %v13354_v41 = vpop.f32.mrb[88].mxu1 }
 0xc30   :  { %v13363_v1 = vsel %vm2037_vm14, %v13354_v41, 0  ;;  %v17817_v44 = vpop.f32.mrb[89].mxu1  ;;  %v13970_v41 = vand.u32 4294901760, %v13969_v15 }
 0xc31   :  { %v13433_v46 = vand.u32 4294901760, %v13363_v1  ;;  %v13983_v44 = vsub.f32 %v21411_v6, %v13982_v28 }
 0xc33   :  { %v13434_v56 = vsub.f32 %v13363_v1, %v13433_v46  ;;  %17861 = vmatmul.mubr.f32.vlgmr.msra.gmra.mrb[90].mxu1 %v13433_v46  ;;  %v13977_v1 = vand.u32 4294901760, %v13976_v57  ;;  %v18761_v57 = vpack.c.bf16 %v21406_v20, %v21404_v21  ;;  %v18806_v20 = vpack.c.bf16 %v14017_v19, %v14010_v30 }
 0xc34   :  { %17898 = vmatprep.mubr.msk.f32.mxu1 %vm19240_vm0, %v19241_v10  ;;  %18726 = vmatpush3.bf16.msra.mxu1 %v21395_v54 }
 0xc35   :  { %v13435_v47 = vand.u32 4294901760, %v13434_v56  ;;  %18727 = vmatprep.subr.bf16.mxu1 %v19239_v3 }
 0xc37   :  { %v13436_v49 = vsub.f32 %v13434_v56, %v13435_v47 }
 0xc38   :  { %18729 = vmatpush3.bf16.msra.mxu1 %v21409_v60 }
 0xc39   :  { %v13437_v43 = vand.u32 4294901760, %v13436_v49  ;;  %18730 = vmatprep.subr.bf16.mxu1 %v19239_v3 }
 0xc3b   :  { %17825 = vmatmul.mubr.f32.vlgmr.msra.gmra.mrb[174].mxu0 %v13437_v43  ;;  %v14003_v43 = vand.u32 4294901760, %v21455_v40 }
 0xc3c   :  { %18711 = vmatpush3.bf16.msra.mxu0 %v18710_v24  ;;  %17833 = vmatprep.mubr.msk.f32.mxu0 %vm19240_vm0, %v19241_v10  ;;  %v13911_v24 = vand.u32 4294901760, %v13863_v23 }
 0xc3d   :  { %17831 = vmatprep.subr.mxu0 %v19241_v10  ;;  %18732 = vmatpush3.bf16.msra.mxu1 %v21423_v52  ;;  %v14004_v29 = vsub.f32 %v21455_v40, %v14003_v43 }
 0xc3e   :  { %18733 = vmatprep.subr.bf16.mxu1 %v19239_v3  ;;  %v21468_v39 = vpack.c.bf16 %v13911_v24, %v13908_v55  ;;  %v21472_v53 = vsub.f32 %v13863_v23, %v13911_v24 }
 0xc3f   :  { %v14005_v45 = vand.u32 4294901760, %v14004_v29 }
 0xc40   :  { %17832 = vmatpush3.msra.mxu0 %v13462_v11 }
 0xc41   :  { %17834 = vmatmul.mubr.f32.vlgmr.msra.gmra.mrb[176].mxu0 %v13433_v46  ;;  %18712 = vmatprep.subr.bf16.mxu0 %v19239_v3 }
 0xc42   :  { %18714 = vmatpush3.bf16.msra.mxu0 %v18713_v27  ;;  %17842 = vmatprep.mubr.msk.f32.mxu0 %vm19240_vm0, %v19241_v10  ;;  %v21453_v27 = vsub.f32 %v13856_v38, %v13890_v42  ;;  %v14018_v38 = vsub.f32 %v21459_v4, %v14017_v19  ;;  %v14499_v19 = vld [vmem:[%s21983_s15 + $0x60] sm:$0xf] }
 0xc43   :  { %17840 = vmatprep.subr.mxu0 %v19241_v10  ;;  %18735 = vmatpush3.bf16.msra.mxu1 %v21433_v9 }
 0xc44   :  { %18736 = vmatprep.subr.bf16.mxu1 %v19239_v3  ;;  %v13996_v50 = vand.u32 4294901760, %v21453_v27  ;;  %v14019_v42 = vand.u32 4294901760, %v14018_v38 }
 0xc46   :  { %17841 = vmatpush3.msra.mxu0 %v13459_v5  ;;  %v13861_v5 = vld [vmem:[%s21981_s13 + $0x48] sm:$0xff]  ;;  %v13997_v25 = vsub.f32 %v21453_v27, %v13996_v50  ;;  %v21524_v2 = vpack.c.bf16 %v14019_v42, %v14012_v33  ;;  %v18803_v21 = vpack.c.bf16 %v14003_v43, %v13996_v50 }
 0xc47   :  { %17843 = vmatmul.mubr.f32.vlgmr.msra.gmra.mrb[178].mxu0 %v13434_v56  ;;  %18715 = vmatprep.subr.bf16.mxu0 %v19239_v3  ;;  %v21500_v56 = vpack.c.bf16 %v13977_v1, %v13970_v41  ;;  %v18764_v41 = vpack.c.bf16 %v21413_v17, %v21411_v6  ;;  %v18767_v1 = vpack.c.bf16 %v21455_v40, %v21453_v27  ;;  %v21998_v27 = vand.u32 4294901760, %v21470_v48 }
 0xc48   :  { %18717 = vmatpush3.bf16.msra.mxu0 %v18707_v13  ;;  %17851 = vmatprep.mubr.msk.f32.mxu0 %vm19240_vm0, %v19241_v10  ;;  %v13998_v12 = vand.u32 4294901760, %v13997_v25  ;;  %v21999_v40 = vand.u32 4294901760, %v21472_v53 }
 0xc49   :  { %17849 = vmatprep.subr.mxu0 %v19241_v10 }
 0xc4a   :  { %v21514_v26 = vpack.c.bf16 %v14005_v45, %v13998_v12 }
 0xc4c   :  { %17850 = vmatpush3.msra.mxu0 %v21355_v61 }
 0xc4d   :  { %17852 = vmatmul.mubr.f32.vlgmr.msra.gmra.mrb[180].mxu0 %v13435_v47  ;;  %18721 = vmatprep.subr.bf16.mxu0 %v19239_v3  ;;  %v13984_v47 = vand.u32 4294901760, %v13983_v44  ;;  %v18770_v44 = vpack.c.bf16 %v21459_v4, %v21457_v22  ;;  %v14495_v22 = vld [vmem:[%s21983_s15 + $0x40] sm:$0xff]  ;;  %v14496_v4 = vld [vmem:[%s21983_s15 + $0x48] sm:$0xff] }
 0xc4e   :  { %18723 = vmatpush3.bf16.msra.mxu0 %v18707_v13  ;;  %17869 = vmatprep.mubr.msk.f32.mxu0 %vm19240_vm0, %v19241_v10  ;;  %v13905_v13 = vand.u32 4294901760, %v13861_v5 }
 0xc4f   :  { %17867 = vmatprep.subr.mxu0 %v19241_v10 }
 0xc50   :  { %v21466_v31 = vsub.f32 %v13861_v5, %v13905_v13 }
 0xc52   :  { %17868 = vmatpush3.msra.mxu0 %v21355_v61  ;;  %v13860_v61 = vld [vmem:[%s21981_s13 + $0x40] sm:$0xff]  ;;  %v21990_v51 = vand.u32 4294901760, %v21466_v31 }
 0xc53   :  { %17870 = vmatmul.mubr.f32.vlgmr.msra.gmra.mrb[182].mxu0 %v13433_v46  ;;  %18832 = vmatprep.subr.bf16.mxu0 %v19239_v3  ;;  %v13902_v7 = vand.u32 4294901760, %v13860_v61  ;;  %v13990_v46 = vsub.f32 %v21413_v17, %v13989_v32  ;;  %v21997_v17 = vand.u32 4294901760, %v21466_v31 }
 0xc54   :  { %18072 = vmatprep.mubr.msk.f32.mxu0 %vm19240_vm0, %v19241_v10  ;;  %v14032_v16 = vsub.f32 %v21466_v31, %v21990_v51 }
 0xc55   :  { %v21443_v14 = vpack.c.bf16 %v13905_v13, %v13902_v7  ;;  %v21464_v58 = vsub.f32 %v13860_v61, %v13902_v7  ;;  %v13991_v49 = vand.u32 4294901760, %v13990_v46  ;;  %v21989_v7 = vand.u32 4294901760, %v21470_v48 }
 0xc56   :  { %v14033_v5 = vand.u32 4294901760, %v14032_v16  ;;  %v21988_v13 = vand.u32 4294901760, %v21472_v53 }
 0xc57   :  { %18738 = vmatpush3.bf16.msra.mxu1 %v21443_v14  ;;  %v21504_v11 = vpack.c.bf16 %v13991_v49, %v13984_v47  ;;  %v21991_v36 = vand.u32 4294901760, %v21464_v58  ;;  %v14039_v23 = vsub.f32 %v21470_v48, %v21989_v7  ;;  %v18773_v46 = vpack.c.bf16 %v21466_v31, %v21464_v58 }
 0xc58   :  { %18739 = vmatprep.subr.bf16.mxu1 %v19239_v3  ;;  %v14046_v55 = vsub.f32 %v21472_v53, %v21988_v13  ;;  %v18776_v47 = vpack.c.bf16 %v21472_v53, %v21470_v48  ;;  %v15190_v13 = vld [vmem:[%s21980_s12] ss:$0 sm:$0xff]  ;;  %v21996_v6 = vand.u32 4294901760, %v21464_v58  ;;  %v14541_v31 = vand.u32 4294901760, %v14496_v4  ;;  %v14497_v48 = vld [vmem:[%s21983_s15 + $0x50] sm:$0xff]  ;;  %v14498_v53 = vld [vmem:[%s21983_s15 + $0x58] sm:$0xff] }
 0xc59   :  { %v14025_v37 = vsub.f32 %v21464_v58, %v21991_v36  ;;  %v14040_v24 = vand.u32 4294901760, %v14039_v23  ;;  %v14538_v58 = vand.u32 4294901760, %v14495_v22 }
 0xc5a   :  { %v14047_v8 = vand.u32 4294901760, %v14046_v55  ;;  %v21770_v30 = vsub.f32 %v14496_v4, %v14541_v31 }
 0xc5b   :  { %18741 = vmatpush3.bf16.msra.mxu1 %v21468_v39  ;;  %v14026_v61 = vand.u32 4294901760, %v14025_v37  ;;  %v21768_v43 = vsub.f32 %v14495_v22, %v14538_v58 }
 0xc5c   :  { %17896 = vmatprep.subr.mxu1 %v19241_v10  ;;  %v21542_v15 = vpack.c.bf16 %v14047_v8, %v14040_v24 }
 0xc5d   :  { %v21534_v18 = vpack.c.bf16 %v14033_v5, %v14026_v61 }
 0xc5f   :  { %17897 = vmatpush3.msra.mxu1 %v21481_v0 }
 0xc60   :  { %18742 = vmatprep.subr.bf16.mxu1 %v19239_v3 }
 0xd06   :  { %v13759_v49 = vpop.f32.mrb[90].mxu1 }
 0xd07   :  { %v17862_v25 = vpop.f32.mrb[91].mxu1 }
 0xd0e   :  { %v13439_v29 = vpop.f32.mrb[174].mxu0 }
 0xd0f   :  { %v17826_v12 = vpop.f32.mrb[175].mxu0 }
 0xd14   :  { %v13525_v45 = vpop.f32.mrb[176].mxu0 }
 0xd15   :  { %v13526_v59 = vadd.f32 %v13525_v45, %v13439_v29  ;;  %v17835_v38 = vpop.f32.mrb[177].mxu0  ;;  %v15191_v29 = vld [vmem:[%s21980_s12 + $0x1] ss:$0 sm:$0xff] }
 0xd1a   :  { %v13603_v33 = vpop.f32.mrb[178].mxu0 }
 0xd1b   :  { %v13604_v42 = vadd.f32 %v13603_v33, %v13526_v59  ;;  %v17844_v37 = vpop.f32.mrb[179].mxu0 }
 0xd20   :  { %v13679_v16 = vpop.f32.mrb[180].mxu0 }
 0xd21   :  { %v13680_v61 = vadd.f32 %v13679_v16, %v13604_v42  ;;  %v17853_v5 = vpop.f32.mrb[181].mxu0  ;;  %v14488_v16 = vld [vmem:[%s21983_s15 + $0x8] sm:$0xff] }
 0xd23   :  { %v13760_v23 = vadd.f32 %v13759_v49, %v13680_v61  ;;  %v14489_v61 = vld [vmem:[%s21983_s15 + $0x10] sm:$0xff] }
 0xd26   :  { %v13833_v55 = vpop.f32.mrb[182].mxu0 }
 0xd27   :  { %v13834_v24 = vadd.f32 %v13833_v55, %v13760_v23  ;;  %v17871_v8 = vpop.f32.mrb[183].mxu0  ;;  %v14517_v23 = vand.u32 4294901760, %v14488_v16  ;;  %v14520_v55 = vand.u32 4294901760, %v14489_v61 }
 0xd28   :  { %v14492_v8 = vld [vmem:[%s21983_s15 + $0x28] sm:$0xff] }
 0xd29   :  { %v13837_v25 = vadd.f32 %v13834_v24, %v21364_v35  ;;  %v14491_v24 = vld [vmem:[%s21983_s15 + $0x20] sm:$0xff] }
 0xd2b   :  { %v13843_v12 = vadd.f32 %v15190_v13, %v13837_v25  ;;  %v14487_v13 = vld [vmem:[%s21983_s15] sm:$0xff] }
 0xd2c   :  { %v14514_v5 = vand.u32 4294901760, %v14487_v13 }
 0xd2d   :  { %vm13845_vm5 = vcmp.gt.f32.partialorder %v13843_v12, 0.0  ;;  %v13850_v45 = vmul.f32 %v15191_v29, %v13843_v12  ;;  %v14526_v29 = vand.u32 4294901760, %v14491_v24 }
 0xd2f   :  { %v13851_v59 = vsel %vm13845_vm5, %v13843_v12, %v13850_v45  ;;  %v14529_v12 = vand.u32 4294901760, %v14492_v8  ;;  %v21596_v45 = vpack.c.bf16 %v14517_v23, %v14514_v5  ;;  %v21607_v7 = vsub.f32 %v14491_v24, %v14526_v29 }
 0xd30   :  { %v13872_v49 = vsel %vm13870_vm6, %v13851_v59, 0  ;;  %v21598_v59 = vsub.f32 %v14487_v13, %v14514_v5 }
 0xd31   :  { %v21564_v38 = vand.u32 4294901760, %v13872_v49  ;;  %18834 = vmatpush3.bf16.msra.mxu0 %v21596_v45  ;;  %v21612_v36 = vsub.f32 %v14492_v8, %v14529_v12  ;;  %v21622_v13 = vpack.c.bf16 %v14529_v12, %v14526_v29  ;;  %v14632_v29 = vand.u32 4294901760, %v21607_v7 }
 0xd32   :  { %18835 = vmatprep.subr.bf16.mxu0 %v19239_v3 }
 0xd33   :  { %v21567_v33 = vsub.f32 %v13872_v49, %v21564_v38  ;;  %v21600_v49 = vsub.f32 %v14488_v16, %v14517_v23  ;;  %v14639_v12 = vand.u32 4294901760, %v21612_v36 }
 0xd35   :  { %v13957_v42 = vand.u32 4294901760, %v21567_v33 }
 0xd37   :  { %v13958_v35 = vsub.f32 %v21567_v33, %v13957_v42 }
 0xd39   :  { %v13959_v37 = vand.u32 4294901760, %v13958_v35  ;;  %v21602_v35 = vsub.f32 %v14489_v61, %v14520_v55 }
 0xd3b   :  { %17899 = vmatmul.mubr.f32.vlgmr.msra.gmra.mrb[92].mxu1 %v13959_v37 }
 0xd3c   :  { %18744 = vmatpush3.bf16.msra.mxu1 %v21500_v56  ;;  %17927 = vmatprep.mubr.msk.f32.mxu1 %vm19240_vm0, %v19241_v10  ;;  %v14490_v56 = vld [vmem:[%s21983_s15 + $0x18] sm:$0xff] }
 0xd3d   :  { %18745 = vmatprep.subr.bf16.mxu1 %v19239_v3  ;;  %v14523_v25 = vand.u32 4294901760, %v14490_v56 }
 0xd3f   :  { %v21605_v37 = vsub.f32 %v14490_v56, %v14523_v25  ;;  %v21610_v51 = vpack.c.bf16 %v14523_v25, %v14520_v55 }
 0xd40   :  { %18747 = vmatpush3.bf16.msra.mxu1 %v21504_v11  ;;  %v21617_v11 = vsub.f32 %v21475_v62, %v21481_v0 }
 0xd41   :  { %18748 = vmatprep.subr.bf16.mxu1 %v19239_v3  ;;  %18837 = vmatpush3.bf16.msra.mxu0 %v21610_v51  ;;  %v14625_v61 = vand.u32 4294901760, %v21605_v37 }
 0xd42   :  { %18838 = vmatprep.subr.bf16.mxu0 %v19239_v3  ;;  %v14052_v16 = vand.u32 4294901760, %v21617_v11 }
 0xd43   :  { %v14626_v55 = vsub.f32 %v21605_v37, %v14625_v61 }
 0xd44   :  { %18750 = vmatpush3.bf16.msra.mxu1 %v21514_v26  ;;  %v14053_v62 = vsub.f32 %v21617_v11, %v14052_v16 }
 0xd45   :  { %18751 = vmatprep.subr.bf16.mxu1 %v19239_v3  ;;  %18840 = vmatpush3.bf16.msra.mxu0 %v21622_v13  ;;  %v14627_v25 = vand.u32 4294901760, %v14626_v55 }
 0xd46   :  { %18841 = vmatprep.subr.bf16.mxu0 %v19239_v3  ;;  %v14054_v26 = vand.u32 4294901760, %v14053_v62  ;;  %v14640_v62 = vsub.f32 %v21612_v36, %v14639_v12 }
 0xd48   :  { %18753 = vmatpush3.bf16.msra.mxu1 %v21524_v2  ;;  %v18797_v2 = vpack.c.bf16 %v13975_v63, %v13968_v34  ;;  %v18809_v34 = vpack.c.bf16 %v21997_v17, %v21996_v6  ;;  %v18812_v63 = vpack.c.bf16 %v21999_v40, %v21998_v27  ;;  %v14660_v40 = vand.u32 4294901760, %v21768_v43 }
 0xd49   :  { %18754 = vmatprep.subr.bf16.mxu1 %v19239_v3 }
 0xd4c   :  { %18756 = vmatpush3.bf16.msra.mxu1 %v21534_v18  ;;  %v18800_v18 = vpack.c.bf16 %v13989_v32, %v13982_v28  ;;  %v14547_v28 = vand.u32 4294901760, %v14498_v53 }
 0xd4d   :  { %18757 = vmatprep.subr.bf16.mxu1 %v19239_v3 }
 0xd50   :  { %18759 = vmatpush3.bf16.msra.mxu1 %v21542_v15 }
 0xd51   :  { %17925 = vmatprep.subr.mxu1 %v19241_v10 }
 0xd54   :  { %17926 = vmatpush3.msra.mxu1 %v14054_v26 }
 0xd55   :  { %17928 = vmatmul.mubr.f32.vlgmr.msra.gmra.mrb[92].mxu1 %v21564_v38  ;;  %18760 = vmatprep.subr.bf16.mxu1 %v19239_v3 }
 0xd56   :  { %18762 = vmatpush3.bf16.msra.mxu1 %v18761_v57  ;;  %17956 = vmatprep.mubr.msk.f32.mxu1 %vm19240_vm0, %v19241_v10 }
 0xd57   :  { %18763 = vmatprep.subr.bf16.mxu1 %v19239_v3 }
 0xd5a   :  { %18765 = vmatpush3.bf16.msra.mxu1 %v18764_v41  ;;  %v21779_v41 = vsub.f32 %v14498_v53, %v14547_v28 }
 0xd5b   :  { %18766 = vmatprep.subr.bf16.mxu1 %v19239_v3 }
 0xd5e   :  { %18768 = vmatpush3.bf16.msra.mxu1 %v18767_v1  ;;  %v21782_v1 = vsel %vm845_vm12, %v14499_v19, 0 }
 0xd5f   :  { %18769 = vmatprep.subr.bf16.mxu1 %v19239_v3 }
 0xd62   :  { %18771 = vmatpush3.bf16.msra.mxu1 %v18770_v44  ;;  %v14604_v44 = vand.u32 4294901760, %v21598_v59 }
 0xd63   :  { %18772 = vmatprep.subr.bf16.mxu1 %v19239_v3 }
 0xd66   :  { %18774 = vmatpush3.bf16.msra.mxu1 %v18773_v46  ;;  %v14611_v46 = vand.u32 4294901760, %v21600_v49 }
 0xd67   :  { %18775 = vmatprep.subr.bf16.mxu1 %v19239_v3 }
 0xd6a   :  { %18777 = vmatpush3.bf16.msra.mxu1 %v18776_v47  ;;  %v21788_v47 = vand.u32 4294901760, %v21782_v1 }
 0xd6b   :  { %17954 = vmatprep.subr.mxu1 %v19241_v10 }
 0xd6e   :  { %17955 = vmatpush3.msra.mxu1 %v21617_v11 }
 0xd6f   :  { %17957 = vmatmul.mubr.f32.vlgmr.msra.gmra.mrb[92].mxu1 %v21567_v33  ;;  %18778 = vmatprep.subr.bf16.mxu1 %v19239_v3  ;;  %v14612_v33 = vsub.f32 %v21600_v49, %v14611_v46 }
 0xd70   :  { %18780 = vmatpush3.bf16.msra.mxu1 %v21395_v54  ;;  %17985 = vmatprep.mubr.msk.f32.mxu1 %vm19240_vm0, %v19241_v10 }
 0xd71   :  { %18781 = vmatprep.subr.bf16.mxu1 %v19239_v3  ;;  %v14613_v23 = vand.u32 4294901760, %v14612_v33  ;;  %v18872_v33 = vpack.c.bf16 %v21605_v37, %v21602_v35 }
 0xd74   :  { %18783 = vmatpush3.bf16.msra.mxu1 %v21409_v60 }
 0xd75   :  { %18784 = vmatprep.subr.bf16.mxu1 %v19239_v3 }
 0xd78   :  { %18786 = vmatpush3.bf16.msra.mxu1 %v21423_v52 }
 0xd79   :  { %18787 = vmatprep.subr.bf16.mxu1 %v19239_v3 }
 0xd7c   :  { %18789 = vmatpush3.bf16.msra.mxu1 %v21433_v9 }
 0xd7d   :  { %18790 = vmatprep.subr.bf16.mxu1 %v19239_v3 }
 0xd80   :  { %18792 = vmatpush3.bf16.msra.mxu1 %v21443_v14 }
 0xd81   :  { %18793 = vmatprep.subr.bf16.mxu1 %v19239_v3 }
 0xd84   :  { %18795 = vmatpush3.bf16.msra.mxu1 %v21468_v39 }
 0xd85   :  { %17983 = vmatprep.subr.mxu1 %v19241_v10 }
 0xd88   :  { %17984 = vmatpush3.msra.mxu1 %v21481_v0 }
 0xd89   :  { %17986 = vmatmul.mubr.f32.vlgmr.msra.gmra.mrb[92].mxu1 %v13957_v42  ;;  %18796 = vmatprep.subr.bf16.mxu1 %v19239_v3  ;;  %v14618_v42 = vand.u32 4294901760, %v21602_v35 }
 0xd8a   :  { %18798 = vmatpush3.bf16.msra.mxu1 %v18797_v2  ;;  %18014 = vmatprep.mubr.msk.f32.mxu1 %vm19240_vm0, %v19241_v10  ;;  %v14641_v2 = vand.u32 4294901760, %v14640_v62 }
 0xd8b   :  { %18799 = vmatprep.subr.bf16.mxu1 %v19239_v3  ;;  %v14619_v56 = vsub.f32 %v21602_v35, %v14618_v42 }
 0xd8d   :  { %v14620_v8 = vand.u32 4294901760, %v14619_v56  ;;  %v18881_v56 = vpack.c.bf16 %v21770_v30, %v21768_v43 }
 0xd8e   :  { %18801 = vmatpush3.bf16.msra.mxu1 %v18800_v18 }
 0xd8f   :  { %18802 = vmatprep.subr.bf16.mxu1 %v19239_v3  ;;  %v18854_v11 = vpack.c.bf16 %v14627_v25, %v14620_v8  ;;  %v15192_v8 = vld [vmem:[%s21982_s14] ss:$0 sm:$0xff] }
 0xd92   :  { %18804 = vmatpush3.bf16.msra.mxu1 %v18803_v21 }
 0xd93   :  { %18805 = vmatprep.subr.bf16.mxu1 %v19239_v3 }
 0xd96   :  { %18807 = vmatpush3.bf16.msra.mxu1 %v18806_v20 }
 0xd97   :  { %18808 = vmatprep.subr.bf16.mxu1 %v19239_v3 }
 0xd9a   :  { %18810 = vmatpush3.bf16.msra.mxu1 %v18809_v34 }
 0xd9b   :  { %18811 = vmatprep.subr.bf16.mxu1 %v19239_v3 }
 0xd9e   :  { %18813 = vmatpush3.bf16.msra.mxu1 %v18812_v63  ;;  %v14667_v63 = vand.u32 4294901760, %v21770_v30 }
 0xd9f   :  { %18012 = vmatprep.subr.mxu1 %v19241_v10 }
 0xda0   :  { %v18917_v35 = vpack.c.bf16 %v14667_v63, %v14660_v40 }
 0xda2   :  { %18013 = vmatpush3.msra.mxu1 %v14052_v16  ;;  %v14633_v16 = vsub.f32 %v21607_v7, %v14632_v29 }
 0xda3   :  { %18015 = vmatmul.mubr.f32.vlgmr.msra.gmra.mrb[92].mxu1 %v21564_v38  ;;  %18814 = vmatprep.subr.bf16.mxu1 %v19239_v3 }
 0xda4   :  { %18816 = vmatpush3.bf16.msra.mxu1 %v21395_v54  ;;  %18043 = vmatprep.mubr.msk.f32.mxu1 %vm19240_vm0, %v19241_v10  ;;  %v14493_v54 = vld [vmem:[%s21983_s15 + $0x30] sm:$0xff]  ;;  %v14634_v26 = vand.u32 4294901760, %v14633_v16  ;;  %v15193_v16 = vld [vmem:[%s21982_s14 + $0x1] ss:$0 sm:$0xff] }
 0xda5   :  { %18817 = vmatprep.subr.bf16.mxu1 %v19239_v3 }
 0xda6   :  { %v18857_v20 = vpack.c.bf16 %v14641_v2, %v14634_v26 }
 0xda8   :  { %18819 = vmatpush3.bf16.msra.mxu1 %v21409_v60  ;;  %v14494_v60 = vld [vmem:[%s21983_s15 + $0x38] sm:$0xff] }
 0xda9   :  { %18820 = vmatprep.subr.bf16.mxu1 %v19239_v3 }
 0xdac   :  { %18822 = vmatpush3.bf16.msra.mxu1 %v21423_v52  ;;  %v14532_v52 = vand.u32 4294901760, %v14493_v54 }
 0xdad   :  { %18823 = vmatprep.subr.bf16.mxu1 %v19239_v3 }
 0xdae   :  { %v21764_v32 = vsub.f32 %v14493_v54, %v14532_v52 }
 0xdb0   :  { %18825 = vmatpush3.bf16.msra.mxu1 %v21433_v9  ;;  %v14535_v9 = vand.u32 4294901760, %v14494_v60  ;;  %v14646_v18 = vand.u32 4294901760, %v21764_v32 }
 0xdb1   :  { %18826 = vmatprep.subr.bf16.mxu1 %v19239_v3 }
 0xdb2   :  { %v21766_v50 = vsub.f32 %v14494_v60, %v14535_v9  ;;  %v14647_v6 = vsub.f32 %v21764_v32, %v14646_v18  ;;  %v14661_v60 = vsub.f32 %v21768_v43, %v14660_v40 }
 0xdb4   :  { %18828 = vmatpush3.bf16.msra.mxu1 %v21443_v14  ;;  %v21744_v14 = vpack.c.bf16 %v14535_v9, %v14532_v52  ;;  %v14653_v21 = vand.u32 4294901760, %v21766_v50  ;;  %v14648_v34 = vand.u32 4294901760, %v14647_v6  ;;  %v14668_v52 = vsub.f32 %v21770_v30, %v14667_v63 }
 0xdb5   :  { %18829 = vmatprep.subr.bf16.mxu1 %v19239_v3  ;;  %v14662_v9 = vand.u32 4294901760, %v14661_v60 }
 0xdb6   :  { %18843 = vmatpush3.bf16.msra.mxu0 %v21744_v14  ;;  %v14654_v17 = vsub.f32 %v21766_v50, %v14653_v21  ;;  %v14669_v22 = vand.u32 4294901760, %v14668_v52 }
 0xdb7   :  { %18844 = vmatprep.subr.bf16.mxu0 %v19239_v3 }
 0xdb8   :  { %18831 = vmatpush3.bf16.msra.mxu1 %v21468_v39  ;;  %v21754_v39 = vpack.c.bf16 %v14541_v31, %v14538_v58  ;;  %v14655_v27 = vand.u32 4294901760, %v14654_v17  ;;  %v14681_v58 = vand.u32 4294901760, %v21779_v41  ;;  %v18863_v31 = vpack.c.bf16 %v14669_v22, %v14662_v9 }
 0xdb9   :  { %18041 = vmatprep.subr.mxu1 %v19241_v10  ;;  %v21867_v22 = vsub.f32 %v21782_v1, %v21788_v47  ;;  %v18905_v1 = vpack.c.bf16 %v14611_v46, %v14604_v44 }
 0xdba   :  { %18846 = vmatpush3.bf16.msra.mxu0 %v21754_v39  ;;  %v18860_v54 = vpack.c.bf16 %v14655_v27, %v14648_v34  ;;  %v14682_v53 = vsub.f32 %v21779_v41, %v14681_v58 }
 0xdbb   :  { %18847 = vmatprep.subr.bf16.mxu0 %v19239_v3 }
 0xdbc   :  { %18042 = vmatpush3.msra.mxu1 %v21481_v0  ;;  %v14544_v0 = vand.u32 4294901760, %v14497_v48 }
 0xdbd   :  { %18044 = vmatmul.mubr.f32.vlgmr.msra.gmra.mrb[92].mxu1 %v21564_v38  ;;  %v14605_v38 = vsub.f32 %v21598_v59, %v14604_v44 }
 0xdbe   :  { %v21775_v15 = vpack.c.bf16 %v14547_v28, %v14544_v0  ;;  %v21777_v57 = vsub.f32 %v14497_v48, %v14544_v0  ;;  %v14683_v28 = vand.u32 4294901760, %v14682_v53 }
 0xdbf   :  { %v14606_v5 = vand.u32 4294901760, %v14605_v38  ;;  %v18869_v38 = vpack.c.bf16 %v21600_v49, %v21598_v59  ;;  %v18911_v59 = vpack.c.bf16 %v14639_v12, %v14632_v29  ;;  %v18914_v49 = vpack.c.bf16 %v14653_v21, %v14646_v18 }
 0xdc0   :  { %18849 = vmatpush3.bf16.msra.mxu0 %v21775_v15  ;;  %v14674_v4 = vand.u32 4294901760, %v21777_v57  ;;  %v18884_v55 = vpack.c.bf16 %v21779_v41, %v21777_v57 }
 0xdc1   :  { %18070 = vmatprep.subr.mxu0 %v19241_v10  ;;  %v18851_v24 = vpack.c.bf16 %v14613_v23, %v14606_v5  ;;  %v18875_v5 = vpack.c.bf16 %v21612_v36, %v21607_v7  ;;  %v18878_v23 = vpack.c.bf16 %v21766_v50, %v21764_v32 }
 0xdc2   :  { %v14675_v48 = vsub.f32 %v21777_v57, %v14674_v4  ;;  %v18920_v36 = vpack.c.bf16 %v14681_v58, %v14674_v4 }
 0xdc4   :  { %18071 = vmatpush3.msra.mxu0 %v21788_v47  ;;  %v14676_v0 = vand.u32 4294901760, %v14675_v48  ;;  %v14688_v48 = vand.u32 4294901760, %v21867_v22 }
 0xdc5   :  { %18850 = vmatprep.subr.bf16.mxu0 %v19239_v3 }
 0xdc6   :  { %v18866_v19 = vpack.c.bf16 %v14683_v28, %v14676_v0 }
 0xe90   :  { %v14475_v25 = vpop.f32.mrb[92].mxu1 }
 0xe91   :  { %v18945_v62 = vadd.f32 %v15192_v8, %v14475_v25  ;;  %v18045_v26 = vpop.f32.mrb[93].mxu1 }
 0xe93   :  { %vm14480_vm7 = vcmp.gt.f32.partialorder %v18945_v62, 0.0  ;;  %v14485_v2 = vmul.f32 %v18945_v62, %v15193_v16 }
 0xe95   :  { %v14486_v6 = vsel %vm14480_vm7, %v18945_v62, %v14485_v2 }
 0xe96   :  { %v14508_v17 = vsel %vm13870_vm6, %v14486_v6, 0 }
 0xe97   :  { %v21858_v34 = vand.u32 4294901760, %v14508_v17 }
 0xe99   :  { %v14592_v27 = vsub.f32 %v14508_v17, %v21858_v34 }
 0xe9b   :  { %v14593_v60 = vand.u32 4294901760, %v14592_v27 }
 0xe9d   :  { %v14594_v52 = vsub.f32 %v14592_v27, %v14593_v60 }
 0xe9f   :  { %v14595_v9 = vand.u32 4294901760, %v14594_v52 }
 0xea1   :  { %18073 = vmatmul.mubr.f32.vlgmr.msra.gmra.mrb[184].mxu0 %v14595_v9 }
 0xea2   :  { %18852 = vmatpush3.bf16.msra.mxu0 %v18851_v24  ;;  %18101 = vmatprep.mubr.msk.f32.mxu0 %vm19240_vm0, %v19241_v10  ;;  %v14689_v24 = vsub.f32 %v21867_v22, %v14688_v48 }
 0xea3   :  { %18853 = vmatprep.subr.bf16.mxu0 %v19239_v3 }
 0xea6   :  { %18855 = vmatpush3.bf16.msra.mxu0 %v18854_v11  ;;  %v14690_v11 = vand.u32 4294901760, %v14689_v24 }
 0xea7   :  { %18856 = vmatprep.subr.bf16.mxu0 %v19239_v3 }
 0xeaa   :  { %18858 = vmatpush3.bf16.msra.mxu0 %v18857_v20  ;;  %v18908_v20 = vpack.c.bf16 %v14625_v61, %v14618_v42 }
 0xeab   :  { %18859 = vmatprep.subr.bf16.mxu0 %v19239_v3 }
 0xeae   :  { %18861 = vmatpush3.bf16.msra.mxu0 %v18860_v54 }
 0xeaf   :  { %18862 = vmatprep.subr.bf16.mxu0 %v19239_v3 }
 0xeb2   :  { %18864 = vmatpush3.bf16.msra.mxu0 %v18863_v31 }
 0xeb3   :  { %18865 = vmatprep.subr.bf16.mxu0 %v19239_v3 }
 0xeb6   :  { %18867 = vmatpush3.bf16.msra.mxu0 %v18866_v19 }
 0xeb7   :  { %18099 = vmatprep.subr.mxu0 %v19241_v10 }
 0xeba   :  { %18100 = vmatpush3.msra.mxu0 %v14690_v11 }
 0xebb   :  { %18102 = vmatmul.mubr.f32.vlgmr.msra.gmra.mrb[184].mxu0 %v21858_v34  ;;  %18868 = vmatprep.subr.bf16.mxu0 %v19239_v3 }
 0xebc   :  { %18870 = vmatpush3.bf16.msra.mxu0 %v18869_v38  ;;  %18130 = vmatprep.mubr.msk.f32.mxu0 %vm19240_vm0, %v19241_v10 }
 0xebd   :  { %18871 = vmatprep.subr.bf16.mxu0 %v19239_v3 }
 0xec0   :  { %18873 = vmatpush3.bf16.msra.mxu0 %v18872_v33 }
 0xec1   :  { %18874 = vmatprep.subr.bf16.mxu0 %v19239_v3 }
 0xec4   :  { %18876 = vmatpush3.bf16.msra.mxu0 %v18875_v5 }
 0xec5   :  { %18877 = vmatprep.subr.bf16.mxu0 %v19239_v3 }
 0xec8   :  { %18879 = vmatpush3.bf16.msra.mxu0 %v18878_v23 }
 0xec9   :  { %18880 = vmatprep.subr.bf16.mxu0 %v19239_v3 }
 0xecc   :  { %18882 = vmatpush3.bf16.msra.mxu0 %v18881_v56 }
 0xecd   :  { %18883 = vmatprep.subr.bf16.mxu0 %v19239_v3 }
 0xed0   :  { %18885 = vmatpush3.bf16.msra.mxu0 %v18884_v55 }
 0xed1   :  { %18128 = vmatprep.subr.mxu0 %v19241_v10 }
 0xed4   :  { %18129 = vmatpush3.msra.mxu0 %v21867_v22 }
 0xed5   :  { %18131 = vmatmul.mubr.f32.vlgmr.msra.gmra.mrb[184].mxu0 %v14592_v27  ;;  %18886 = vmatprep.subr.bf16.mxu0 %v19239_v3 }
 0xed6   :  { %18888 = vmatpush3.bf16.msra.mxu0 %v21596_v45  ;;  %18159 = vmatprep.mubr.msk.f32.mxu0 %vm19240_vm0, %v19241_v10 }
 0xed7   :  { %18889 = vmatprep.subr.bf16.mxu0 %v19239_v3 }
 0xeda   :  { %18891 = vmatpush3.bf16.msra.mxu0 %v21610_v51 }
 0xedb   :  { %18892 = vmatprep.subr.bf16.mxu0 %v19239_v3 }
 0xede   :  { %18894 = vmatpush3.bf16.msra.mxu0 %v21622_v13 }
 0xedf   :  { %18895 = vmatprep.subr.bf16.mxu0 %v19239_v3 }
 0xee2   :  { %18897 = vmatpush3.bf16.msra.mxu0 %v21744_v14 }
 0xee3   :  { %18898 = vmatprep.subr.bf16.mxu0 %v19239_v3 }
 0xee6   :  { %18900 = vmatpush3.bf16.msra.mxu0 %v21754_v39 }
 0xee7   :  { %18901 = vmatprep.subr.bf16.mxu0 %v19239_v3 }
 0xeea   :  { %18903 = vmatpush3.bf16.msra.mxu0 %v21775_v15 }
 0xeeb   :  { %18157 = vmatprep.subr.mxu0 %v19241_v10 }
 0xeee   :  { %18158 = vmatpush3.msra.mxu0 %v21788_v47 }
 0xeef   :  { %18160 = vmatmul.mubr.f32.vlgmr.msra.gmra.mrb[184].mxu0 %v14593_v60  ;;  %18904 = vmatprep.subr.bf16.mxu0 %v19239_v3 }
 0xef0   :  { %18906 = vmatpush3.bf16.msra.mxu0 %v18905_v1  ;;  %18188 = vmatprep.mubr.msk.f32.mxu0 %vm19240_vm0, %v19241_v10 }
 0xef1   :  { %18907 = vmatprep.subr.bf16.mxu0 %v19239_v3 }
 0xef4   :  { %18909 = vmatpush3.bf16.msra.mxu0 %v18908_v20 }
 0xef5   :  { %18910 = vmatprep.subr.bf16.mxu0 %v19239_v3 }
 0xef8   :  { %18912 = vmatpush3.bf16.msra.mxu0 %v18911_v59 }
 0xef9   :  { %18913 = vmatprep.subr.bf16.mxu0 %v19239_v3 }
 0xefc   :  { %18915 = vmatpush3.bf16.msra.mxu0 %v18914_v49 }
 0xefd   :  { %18916 = vmatprep.subr.bf16.mxu0 %v19239_v3 }
 0xf00   :  { %18918 = vmatpush3.bf16.msra.mxu0 %v18917_v35 }
 0xf01   :  { %18919 = vmatprep.subr.bf16.mxu0 %v19239_v3 }
 0xf04   :  { %18921 = vmatpush3.bf16.msra.mxu0 %v18920_v36 }
 0xf05   :  { %18186 = vmatprep.subr.mxu0 %v19241_v10 }
 0xf08   :  { %18187 = vmatpush3.msra.mxu0 %v14688_v48 }
 0xf09   :  { %18189 = vmatmul.mubr.f32.vlgmr.msra.gmra.mrb[184].mxu0 %v21858_v34  ;;  %18922 = vmatprep.subr.bf16.mxu0 %v19239_v3 }
 0xf0a   :  { %18924 = vmatpush3.bf16.msra.mxu0 %v21596_v45  ;;  %18217 = vmatprep.mubr.msk.f32.mxu0 %vm19240_vm0, %v19241_v10  ;;  %vm15121_vm0 = vcmask 17408  }
 0xf0b   :  { %18925 = vmatprep.subr.bf16.mxu0 %v19239_v3 }
 0xf0e   :  { %18927 = vmatpush3.bf16.msra.mxu0 %v21610_v51  ;;  %v15194_v51 = vld [vmem:[%s21984_s16] ss:$0 sm:$0xff] }
 0xf0f   :  { %18928 = vmatprep.subr.bf16.mxu0 %v19239_v3 }
 0xf12   :  { %18930 = vmatpush3.bf16.msra.mxu0 %v21622_v13 }
 0xf13   :  { %18931 = vmatprep.subr.bf16.mxu0 %v19239_v3 }
 0xf16   :  { %18933 = vmatpush3.bf16.msra.mxu0 %v21744_v14 }
 0xf17   :  { %18934 = vmatprep.subr.bf16.mxu0 %v19239_v3 }
 0xf1a   :  { %18936 = vmatpush3.bf16.msra.mxu0 %v21754_v39 }
 0xf1b   :  { %18937 = vmatprep.subr.bf16.mxu0 %v19239_v3 }
 0xf1e   :  { %18939 = vmatpush3.bf16.msra.mxu0 %v21775_v15 }
 0xf1f   :  { %18215 = vmatprep.subr.mxu0 %v19241_v10 }
 0xf22   :  { %18216 = vmatpush3.msra.mxu0 %v21788_v47 }
 0xf23   :  { %18218 = vmatmul.mubr.f32.vlgmr.msra.gmra.mrb[184].mxu0 %v21858_v34 }
 0xff6   :  { %v15111_v7 = vpop.f32.mrb[184].mxu0 }
 0xff7   :  { %v18946_v45 = vadd.f32 %v15194_v51, %v15111_v7  ;;  %v18219_v37 = vpop.f32.mrb[185].mxu0 }
 0xff9   :  { %v15195_v13 = vmul.f32 -1.442695, %v18946_v45 }
 0xffb   :  { %19211 = vpow2.f32 %v15195_v13 }
0x1005   :  { %v19212_v14 = vpop.eup %19211 }
0x1006   :  { %v15118_v39 = vadd.f32 1.0, %v19212_v14 }
0x1008   :  { %19213 = vrcp.f32 %v15118_v39 }
0x1012   :  { %v19214_v3 = vpop.eup %19213 }
0x1013   :  { %15122 = vst.msk [vmem:[#allocation2] sm:$0x3] %vm15121_vm0, %v19214_v3 }
0x1014   :  { %19226 = shalt.err (!%p19223_p4)
}
0x1015   :  { %s19227_s6 = scalar_lea.hbm %s21985_s17, 32 }
0x1016   :  { %p19228_p5 = scmp.ne.s32.totalorder %s21985_s17, %s19227_s6  ;;  %p19231_p6 = scmp.lt.u32.totalorder %s19227_s6, %s21985_s17 }
0x1018   :  { %p19233_p7 = pnand %p19231_p6, %p19228_p5 }
0x101a   :  { %19236 = shalt.err (!%p19233_p7)
}
0x101b   :  { %15132 = dma.vmem_to_hbm [thread:$0]  %s15130_s30, 32, %s21985_s17, [#allocation3]  }
0x101c   :  { %19237 = dma.done.wait [#allocation3], 32  }
0x101d   :  { %19238 = vsyncadd [#allocation3], 4294967264 }
0x101e   :  { %15136 = vsyncpa [#allocation3], 1 }

</bundles_post_ra>
